<compile_context>
chip_gen: v6e
topology: v6e:2x2x1
jax: 0.10.0
libtpu: 0.0.40
codegen_flags: <defaults>
</compile_context>

<pallas_src>
import functools

import jax
import jax.numpy as jnp
import numpy as np
from jax.experimental import pallas as pl
from jax.experimental.pallas import tpu as pltpu

# --- module hyper-params ---
D = 8              # number of Linear layers in feature_out
W = 256            # hidden width
FEAT_DIM = 32      # args.deform_feat_dim
N_OFFSETS = 10     # args.deform_n_offsets
OFF_DIM = N_OFFSETS * 3
INPUT_CH = 27
INPUT_CH_TIME = 9


def _pick_tm(n):
    """Adaptive rows-per-grid-step.

    Small N: ~2 steps so both v7x TensorCores get work.  Large N: up to 1024
    rows per step to amortize the ~0.35us per-step overhead while staying well
    inside VMEM (weights are double-buffered constants)."""
    if n <= 512:
        half = (n + 1) // 2
        return max(8, ((half + 7) // 8) * 8)
    return int(min(1024, max(256, (n // 8) // 256 * 256)))


def deform_kernel(xt_ref, feat_ref, offs_ref, scal_ref, dyn_ref,
                  w0_ref, b0_ref, wm_ref, bm_ref, wh1_ref, bh1_ref,
                  wp2_ref, bp2_ref, wf2_ref, bf2_ref,
                  wo2_ref, bo2_ref, ws2_ref, bs2_ref,
                  pts_ref, featd_ref, offsd_ref, scald_ref):
    bf16 = jnp.bfloat16
    relu = lambda v: jnp.maximum(v, 0)
    # bf16 operands, f32 MXU accumulation (weights/biases are pre-cast bf16).
    mm = lambda a, b: jnp.dot(a.astype(bf16), b, preferred_element_type=jnp.float32)

    xt = xt_ref[...]                                     # [TM, 8] f32: xyz | t | 0

    # --- query_time: feature_out = Linear(4,W) + (D-1) x [ReLU, Linear(W,W)]
    # hidden activations kept in bf16 (bias add + relu on packed bf16 vregs).
    h = mm(xt, w0_ref[...]).astype(bf16) + b0_ref[...]
    bm = bm_ref[...]
    for i in range(D - 1):                               # static unroll
        h = mm(relu(h), wm_ref[i]).astype(bf16) + bm[i:i + 1, :]

    # --- deform heads: [ReLU, Linear(W,W), ReLU, Linear(W,out)] x 4.
    rh = relu(h)                                         # shared across heads
    g = relu(mm(rh, wh1_ref[...]).astype(bf16) + bh1_ref[...])   # [TM, 4W] bf16

    # Second layers: one dot per head; RHS is zero-padded to 128 output lanes
    # so each delta slice starts at lane 0 (same MXU cost as the fused
    # block-diagonal variant, no cross-lane shuffles).  Deltas stay f32.
    dp = mm(g[:, 0 * W:1 * W], wp2_ref[...])[:, :3] + bp2_ref[...]
    df = mm(g[:, 1 * W:2 * W], wf2_ref[...])[:, :FEAT_DIM] + bf2_ref[...]
    do = mm(g[:, 2 * W:3 * W], wo2_ref[...])[:, :OFF_DIM] + bo2_ref[...]
    ds = mm(g[:, 3 * W:4 * W], ws2_ref[...])[:, :6] + bs2_ref[...]

    # dynamics: tanh activation, 'mul' type (global -> anchor, local -> rest).
    dyn = jnp.tanh(dyn_ref[...])                         # [TM, 2] f32
    da = dyn[:, 0:1]
    dl = dyn[:, 1:2]

    # static_mlp=False, empty_voxel=False -> mask == 1 -> plain residual add.
    pts_ref[...] = xt[:, :3] + dp * da
    featd_ref[...] = feat_ref[...] + df * dl
    offsd_ref[...] = offs_ref[...] + do * dl
    scald_ref[...] = scal_ref[...] + ds * dl


def _prep_weights(p):
    """Fuse / pad / pre-cast the PyTorch-style params into the kernel layout."""
    f32, bf16 = jnp.float32, jnp.bfloat16

    # Linear(4, W) -> [8, W]: rows 0-2 xyz, row 3 time, rows 4-7 zero (keeps
    # the contraction at the native sublane tile of 8).
    w0p = jnp.zeros((8, W), f32).at[:4, :].set(p['w0']).astype(bf16)

    # 4 head first layers fused along the output dim: [W, 4W].
    wh1 = jnp.concatenate([p['wh1'][j] for j in range(4)], axis=1).astype(bf16)
    bh1 = jnp.concatenate([p['bh1'][j][None, :] for j in range(4)], axis=1).astype(bf16)

    # Head second layers zero-padded to 128 output lanes (lane-0 aligned).
    def pad128(w):
        return jnp.zeros((W, 128), f32).at[:, :w.shape[1]].set(w).astype(bf16)

    return dict(
        w0=w0p, b0=p['b0'].astype(bf16),
        wm=p['wm'].astype(bf16), bm=p['bm'].astype(bf16),
        wh1=wh1, bh1=bh1,
        wp2=pad128(p['wp2']), bp2=p['bp2'],
        wf2=pad128(p['wf2']), bf2=p['bf2'],
        wo2=pad128(p['wo2']), bo2=p['bo2'],
        ws2=pad128(p['ws2']), bs2=p['bs2'],
    )


_WEIGHT_ORDER = ['w0', 'b0', 'wm', 'bm', 'wh1', 'bh1',
                 'wp2', 'bp2', 'wf2', 'bf2', 'wo2', 'bo2', 'ws2', 'bs2']


@jax.jit
def deformation_anchor_forward(params, rays_pts_emb, feat, grid_offsets,
                               grid_scaling, dynamics, time_emb):
    N = rays_pts_emb.shape[0]
    tm = _pick_tm(N)
    grid = (pl.cdiv(N, tm),)

    # Tiny [N,8] slab (xyz | t | zeros) — the only wrapper-side data movement;
    # everything else is fed to the kernel in its original narrow layout.
    xt = jnp.concatenate(
        [rays_pts_emb[:, :3], time_emb[:, :1],
         jnp.zeros((N, 4), jnp.float32)], axis=-1)
    offs_flat = grid_offsets.reshape(N, OFF_DIM)

    kp = _prep_weights(params)

    def row_spec(width):
        return pl.BlockSpec((tm, width), lambda i: (i, 0))

    def full_spec(arr):
        return pl.BlockSpec(arr.shape, lambda i, r=arr.ndim: (0,) * r)

    pts, featd, offsd, scald = pl.pallas_call(
        deform_kernel,
        out_shape=(jax.ShapeDtypeStruct((N, 3), jnp.float32),
                   jax.ShapeDtypeStruct((N, FEAT_DIM), jnp.float32),
                   jax.ShapeDtypeStruct((N, OFF_DIM), jnp.float32),
                   jax.ShapeDtypeStruct((N, 6), jnp.float32)),
        grid_spec=pltpu.PrefetchScalarGridSpec(
            num_scalar_prefetch=0,
            grid=grid,
            in_specs=[row_spec(8), row_spec(FEAT_DIM), row_spec(OFF_DIM),
                      row_spec(6), row_spec(2)]
                     + [full_spec(kp[k]) for k in _WEIGHT_ORDER],
            out_specs=[row_spec(3), row_spec(FEAT_DIM), row_spec(OFF_DIM),
                       row_spec(6)],
        ),
        compiler_params=pltpu.CompilerParams(
            dimension_semantics=("parallel",),
            vmem_limit_bytes=48 << 20),
    )(xt, feat, offs_flat, grid_scaling, dynamics,
      *[kp[k] for k in _WEIGHT_ORDER])

    return pts, featd, offsd.reshape(N, N_OFFSETS, 3), scald


def init_params(key):
    """Deterministic synthetic weights, PyTorch-Linear-style uniform init."""
    def linear(k, fan_in, fan_out):
        kw, kb = jax.random.split(k)
        bound = 1.0 / np.sqrt(fan_in)
        w = jax.random.uniform(kw, (fan_in, fan_out), jnp.float32, -bound, bound)
        b = jax.random.uniform(kb, (1, fan_out), jnp.float32, -bound, bound)
        return w, b

    keys = jax.random.split(key, 16)
    params = {}
    params['w0'], params['b0'] = linear(keys[0], 4, W)

    wm, bm = [], []
    for i in range(D - 1):
        w, b = linear(keys[1 + i], W, W)
        wm.append(w)
        bm.append(b[0])
    params['wm'] = jnp.stack(wm)          # [D-1, W, W]
    params['bm'] = jnp.stack(bm)          # [D-1, W]

    wh1, bh1 = [], []
    for j in range(4):                    # pos / feature / offsets / scaling heads
        w, b = linear(keys[8 + j], W, W)
        wh1.append(w)
        bh1.append(b[0])
    params['wh1'] = jnp.stack(wh1)        # [4, W, W]
    params['bh1'] = jnp.stack(bh1)        # [4, W]

    params['wp2'], params['bp2'] = linear(keys[12], W, 3)
    params['wf2'], params['bf2'] = linear(keys[13], W, FEAT_DIM)
    params['wo2'], params['bo2'] = linear(keys[14], W, OFF_DIM)
    params['ws2'], params['bs2'] = linear(keys[15], W, 6)
    return params


def reference_forward(params, rays_pts_emb, feat, grid_offsets,
                      grid_scaling, dynamics, time_emb):
    """Pure-JAX reference for the PyTorch forward_dynamic (no_grid branch),
    mirroring the kernel's numerics: bf16 matmul operands with f32 MXU
    accumulation and bf16 hidden activations (weights here are synthetic, so
    bf16 at layer boundaries is the intended precision)."""
    p = params
    bf16 = jnp.bfloat16
    relu = lambda v: jnp.maximum(v, 0)
    mm = lambda a, b: jnp.dot(a.astype(bf16), b.astype(bf16),
                              preferred_element_type=jnp.float32)

    xyz = rays_pts_emb[:, :3]
    t = time_emb[:, :1]
    x0 = jnp.concatenate([xyz, t], -1)
    h = mm(x0, p['w0']).astype(bf16) + p['b0'].astype(bf16)
    for i in range(D - 1):
        h = mm(relu(h), p['wm'][i]).astype(bf16) + p['bm'][i].astype(bf16)
    rh = relu(h)

    def head(j, w2, b2):
        g = relu(mm(rh, p['wh1'][j]).astype(bf16) + p['bh1'][j].astype(bf16))
        return mm(g, w2) + b2

    da = jnp.tanh(dynamics[:, 0:1])
    dl = jnp.tanh(dynamics[:, 1:2])

    # static_mlp=False, empty_voxel=False -> mask == 1.
    pts = xyz + head(0, p['wp2'], p['bp2']) * da
    featd = feat + head(1, p['wf2'], p['bf2']) * dl
    offs = grid_offsets.reshape(-1, OFF_DIM)
    offsd = (offs + head(2, p['wo2'], p['bo2']) * dl).reshape(-1, N_OFFSETS, 3)
    scald = grid_scaling + head(3, p['ws2'], p['bs2']) * dl
    return pts, featd, offsd, scald


if __name__ == "__main__":
    key = jax.random.PRNGKey(0)
    kparam, k1, k2, k3, k4, k5, k6 = jax.random.split(key, 7)

    N = 300  # not a multiple of the tile -> exercises the ragged last block
    params = init_params(kparam)
    rays_pts_emb = jax.random.normal(k1, (N, INPUT_CH), jnp.float32)
    feat = jax.random.normal(k2, (N, FEAT_DIM), jnp.float32)
    grid_offsets = jax.random.normal(k3, (N, N_OFFSETS, 3), jnp.float32)
    grid_scaling = jax.random.normal(k4, (N, 6), jnp.float32)
    dynamics = jax.random.normal(k5, (N, 2), jnp.float32)
    time_emb = jax.random.normal(k6, (N, INPUT_CH_TIME), jnp.float32)

    outs = deformation_anchor_forward(params, rays_pts_emb, feat, grid_offsets,
                                      grid_scaling, dynamics, time_emb)
    outs = jax.block_until_ready(outs)

    refs = reference_forward(params, rays_pts_emb, feat, grid_offsets,
                             grid_scaling, dynamics, time_emb)
    for o, r in zip(outs, refs):
        np.testing.assert_allclose(np.asarray(o), np.asarray(r),
                                   rtol=1e-2, atol=1e-2)

    print("KERNEL_OK")
</pallas_src>

<mosaic_0001>
module attributes {stable_mosaic.version = 11 : i64} {
  func.func @deform_kernel(%arg0: i32, %arg1: memref<152x8xf32, #tpu.memory_space<vmem>>, %arg2: memref<152x32xf32, #tpu.memory_space<vmem>>, %arg3: memref<152x30xf32, #tpu.memory_space<vmem>>, %arg4: memref<152x6xf32, #tpu.memory_space<vmem>>, %arg5: memref<152x2xf32, #tpu.memory_space<vmem>>, %arg6: memref<8x256xbf16, #tpu.memory_space<vmem>>, %arg7: memref<1x256xbf16, #tpu.memory_space<vmem>>, %arg8: memref<7x256x256xbf16, #tpu.memory_space<vmem>>, %arg9: memref<7x256xbf16, #tpu.memory_space<vmem>>, %arg10: memref<256x1024xbf16, #tpu.memory_space<vmem>>, %arg11: memref<1x1024xbf16, #tpu.memory_space<vmem>>, %arg12: memref<256x128xbf16, #tpu.memory_space<vmem>>, %arg13: memref<1x3xf32, #tpu.memory_space<vmem>>, %arg14: memref<256x128xbf16, #tpu.memory_space<vmem>>, %arg15: memref<1x32xf32, #tpu.memory_space<vmem>>, %arg16: memref<256x128xbf16, #tpu.memory_space<vmem>>, %arg17: memref<1x30xf32, #tpu.memory_space<vmem>>, %arg18: memref<256x128xbf16, #tpu.memory_space<vmem>>, %arg19: memref<1x6xf32, #tpu.memory_space<vmem>>, %arg20: memref<152x3xf32, #tpu.memory_space<vmem>>, %arg21: memref<152x32xf32, #tpu.memory_space<vmem>>, %arg22: memref<152x30xf32, #tpu.memory_space<vmem>>, %arg23: memref<152x6xf32, #tpu.memory_space<vmem>>) attributes {dimension_semantics = [#tpu.dimension_semantics<parallel>], iteration_bounds = array<i64: 2>, scalar_prefetch = 0 : i64, scratch_operands = 0 : i64, tpu.core_type = #tpu.core_type<tc>, window_params = [{transform_indices = @transform_0, window_bounds = array<i64: 152, 8>}, {transform_indices = @transform_1, window_bounds = array<i64: 152, 32>}, {transform_indices = @transform_2, window_bounds = array<i64: 152, 30>}, {transform_indices = @transform_3, window_bounds = array<i64: 152, 6>}, {transform_indices = @transform_4, window_bounds = array<i64: 152, 2>}, {pipeline_mode = #tpu.pipeline_mode<synchronous>, transform_indices = @transform_5, window_bounds = array<i64: 8, 256>}, {pipeline_mode = #tpu.pipeline_mode<synchronous>, transform_indices = @transform_6, window_bounds = array<i64: 1, 256>}, {pipeline_mode = #tpu.pipeline_mode<synchronous>, transform_indices = @transform_7, window_bounds = array<i64: 7, 256, 256>}, {pipeline_mode = #tpu.pipeline_mode<synchronous>, transform_indices = @transform_8, window_bounds = array<i64: 7, 256>}, {pipeline_mode = #tpu.pipeline_mode<synchronous>, transform_indices = @transform_9, window_bounds = array<i64: 256, 1024>}, {pipeline_mode = #tpu.pipeline_mode<synchronous>, transform_indices = @transform_10, window_bounds = array<i64: 1, 1024>}, {pipeline_mode = #tpu.pipeline_mode<synchronous>, transform_indices = @transform_11, window_bounds = array<i64: 256, 128>}, {pipeline_mode = #tpu.pipeline_mode<synchronous>, transform_indices = @transform_12, window_bounds = array<i64: 1, 3>}, {pipeline_mode = #tpu.pipeline_mode<synchronous>, transform_indices = @transform_13, window_bounds = array<i64: 256, 128>}, {pipeline_mode = #tpu.pipeline_mode<synchronous>, transform_indices = @transform_14, window_bounds = array<i64: 1, 32>}, {pipeline_mode = #tpu.pipeline_mode<synchronous>, transform_indices = @transform_15, window_bounds = array<i64: 256, 128>}, {pipeline_mode = #tpu.pipeline_mode<synchronous>, transform_indices = @transform_16, window_bounds = array<i64: 1, 30>}, {pipeline_mode = #tpu.pipeline_mode<synchronous>, transform_indices = @transform_17, window_bounds = array<i64: 256, 128>}, {pipeline_mode = #tpu.pipeline_mode<synchronous>, transform_indices = @transform_18, window_bounds = array<i64: 1, 6>}, {transform_indices = @transform_19, window_bounds = array<i64: 152, 3>}, {transform_indices = @transform_20, window_bounds = array<i64: 152, 32>}, {transform_indices = @transform_21, window_bounds = array<i64: 152, 30>}, {transform_indices = @transform_22, window_bounds = array<i64: 152, 6>}]} {
    %c0 = arith.constant 0 : index
    %c0_0 = arith.constant 0 : index
    %0 = vector.load %arg1[%c0, %c0_0] : memref<152x8xf32, #tpu.memory_space<vmem>>, vector<152x8xf32>
    %c0_1 = arith.constant 0 : index
    %c0_2 = arith.constant 0 : index
    %1 = vector.load %arg6[%c0_1, %c0_2] : memref<8x256xbf16, #tpu.memory_space<vmem>>, vector<8x256xbf16>
    %2 = arith.truncf %0 : vector<152x8xf32> to vector<152x8xbf16>
    %cst = arith.constant dense<0.000000e+00> : vector<152x256xf32>
    %3 = tpu.matmul %2, %1, %cst {dimension_numbers = #tpu.dot_dimension_numbers<[1], [0], [0], [1], [0, 0, 1, 1], [], []>} : vector<152x8xbf16>, vector<8x256xbf16>, vector<152x256xf32> -> vector<152x256xf32>
    %4 = arith.truncf %3 : vector<152x256xf32> to vector<152x256xbf16>
    %c0_3 = arith.constant 0 : index
    %c0_4 = arith.constant 0 : index
    %5 = vector.load %arg7[%c0_3, %c0_4] : memref<1x256xbf16, #tpu.memory_space<vmem>>, vector<1x256xbf16>
    %6 = vector.broadcast %5 : vector<1x256xbf16> to vector<152x256xbf16>
    %7 = arith.addf %4, %6 : vector<152x256xbf16>
    %c0_5 = arith.constant 0 : index
    %c0_6 = arith.constant 0 : index
    %8 = vector.load %arg9[%c0_5, %c0_6] : memref<7x256xbf16, #tpu.memory_space<vmem>>, vector<7x256xbf16>
    %cst_7 = arith.constant 0.000000e+00 : bf16
    %9 = vector.broadcast %cst_7 : bf16 to vector<152x256xbf16>
    %10 = arith.maximumf %7, %9 : vector<152x256xbf16>
    %c0_8 = arith.constant 0 : index
    %c0_9 = arith.constant 0 : index
    %c0_10 = arith.constant 0 : index
    %11 = vector.load %arg8[%c0_8, %c0_9, %c0_10] : memref<7x256x256xbf16, #tpu.memory_space<vmem>>, vector<1x256x256xbf16>
    %12 = vector.shape_cast %11 : vector<1x256x256xbf16> to vector<256x256xbf16>
    %cst_11 = arith.constant dense<0.000000e+00> : vector<152x256xf32>
    %13 = tpu.matmul %10, %12, %cst_11 {dimension_numbers = #tpu.dot_dimension_numbers<[1], [0], [0], [1], [0, 0, 1, 1], [], []>} : vector<152x256xbf16>, vector<256x256xbf16>, vector<152x256xf32> -> vector<152x256xf32>
    %14 = arith.truncf %13 : vector<152x256xf32> to vector<152x256xbf16>
    %15 = vector.extract_strided_slice %8 {offsets = [0, 0], sizes = [1, 256], strides = [1, 1]} : vector<7x256xbf16> to vector<1x256xbf16>
    %16 = vector.broadcast %15 : vector<1x256xbf16> to vector<152x256xbf16>
    %17 = arith.addf %14, %16 : vector<152x256xbf16>
    %cst_12 = arith.constant 0.000000e+00 : bf16
    %18 = vector.broadcast %cst_12 : bf16 to vector<152x256xbf16>
    %19 = arith.maximumf %17, %18 : vector<152x256xbf16>
    %c1 = arith.constant 1 : index
    %c0_13 = arith.constant 0 : index
    %c0_14 = arith.constant 0 : index
    %20 = vector.load %arg8[%c1, %c0_13, %c0_14] : memref<7x256x256xbf16, #tpu.memory_space<vmem>>, vector<1x256x256xbf16>
    %21 = vector.shape_cast %20 : vector<1x256x256xbf16> to vector<256x256xbf16>
    %cst_15 = arith.constant dense<0.000000e+00> : vector<152x256xf32>
    %22 = tpu.matmul %19, %21, %cst_15 {dimension_numbers = #tpu.dot_dimension_numbers<[1], [0], [0], [1], [0, 0, 1, 1], [], []>} : vector<152x256xbf16>, vector<256x256xbf16>, vector<152x256xf32> -> vector<152x256xf32>
    %23 = arith.truncf %22 : vector<152x256xf32> to vector<152x256xbf16>
    %24 = vector.extract_strided_slice %8 {offsets = [1, 0], sizes = [1, 256], strides = [1, 1]} : vector<7x256xbf16> to vector<1x256xbf16>
    %25 = vector.broadcast %24 : vector<1x256xbf16> to vector<152x256xbf16>
    %26 = arith.addf %23, %25 : vector<152x256xbf16>
    %cst_16 = arith.constant 0.000000e+00 : bf16
    %27 = vector.broadcast %cst_16 : bf16 to vector<152x256xbf16>
    %28 = arith.maximumf %26, %27 : vector<152x256xbf16>
    %c2 = arith.constant 2 : index
    %c0_17 = arith.constant 0 : index
    %c0_18 = arith.constant 0 : index
    %29 = vector.load %arg8[%c2, %c0_17, %c0_18] : memref<7x256x256xbf16, #tpu.memory_space<vmem>>, vector<1x256x256xbf16>
    %30 = vector.shape_cast %29 : vector<1x256x256xbf16> to vector<256x256xbf16>
    %cst_19 = arith.constant dense<0.000000e+00> : vector<152x256xf32>
    %31 = tpu.matmul %28, %30, %cst_19 {dimension_numbers = #tpu.dot_dimension_numbers<[1], [0], [0], [1], [0, 0, 1, 1], [], []>} : vector<152x256xbf16>, vector<256x256xbf16>, vector<152x256xf32> -> vector<152x256xf32>
    %32 = arith.truncf %31 : vector<152x256xf32> to vector<152x256xbf16>
    %33 = vector.extract_strided_slice %8 {offsets = [2, 0], sizes = [1, 256], strides = [1, 1]} : vector<7x256xbf16> to vector<1x256xbf16>
    %34 = vector.broadcast %33 : vector<1x256xbf16> to vector<152x256xbf16>
    %35 = arith.addf %32, %34 : vector<152x256xbf16>
    %cst_20 = arith.constant 0.000000e+00 : bf16
    %36 = vector.broadcast %cst_20 : bf16 to vector<152x256xbf16>
    %37 = arith.maximumf %35, %36 : vector<152x256xbf16>
    %c3 = arith.constant 3 : index
    %c0_21 = arith.constant 0 : index
    %c0_22 = arith.constant 0 : index
    %38 = vector.load %arg8[%c3, %c0_21, %c0_22] : memref<7x256x256xbf16, #tpu.memory_space<vmem>>, vector<1x256x256xbf16>
    %39 = vector.shape_cast %38 : vector<1x256x256xbf16> to vector<256x256xbf16>
    %cst_23 = arith.constant dense<0.000000e+00> : vector<152x256xf32>
    %40 = tpu.matmul %37, %39, %cst_23 {dimension_numbers = #tpu.dot_dimension_numbers<[1], [0], [0], [1], [0, 0, 1, 1], [], []>} : vector<152x256xbf16>, vector<256x256xbf16>, vector<152x256xf32> -> vector<152x256xf32>
    %41 = arith.truncf %40 : vector<152x256xf32> to vector<152x256xbf16>
    %42 = vector.extract_strided_slice %8 {offsets = [3, 0], sizes = [1, 256], strides = [1, 1]} : vector<7x256xbf16> to vector<1x256xbf16>
    %43 = vector.broadcast %42 : vector<1x256xbf16> to vector<152x256xbf16>
    %44 = arith.addf %41, %43 : vector<152x256xbf16>
    %cst_24 = arith.constant 0.000000e+00 : bf16
    %45 = vector.broadcast %cst_24 : bf16 to vector<152x256xbf16>
    %46 = arith.maximumf %44, %45 : vector<152x256xbf16>
    %c4 = arith.constant 4 : index
    %c0_25 = arith.constant 0 : index
    %c0_26 = arith.constant 0 : index
    %47 = vector.load %arg8[%c4, %c0_25, %c0_26] : memref<7x256x256xbf16, #tpu.memory_space<vmem>>, vector<1x256x256xbf16>
    %48 = vector.shape_cast %47 : vector<1x256x256xbf16> to vector<256x256xbf16>
    %cst_27 = arith.constant dense<0.000000e+00> : vector<152x256xf32>
    %49 = tpu.matmul %46, %48, %cst_27 {dimension_numbers = #tpu.dot_dimension_numbers<[1], [0], [0], [1], [0, 0, 1, 1], [], []>} : vector<152x256xbf16>, vector<256x256xbf16>, vector<152x256xf32> -> vector<152x256xf32>
    %50 = arith.truncf %49 : vector<152x256xf32> to vector<152x256xbf16>
    %51 = vector.extract_strided_slice %8 {offsets = [4, 0], sizes = [1, 256], strides = [1, 1]} : vector<7x256xbf16> to vector<1x256xbf16>
    %52 = vector.broadcast %51 : vector<1x256xbf16> to vector<152x256xbf16>
    %53 = arith.addf %50, %52 : vector<152x256xbf16>
    %cst_28 = arith.constant 0.000000e+00 : bf16
    %54 = vector.broadcast %cst_28 : bf16 to vector<152x256xbf16>
    %55 = arith.maximumf %53, %54 : vector<152x256xbf16>
    %c5 = arith.constant 5 : index
    %c0_29 = arith.constant 0 : index
    %c0_30 = arith.constant 0 : index
    %56 = vector.load %arg8[%c5, %c0_29, %c0_30] : memref<7x256x256xbf16, #tpu.memory_space<vmem>>, vector<1x256x256xbf16>
    %57 = vector.shape_cast %56 : vector<1x256x256xbf16> to vector<256x256xbf16>
    %cst_31 = arith.constant dense<0.000000e+00> : vector<152x256xf32>
    %58 = tpu.matmul %55, %57, %cst_31 {dimension_numbers = #tpu.dot_dimension_numbers<[1], [0], [0], [1], [0, 0, 1, 1], [], []>} : vector<152x256xbf16>, vector<256x256xbf16>, vector<152x256xf32> -> vector<152x256xf32>
    %59 = arith.truncf %58 : vector<152x256xf32> to vector<152x256xbf16>
    %60 = vector.extract_strided_slice %8 {offsets = [5, 0], sizes = [1, 256], strides = [1, 1]} : vector<7x256xbf16> to vector<1x256xbf16>
    %61 = vector.broadcast %60 : vector<1x256xbf16> to vector<152x256xbf16>
    %62 = arith.addf %59, %61 : vector<152x256xbf16>
    %cst_32 = arith.constant 0.000000e+00 : bf16
    %63 = vector.broadcast %cst_32 : bf16 to vector<152x256xbf16>
    %64 = arith.maximumf %62, %63 : vector<152x256xbf16>
    %c6 = arith.constant 6 : index
    %c0_33 = arith.constant 0 : index
    %c0_34 = arith.constant 0 : index
    %65 = vector.load %arg8[%c6, %c0_33, %c0_34] : memref<7x256x256xbf16, #tpu.memory_space<vmem>>, vector<1x256x256xbf16>
    %66 = vector.shape_cast %65 : vector<1x256x256xbf16> to vector<256x256xbf16>
    %cst_35 = arith.constant dense<0.000000e+00> : vector<152x256xf32>
    %67 = tpu.matmul %64, %66, %cst_35 {dimension_numbers = #tpu.dot_dimension_numbers<[1], [0], [0], [1], [0, 0, 1, 1], [], []>} : vector<152x256xbf16>, vector<256x256xbf16>, vector<152x256xf32> -> vector<152x256xf32>
    %68 = arith.truncf %67 : vector<152x256xf32> to vector<152x256xbf16>
    %69 = vector.extract_strided_slice %8 {offsets = [6, 0], sizes = [1, 256], strides = [1, 1]} : vector<7x256xbf16> to vector<1x256xbf16>
    %70 = vector.broadcast %69 : vector<1x256xbf16> to vector<152x256xbf16>
    %71 = arith.addf %68, %70 : vector<152x256xbf16>
    %cst_36 = arith.constant 0.000000e+00 : bf16
    %72 = vector.broadcast %cst_36 : bf16 to vector<152x256xbf16>
    %73 = arith.maximumf %71, %72 : vector<152x256xbf16>
    %c0_37 = arith.constant 0 : index
    %c0_38 = arith.constant 0 : index
    %74 = vector.load %arg10[%c0_37, %c0_38] : memref<256x1024xbf16, #tpu.memory_space<vmem>>, vector<256x1024xbf16>
    %cst_39 = arith.constant dense<0.000000e+00> : vector<152x1024xf32>
    %75 = tpu.matmul %73, %74, %cst_39 {dimension_numbers = #tpu.dot_dimension_numbers<[1], [0], [0], [1], [0, 0, 1, 1], [], []>} : vector<152x256xbf16>, vector<256x1024xbf16>, vector<152x1024xf32> -> vector<152x1024xf32>
    %76 = arith.truncf %75 : vector<152x1024xf32> to vector<152x1024xbf16>
    %c0_40 = arith.constant 0 : index
    %c0_41 = arith.constant 0 : index
    %77 = vector.load %arg11[%c0_40, %c0_41] : memref<1x1024xbf16, #tpu.memory_space<vmem>>, vector<1x1024xbf16>
    %78 = vector.broadcast %77 : vector<1x1024xbf16> to vector<152x1024xbf16>
    %79 = arith.addf %76, %78 : vector<152x1024xbf16>
    %cst_42 = arith.constant 0.000000e+00 : bf16
    %80 = vector.broadcast %cst_42 : bf16 to vector<152x1024xbf16>
    %81 = arith.maximumf %79, %80 : vector<152x1024xbf16>
    %82 = vector.extract_strided_slice %81 {offsets = [0, 0], sizes = [152, 256], strides = [1, 1]} : vector<152x1024xbf16> to vector<152x256xbf16>
    %c0_43 = arith.constant 0 : index
    %c0_44 = arith.constant 0 : index
    %83 = vector.load %arg12[%c0_43, %c0_44] : memref<256x128xbf16, #tpu.memory_space<vmem>>, vector<256x128xbf16>
    %cst_45 = arith.constant dense<0.000000e+00> : vector<152x128xf32>
    %84 = tpu.matmul %82, %83, %cst_45 {dimension_numbers = #tpu.dot_dimension_numbers<[1], [0], [0], [1], [0, 0, 1, 1], [], []>} : vector<152x256xbf16>, vector<256x128xbf16>, vector<152x128xf32> -> vector<152x128xf32>
    %85 = vector.extract_strided_slice %84 {offsets = [0, 0], sizes = [152, 3], strides = [1, 1]} : vector<152x128xf32> to vector<152x3xf32>
    %c0_46 = arith.constant 0 : index
    %c0_47 = arith.constant 0 : index
    %86 = vector.load %arg13[%c0_46, %c0_47] : memref<1x3xf32, #tpu.memory_space<vmem>>, vector<1x3xf32>
    %87 = vector.broadcast %86 : vector<1x3xf32> to vector<152x3xf32>
    %88 = arith.addf %85, %87 : vector<152x3xf32>
    %89 = vector.extract_strided_slice %81 {offsets = [0, 256], sizes = [152, 256], strides = [1, 1]} : vector<152x1024xbf16> to vector<152x256xbf16>
    %c0_48 = arith.constant 0 : index
    %c0_49 = arith.constant 0 : index
    %90 = vector.load %arg14[%c0_48, %c0_49] : memref<256x128xbf16, #tpu.memory_space<vmem>>, vector<256x128xbf16>
    %cst_50 = arith.constant dense<0.000000e+00> : vector<152x128xf32>
    %91 = tpu.matmul %89, %90, %cst_50 {dimension_numbers = #tpu.dot_dimension_numbers<[1], [0], [0], [1], [0, 0, 1, 1], [], []>} : vector<152x256xbf16>, vector<256x128xbf16>, vector<152x128xf32> -> vector<152x128xf32>
    %92 = vector.extract_strided_slice %91 {offsets = [0, 0], sizes = [152, 32], strides = [1, 1]} : vector<152x128xf32> to vector<152x32xf32>
    %c0_51 = arith.constant 0 : index
    %c0_52 = arith.constant 0 : index
    %93 = vector.load %arg15[%c0_51, %c0_52] : memref<1x32xf32, #tpu.memory_space<vmem>>, vector<1x32xf32>
    %94 = vector.broadcast %93 : vector<1x32xf32> to vector<152x32xf32>
    %95 = arith.addf %92, %94 : vector<152x32xf32>
    %96 = vector.extract_strided_slice %81 {offsets = [0, 512], sizes = [152, 256], strides = [1, 1]} : vector<152x1024xbf16> to vector<152x256xbf16>
    %c0_53 = arith.constant 0 : index
    %c0_54 = arith.constant 0 : index
    %97 = vector.load %arg16[%c0_53, %c0_54] : memref<256x128xbf16, #tpu.memory_space<vmem>>, vector<256x128xbf16>
    %cst_55 = arith.constant dense<0.000000e+00> : vector<152x128xf32>
    %98 = tpu.matmul %96, %97, %cst_55 {dimension_numbers = #tpu.dot_dimension_numbers<[1], [0], [0], [1], [0, 0, 1, 1], [], []>} : vector<152x256xbf16>, vector<256x128xbf16>, vector<152x128xf32> -> vector<152x128xf32>
    %99 = vector.extract_strided_slice %98 {offsets = [0, 0], sizes = [152, 30], strides = [1, 1]} : vector<152x128xf32> to vector<152x30xf32>
    %c0_56 = arith.constant 0 : index
    %c0_57 = arith.constant 0 : index
    %100 = vector.load %arg17[%c0_56, %c0_57] : memref<1x30xf32, #tpu.memory_space<vmem>>, vector<1x30xf32>
    %101 = vector.broadcast %100 : vector<1x30xf32> to vector<152x30xf32>
    %102 = arith.addf %99, %101 : vector<152x30xf32>
    %103 = vector.extract_strided_slice %81 {offsets = [0, 768], sizes = [152, 256], strides = [1, 1]} : vector<152x1024xbf16> to vector<152x256xbf16>
    %c0_58 = arith.constant 0 : index
    %c0_59 = arith.constant 0 : index
    %104 = vector.load %arg18[%c0_58, %c0_59] : memref<256x128xbf16, #tpu.memory_space<vmem>>, vector<256x128xbf16>
    %cst_60 = arith.constant dense<0.000000e+00> : vector<152x128xf32>
    %105 = tpu.matmul %103, %104, %cst_60 {dimension_numbers = #tpu.dot_dimension_numbers<[1], [0], [0], [1], [0, 0, 1, 1], [], []>} : vector<152x256xbf16>, vector<256x128xbf16>, vector<152x128xf32> -> vector<152x128xf32>
    %106 = vector.extract_strided_slice %105 {offsets = [0, 0], sizes = [152, 6], strides = [1, 1]} : vector<152x128xf32> to vector<152x6xf32>
    %c0_61 = arith.constant 0 : index
    %c0_62 = arith.constant 0 : index
    %107 = vector.load %arg19[%c0_61, %c0_62] : memref<1x6xf32, #tpu.memory_space<vmem>>, vector<1x6xf32>
    %108 = vector.broadcast %107 : vector<1x6xf32> to vector<152x6xf32>
    %109 = arith.addf %106, %108 : vector<152x6xf32>
    %c0_63 = arith.constant 0 : index
    %c0_64 = arith.constant 0 : index
    %110 = vector.load %arg5[%c0_63, %c0_64] : memref<152x2xf32, #tpu.memory_space<vmem>>, vector<152x2xf32>
    %111 = math.tanh %110 : vector<152x2xf32>
    %112 = vector.extract_strided_slice %111 {offsets = [0, 0], sizes = [152, 1], strides = [1, 1]} : vector<152x2xf32> to vector<152x1xf32>
    %113 = vector.extract_strided_slice %111 {offsets = [0, 1], sizes = [152, 1], strides = [1, 1]} : vector<152x2xf32> to vector<152x1xf32>
    %114 = vector.extract_strided_slice %0 {offsets = [0, 0], sizes = [152, 3], strides = [1, 1]} : vector<152x8xf32> to vector<152x3xf32>
    %115 = vector.broadcast %112 : vector<152x1xf32> to vector<152x3xf32>
    %116 = arith.mulf %88, %115 : vector<152x3xf32>
    %117 = arith.addf %114, %116 : vector<152x3xf32>
    %c0_65 = arith.constant 0 : index
    %c0_66 = arith.constant 0 : index
    %118 = vector.load %arg20[%c0_65, %c0_66] : memref<152x3xf32, #tpu.memory_space<vmem>>, vector<152x3xf32>
    tpu.vector_store %arg20[%c0_65, %c0_66], %117 {strides = array<i32>} : memref<152x3xf32, #tpu.memory_space<vmem>>, vector<152x3xf32>,
    %c0_67 = arith.constant 0 : index
    %c0_68 = arith.constant 0 : index
    %119 = vector.load %arg2[%c0_67, %c0_68] : memref<152x32xf32, #tpu.memory_space<vmem>>, vector<152x32xf32>
    %120 = vector.broadcast %113 : vector<152x1xf32> to vector<152x32xf32>
    %121 = arith.mulf %95, %120 : vector<152x32xf32>
    %122 = arith.addf %119, %121 : vector<152x32xf32>
    %c0_69 = arith.constant 0 : index
    %c0_70 = arith.constant 0 : index
    %123 = vector.load %arg21[%c0_69, %c0_70] : memref<152x32xf32, #tpu.memory_space<vmem>>, vector<152x32xf32>
    tpu.vector_store %arg21[%c0_69, %c0_70], %122 {strides = array<i32>} : memref<152x32xf32, #tpu.memory_space<vmem>>, vector<152x32xf32>,
    %c0_71 = arith.constant 0 : index
    %c0_72 = arith.constant 0 : index
    %124 = vector.load %arg3[%c0_71, %c0_72] : memref<152x30xf32, #tpu.memory_space<vmem>>, vector<152x30xf32>
    %125 = vector.broadcast %113 : vector<152x1xf32> to vector<152x30xf32>
    %126 = arith.mulf %102, %125 : vector<152x30xf32>
    %127 = arith.addf %124, %126 : vector<152x30xf32>
    %c0_73 = arith.constant 0 : index
    %c0_74 = arith.constant 0 : index
    %128 = vector.load %arg22[%c0_73, %c0_74] : memref<152x30xf32, #tpu.memory_space<vmem>>, vector<152x30xf32>
    tpu.vector_store %arg22[%c0_73, %c0_74], %127 {strides = array<i32>} : memref<152x30xf32, #tpu.memory_space<vmem>>, vector<152x30xf32>,
    %c0_75 = arith.constant 0 : index
    %c0_76 = arith.constant 0 : index
    %129 = vector.load %arg4[%c0_75, %c0_76] : memref<152x6xf32, #tpu.memory_space<vmem>>, vector<152x6xf32>
    %130 = vector.broadcast %113 : vector<152x1xf32> to vector<152x6xf32>
    %131 = arith.mulf %109, %130 : vector<152x6xf32>
    %132 = arith.addf %129, %131 : vector<152x6xf32>
    %c0_77 = arith.constant 0 : index
    %c0_78 = arith.constant 0 : index
    %133 = vector.load %arg23[%c0_77, %c0_78] : memref<152x6xf32, #tpu.memory_space<vmem>>, vector<152x6xf32>
    tpu.vector_store %arg23[%c0_77, %c0_78], %132 {strides = array<i32>} : memref<152x6xf32, #tpu.memory_space<vmem>>, vector<152x6xf32>,
    return
  }
  func.func @transform_0(%arg0: i32) -> (i32, i32) {
    %c0_i32 = arith.constant 0 : i32
    %c0_i32_0 = arith.constant 0 : i32
    return %arg0, %c0_i32 : i32, i32
  }
  func.func @transform_1(%arg0: i32) -> (i32, i32) {
    %c0_i32 = arith.constant 0 : i32
    %c0_i32_0 = arith.constant 0 : i32
    return %arg0, %c0_i32 : i32, i32
  }
  func.func @transform_2(%arg0: i32) -> (i32, i32) {
    %c0_i32 = arith.constant 0 : i32
    %c0_i32_0 = arith.constant 0 : i32
    return %arg0, %c0_i32 : i32, i32
  }
  func.func @transform_3(%arg0: i32) -> (i32, i32) {
    %c0_i32 = arith.constant 0 : i32
    %c0_i32_0 = arith.constant 0 : i32
    return %arg0, %c0_i32 : i32, i32
  }
  func.func @transform_4(%arg0: i32) -> (i32, i32) {
    %c0_i32 = arith.constant 0 : i32
    %c0_i32_0 = arith.constant 0 : i32
    return %arg0, %c0_i32 : i32, i32
  }
  func.func @transform_5(%arg0: i32) -> (i32, i32) {
    %c0_i32 = arith.constant 0 : i32
    %c0_i32_0 = arith.constant 0 : i32
    %c0_i32_1 = arith.constant 0 : i32
    return %c0_i32, %c0_i32_0 : i32, i32
  }
  func.func @transform_6(%arg0: i32) -> (i32, i32) {
    %c0_i32 = arith.constant 0 : i32
    %c0_i32_0 = arith.constant 0 : i32
    %c0_i32_1 = arith.constant 0 : i32
    return %c0_i32, %c0_i32_0 : i32, i32
  }
  func.func @transform_7(%arg0: i32) -> (i32, i32, i32) {
    %c0_i32 = arith.constant 0 : i32
    %c0_i32_0 = arith.constant 0 : i32
    %c0_i32_1 = arith.constant 0 : i32
    %c0_i32_2 = arith.constant 0 : i32
    return %c0_i32, %c0_i32_0, %c0_i32_1 : i32, i32, i32
  }
  func.func @transform_8(%arg0: i32) -> (i32, i32) {
    %c0_i32 = arith.constant 0 : i32
    %c0_i32_0 = arith.constant 0 : i32
    %c0_i32_1 = arith.constant 0 : i32
    return %c0_i32, %c0_i32_0 : i32, i32
  }
  func.func @transform_9(%arg0: i32) -> (i32, i32) {
    %c0_i32 = arith.constant 0 : i32
    %c0_i32_0 = arith.constant 0 : i32
    %c0_i32_1 = arith.constant 0 : i32
    return %c0_i32, %c0_i32_0 : i32, i32
  }
  func.func @transform_10(%arg0: i32) -> (i32, i32) {
    %c0_i32 = arith.constant 0 : i32
    %c0_i32_0 = arith.constant 0 : i32
    %c0_i32_1 = arith.constant 0 : i32
    return %c0_i32, %c0_i32_0 : i32, i32
  }
  func.func @transform_11(%arg0: i32) -> (i32, i32) {
    %c0_i32 = arith.constant 0 : i32
    %c0_i32_0 = arith.constant 0 : i32
    %c0_i32_1 = arith.constant 0 : i32
    return %c0_i32, %c0_i32_0 : i32, i32
  }
  func.func @transform_12(%arg0: i32) -> (i32, i32) {
    %c0_i32 = arith.constant 0 : i32
    %c0_i32_0 = arith.constant 0 : i32
    %c0_i32_1 = arith.constant 0 : i32
    return %c0_i32, %c0_i32_0 : i32, i32
  }
  func.func @transform_13(%arg0: i32) -> (i32, i32) {
    %c0_i32 = arith.constant 0 : i32
    %c0_i32_0 = arith.constant 0 : i32
    %c0_i32_1 = arith.constant 0 : i32
    return %c0_i32, %c0_i32_0 : i32, i32
  }
  func.func @transform_14(%arg0: i32) -> (i32, i32) {
    %c0_i32 = arith.constant 0 : i32
    %c0_i32_0 = arith.constant 0 : i32
    %c0_i32_1 = arith.constant 0 : i32
    return %c0_i32, %c0_i32_0 : i32, i32
  }
  func.func @transform_15(%arg0: i32) -> (i32, i32) {
    %c0_i32 = arith.constant 0 : i32
    %c0_i32_0 = arith.constant 0 : i32
    %c0_i32_1 = arith.constant 0 : i32
    return %c0_i32, %c0_i32_0 : i32, i32
  }
  func.func @transform_16(%arg0: i32) -> (i32, i32) {
    %c0_i32 = arith.constant 0 : i32
    %c0_i32_0 = arith.constant 0 : i32
    %c0_i32_1 = arith.constant 0 : i32
    return %c0_i32, %c0_i32_0 : i32, i32
  }
  func.func @transform_17(%arg0: i32) -> (i32, i32) {
    %c0_i32 = arith.constant 0 : i32
    %c0_i32_0 = arith.constant 0 : i32
    %c0_i32_1 = arith.constant 0 : i32
    return %c0_i32, %c0_i32_0 : i32, i32
  }
  func.func @transform_18(%arg0: i32) -> (i32, i32) {
    %c0_i32 = arith.constant 0 : i32
    %c0_i32_0 = arith.constant 0 : i32
    %c0_i32_1 = arith.constant 0 : i32
    return %c0_i32, %c0_i32_0 : i32, i32
  }
  func.func @transform_19(%arg0: i32) -> (i32, i32) {
    %c0_i32 = arith.constant 0 : i32
    %c0_i32_0 = arith.constant 0 : i32
    return %arg0, %c0_i32 : i32, i32
  }
  func.func @transform_20(%arg0: i32) -> (i32, i32) {
    %c0_i32 = arith.constant 0 : i32
    %c0_i32_0 = arith.constant 0 : i32
    return %arg0, %c0_i32 : i32, i32
  }
  func.func @transform_21(%arg0: i32) -> (i32, i32) {
    %c0_i32 = arith.constant 0 : i32
    %c0_i32_0 = arith.constant 0 : i32
    return %arg0, %c0_i32 : i32, i32
  }
  func.func @transform_22(%arg0: i32) -> (i32, i32) {
    %c0_i32 = arith.constant 0 : i32
    %c0_i32_0 = arith.constant 0 : i32
    return %arg0, %c0_i32 : i32, i32
  }
}

</mosaic_0001>

<bundles_post_ra>
// kernel: deformation_anchor_forward.1
= control target key start
LH: loop header
LB: loop body
LE: loop exit
PB: predicated region body
PF: predicated region fallthrough
CT: control target
= control target key end

     0   :  { %s11606_s0 = inlined_call_operand.vmem [shape: f32[300,8], index: 0, kind: input, shape index: {}]   ;;  %s11607_s1 = inlined_call_operand.vmem [shape: f32[300,32], index: 1, kind: input, shape index: {}]   ;;  %s11608_s2 = inlined_call_operand.vmem [shape: f32[300,30], index: 2, kind: input, shape index: {}]   ;;  %s11609_s3 = inlined_call_operand.vmem [shape: f32[300,6], index: 3, kind: input, shape index: {}]   ;;  %s11610_s4 = inlined_call_operand.vmem [shape: f32[300,2], index: 4, kind: input, shape index: {}]   ;;  %s11611_s5 = inlined_call_operand.vmem [shape: bf16[8,256], index: 5, kind: input, shape index: {}]   ;;  %s11612_s6 = inlined_call_operand.vmem [shape: bf16[1,256], index: 6, kind: input, shape index: {}]   ;;  %s11613_s7 = inlined_call_operand.vmem [shape: bf16[7,256,256], index: 7, kind: input, shape index: {}]   ;;  %s11614_s8 = inlined_call_operand.vmem [shape: bf16[7,256], index: 8, kind: input, shape index: {}]   ;;  %s11615_s9 = inlined_call_operand.vmem [shape: bf16[256,1024], index: 9, kind: input, shape index: {}]   ;;  %s11616_s10 = inlined_call_operand.vmem [shape: bf16[1,1024], index: 10, kind: input, shape index: {}]   ;;  %s11617_s11 = inlined_call_operand.vmem [shape: bf16[256,128], index: 11, kind: input, shape index: {}]   ;;  %s11618_s12 = inlined_call_operand.vmem [shape: f32[1,3], index: 12, kind: input, shape index: {}]   ;;  %s11619_s13 = inlined_call_operand.vmem [shape: bf16[256,128], index: 13, kind: input, shape index: {}]   ;;  %s11620_s14 = inlined_call_operand.vmem [shape: f32[1,32], index: 14, kind: input, shape index: {}]   ;;  %s11621_s15 = inlined_call_operand.vmem [shape: bf16[256,128], index: 15, kind: input, shape index: {}]   ;;  %s11622_s16 = inlined_call_operand.vmem [shape: f32[1,30], index: 16, kind: input, shape index: {}]   ;;  %s11623_s17 = inlined_call_operand.vmem [shape: bf16[256,128], index: 17, kind: input, shape index: {}]   ;;  %s11624_s18 = inlined_call_operand.vmem [shape: f32[1,6], index: 18, kind: input, shape index: {}]   ;;  %s11625_s19 = inlined_call_operand.vmem [shape: f32[300,3], index: 19, kind: output, shape index: {0}]   ;;  %s11626_s20 = inlined_call_operand.vmem [shape: f32[300,32], index: 20, kind: output, shape index: {1}]   ;;  %s11627_s21 = inlined_call_operand.vmem [shape: f32[300,30], index: 21, kind: output, shape index: {2}]   ;;  %s11628_s22 = inlined_call_operand.vmem [shape: f32[300,6], index: 22, kind: output, shape index: {3}]  }
   0x1   :  { %11629 = sst [smem:[#allocation2_spill]] %s11606_s0 }
   0x2   :  { %11630 = sst [smem:[#allocation3_spill]] %s11607_s1 }
   0x3   :  { %11631 = sst [smem:[#allocation4_spill]] %s11608_s2 }
   0x4   :  { %11632 = sst [smem:[#allocation5_spill]] %s11609_s3  ;;  %s8853_s3 = smov 0  }
   0x5   :  { %11633 = sst [smem:[#allocation6_spill]] %s11610_s4 }
   0x6   :  { %11634 = sst [smem:[#allocation7_spill]] %s11611_s5 }
   0x7   :  { %11635 = sst [smem:[#allocation8_spill]] %s11612_s6 }
   0x8 LB: > { %s7286_s28 = sadd.s32 4294967295, %s8733_s3   ;;  %p7290_p0 = scmp.ge.s32.totalorder %s8733_s3, 1  ;;  %s8733_s3 = sphi %s8853_s3, %s33_s3  }
   0x9   : > { %p664_p1 = scmp.lt.s32.totalorder %s8733_s3, 3 }
   0xb   : > { %p665_p2 = pnand %p7290_p0, %p664_p1 }
   0xc   : > { %s11636_s4 = sld [smem:[#allocation7_spill]] (!%p665_p2)  ;;  %s761_s0 = smul.u32 (!%p665_p2), 19, %s7286_s28 }
   0xd   : > { %668 = sbr.rel (%p665_p2) target bundleno = 2263 (0x8d7), region = 96  ;;  %s11637_s23 = sld [smem:[#allocation2_spill]] (!%p665_p2) }
   0xe   : > { %p762_p3 = scmp.lt.s32.totalorder (!%p665_p2), %s761_s0, 37  ;;  %s11638_s28 = sld [smem:[#allocation8_spill]] (!%p665_p2) }
   0xf   : > { %s11639_s30 = sld [smem:[#allocation6_spill]] (!%p665_p2) }
  0x10   : > { %s11640_s5 = sld [smem:[#allocation3_spill]] (!%p665_p2) }
  0x11   : > { %s11642_s27 = sld [smem:[#allocation5_spill]] (!%p665_p2) }
  0x12   : > { %v835_v0 = vld [vmem:[%s11636_s4] sm:$0xff]  ;;  %vm882_vm0 = vcmask 1043456   ;;  %v8735_v3 = vmov 0   ;;  %v8267_v4 = vld [vmem:[%s11613_s7 + $0x74] ss:$8 sps:$4 sm:$0xff]   ;;  %s11644_s0 = smov (!%p762_p3, %s761_s0), 37 }
  0x13   : > { %v7301_v1 = vcombine.high %v835_v0, %v835_v0  ;;  %v7300_v2 = vcombine.low %v835_v0, %v835_v0  ;;  %921 = vmatprep.mubr.bf16.mxu0 %v8735_v3  ;;  %v8269_v5 = vld [vmem:[%s11613_s7 + $0x70] ss:$8 sps:$4 sm:$0xff]   ;;  %8262 = vset.pattern.permute.xlu1 %v8735_v3  ;;  %v8270_v6 = vld [vmem:[%s11613_s7 + $0x64] ss:$8 sps:$4 sm:$0xff]   ;;  %v8272_v8 = vld [vmem:[%s11613_s7 + $0x60] ss:$8 sps:$4 sm:$0xff]  }
  0x14   : > { %8261 = vset.pattern.permute.xlu0 %v8735_v3  ;;  %1311 = vmatprep.subr.bf16.mxu1 %v8267_v4  ;;  %v8273_v9 = vld [vmem:[%s11613_s7 + $0x54] ss:$8 sps:$4 sm:$0xff]   ;;  %s8882_s29 = sshll.u32 %s11644_s0, 3  ;;  %vm851_vm1 = vcmask 64512   ;;  %v8275_v12 = vld [vmem:[%s11613_s7 + $0x50] ss:$8 sps:$4 sm:$0xff]  }
  0x15   : > { %7302 = vmatprep.subr.msk.bf16.mxu0 %vm882_vm0, %v7301_v1  ;;  %v884_v7 = vsel %vm882_vm0, %v7300_v2, 0  ;;  %1312 = vmatpush1.bf16.msra.mxu1 %v8269_v5  ;;  %s8888_s1 = scalar_lea.vmem %s11637_s23, %s8882_s29  ;;  %v8276_v14 = vld [vmem:[%s11613_s7 + $0x44] ss:$8 sps:$4 sm:$0xff]   ;;  %v8278_v17 = vld [vmem:[%s11613_s7 + $0x40] ss:$8 sps:$4 sm:$0xff]   ;;  %s10574_s4 = scalar_lea.vmem %s11639_s30, %s8882_s29  ;;  %vm6753_vm2 = vcmask 23552  }
  0x16   : > { %904 = vmatpush1.bf16.msra.mxu0 %v884_v7  ;;  %1313 = vmatprep.subr.bf16.mxu1 %v8270_v6  ;;  %v816_v10 = vld [vmem:[%s8888_s1] sm:$0xff]  ;;  %v817_v11 = vld [vmem:[%s8888_s1 + $0x8] sm:$0xff]  ;;  %v818_v15 = vld [vmem:[%s8888_s1 + $0x10] sm:$0xff]  ;;  %s11139_s24 = scalar_lea.vmem %s11640_s5, %s8882_s29  ;;  %s11158_s2 = scalar_lea.vmem %s11626_s20, %s8882_s29  ;;  %vm6906_vm3 = vcmask 261120   ;;  %vm6983_vm4 = vcmask 244736   ;;  %vm7060_vm5 = vcmask 48128  }
  0x17   : > { %v836_v13 = vpack.c.bf16 %v817_v11, %v816_v10  ;;  %v819_v16 = vld [vmem:[%s8888_s1 + $0x18] sm:$0xff]  ;;  %v8282_v21 = vld [vmem:[%s11613_s7 + $0x24] ss:$8 sps:$4 sm:$0xff]   ;;  %v8284_v24 = vld [vmem:[%s11613_s7 + $0x20] ss:$8 sps:$4 sm:$0xff]   ;;  %s11641_s5 = sld [smem:[#allocation4_spill]]  ;;  %s11397_s6 = scalar_lea.vmem %s11627_s21, %s8882_s29 }
  0x18   : > { %v8279_v18 = vld [vmem:[%s11613_s7 + $0x34] ss:$8 sps:$4 sm:$0xff]   ;;  %v837_v19 = vpack.c.bf16 %v819_v16, %v818_v15  ;;  %v8281_v20 = vld [vmem:[%s11613_s7 + $0x30] ss:$8 sps:$4 sm:$0xff]   ;;  %v820_v22 = vld [vmem:[%s8888_s1 + $0x20] sm:$0xff] }
  0x19   : > { %1314 = vmatpush1.bf16.msra.mxu1 %v8272_v8  ;;  %7303 = vmatmul.mubr.msk.bf16.vlgmr.msra.gmra.mxu0 %vm851_vm1, %v836_v13  ;;  %v821_v23 = vld [vmem:[%s8888_s1 + $0x28] sm:$0xff]  ;;  %v8285_v25 = vld [vmem:[%s11613_s7 + $0x14] ss:$8 sps:$4 sm:$0xff]   ;;  %v8287_v27 = vld [vmem:[%s11613_s7 + $0x10] ss:$8 sps:$4 sm:$0xff]  }
  0x1a   : > { %1315 = vmatprep.subr.bf16.mxu1 %v8273_v9  ;;  %931 = vmatprep.mubr.bf16.mxu0 %v8735_v3  ;;  %v838_v26 = vpack.c.bf16 %v821_v23, %v820_v22  ;;  %v8288_v28 = vld [vmem:[%s11613_s7 + $0x4] ss:$8 sps:$4 sm:$0xff]   ;;  %v822_v29 = vld [vmem:[%s8888_s1 + $0x30] sm:$0xff]  ;;  %v823_v30 = vld [vmem:[%s8888_s1 + $0x38] sm:$0xff] }
  0x1b   : > { %v8290_v31 = vld [vmem:[%s11613_s7] ss:$8 sps:$4 sm:$0xff]   ;;  %v8291_v32 = vld [vmem:[%s11613_s7 + $0xf4] ss:$8 sps:$4 sm:$0xff]   ;;  %v8293_v33 = vld [vmem:[%s11613_s7 + $0xf0] ss:$8 sps:$4 sm:$0xff]   ;;  %v839_v34 = vpack.c.bf16 %v823_v30, %v822_v29 }
  0x1c   : > { %v8294_v35 = vld [vmem:[%s11613_s7 + $0xe4] ss:$8 sps:$4 sm:$0xff]   ;;  %v8296_v38 = vld [vmem:[%s11613_s7 + $0xe0] ss:$8 sps:$4 sm:$0xff]   ;;  %v8297_v39 = vld [vmem:[%s11613_s7 + $0xd4] ss:$8 sps:$4 sm:$0xff]  }
  0x1d   : > { %1316 = vmatpush1.bf16.msra.mxu1 %v8275_v12  ;;  %v824_v36 = vld [vmem:[%s8888_s1 + $0x40] sm:$0xff]  ;;  %v825_v37 = vld [vmem:[%s8888_s1 + $0x48] sm:$0xff]  ;;  %v8299_v40 = vld [vmem:[%s11613_s7 + $0xd0] ss:$8 sps:$4 sm:$0xff]  }
  0x1e   : > { %1317 = vmatprep.subr.bf16.mxu1 %v8276_v14  ;;  %v840_v41 = vpack.c.bf16 %v825_v37, %v824_v36  ;;  %v8300_v42 = vld [vmem:[%s11613_s7 + $0xc4] ss:$8 sps:$4 sm:$0xff]   ;;  %v826_v43 = vld [vmem:[%s8888_s1 + $0x50] sm:$0xff]  ;;  %v827_v44 = vld [vmem:[%s8888_s1 + $0x58] sm:$0xff] }
  0x1f   : > { %v8302_v45 = vld [vmem:[%s11613_s7 + $0xc0] ss:$8 sps:$4 sm:$0xff]   ;;  %v8303_v46 = vld [vmem:[%s11613_s7 + $0xb4] ss:$8 sps:$4 sm:$0xff]   ;;  %v8305_v47 = vld [vmem:[%s11613_s7 + $0xb0] ss:$8 sps:$4 sm:$0xff]   ;;  %v841_v48 = vpack.c.bf16 %v827_v44, %v826_v43 }
  0x20   : > { %v828_v49 = vld [vmem:[%s8888_s1 + $0x60] sm:$0xff]  ;;  %v829_v50 = vld [vmem:[%s8888_s1 + $0x68] sm:$0xff]  ;;  %v830_v52 = vld [vmem:[%s8888_s1 + $0x70] sm:$0xff] }
  0x21   : > { %1318 = vmatpush1.bf16.msra.mxu1 %v8278_v17  ;;  %7304 = vmatmul.mubr.msk.bf16.gmra.mxu0 %vm851_vm1, %v837_v19  ;;  %v842_v51 = vpack.c.bf16 %v829_v50, %v828_v49  ;;  %v831_v53 = vld [vmem:[%s8888_s1 + $0x78] sm:$0xff]  ;;  %v832_v55 = vld [vmem:[%s8888_s1 + $0x80] sm:$0xff]  ;;  %v833_v56 = vld [vmem:[%s8888_s1 + $0x88] sm:$0xff] }
  0x22   : > { %1319 = vmatprep.subr.bf16.mxu1 %v8279_v18  ;;  %941 = vmatprep.mubr.bf16.mxu0 %v8735_v3  ;;  %v843_v54 = vpack.c.bf16 %v831_v53, %v830_v52  ;;  %v844_v57 = vpack.c.bf16 %v833_v56, %v832_v55  ;;  %v834_v58 = vld [vmem:[%s8888_s1 + $0x90] sm:$0xff]  ;;  %v8306_v59 = vld [vmem:[%s11613_s7 + $0xa4] ss:$8 sps:$4 sm:$0xff]   ;;  %v8308_v60 = vld [vmem:[%s11613_s7 + $0xa0] ss:$8 sps:$4 sm:$0xff]  }
  0x23   : > { %v845_v61 = vpack.c.bf16 %v834_v58, %v834_v58  ;;  %v8309_v62 = vld [vmem:[%s11613_s7 + $0x94] ss:$8 sps:$4 sm:$0xff]   ;;  %v8311_v63 = vld [vmem:[%s11613_s7 + $0x90] ss:$8 sps:$4 sm:$0xff]   ;;  %v8312_v0 = vld [vmem:[%s11613_s7 + $0x84] ss:$8 sps:$4 sm:$0xff]  }
  0x24   : > { %v8314_v1 = vld [vmem:[%s11613_s7 + $0x80] ss:$8 sps:$4 sm:$0xff]   ;;  %v8315_v2 = vld [vmem:[%s11613_s7 + $0x170] ss:$8 sps:$4 sm:$0xff]   ;;  %v8317_v4 = vld [vmem:[%s11613_s7 + $0x174] ss:$8 sps:$4 sm:$0xff]  }
  0x25   : > { %1320 = vmatpush1.bf16.msra.mxu1 %v8281_v20  ;;  %v8320_v5 = vld [vmem:[%s11613_s7 + $0x164] ss:$8 sps:$4 sm:$0xff]   ;;  %1714 = vmatprep.subr.bf16.mxu0 %v8317_v4  ;;  %v8318_v6 = vld [vmem:[%s11613_s7 + $0x160] ss:$8 sps:$4 sm:$0xff]   ;;  %v8323_v7 = vld [vmem:[%s11613_s7 + $0x154] ss:$8 sps:$4 sm:$0xff]   ;;  %v1053_v20 = vlaneseq }
  0x26   : > { %1321 = vmatprep.subr.bf16.mxu1 %v8282_v21  ;;  %1715 = vmatpush1.bf16.msra.mxu0 %v8315_v2  ;;  %v8321_v8 = vld [vmem:[%s11613_s7 + $0x150] ss:$8 sps:$4 sm:$0xff]   ;;  %v8326_v9 = vld [vmem:[%s11613_s7 + $0x144] ss:$8 sps:$4 sm:$0xff]   ;;  %v8324_v10 = vld [vmem:[%s11613_s7 + $0x140] ss:$8 sps:$4 sm:$0xff]  }
  0x27   : > { %1716 = vmatprep.subr.bf16.mxu0 %v8320_v5  ;;  %v8329_v11 = vld [vmem:[%s11613_s7 + $0x134] ss:$8 sps:$4 sm:$0xff]   ;;  %v8327_v12 = vld [vmem:[%s11613_s7 + $0x130] ss:$8 sps:$4 sm:$0xff]   ;;  %v8332_v13 = vld [vmem:[%s11613_s7 + $0x124] ss:$8 sps:$4 sm:$0xff]  }
  0x28   : > { %v8330_v14 = vld [vmem:[%s11613_s7 + $0x120] ss:$8 sps:$4 sm:$0xff]   ;;  %v8335_v15 = vld [vmem:[%s11613_s7 + $0x114] ss:$8 sps:$4 sm:$0xff]   ;;  %v8333_v16 = vld [vmem:[%s11613_s7 + $0x110] ss:$8 sps:$4 sm:$0xff]  }
  0x29   : > { %1322 = vmatpush1.bf16.msra.mxu1 %v8284_v24  ;;  %7305 = vmatmul.mubr.msk.bf16.gmra.mxu0 %vm851_vm1, %v838_v26  ;;  %v8338_v17 = vld [vmem:[%s11613_s7 + $0x104] ss:$8 sps:$4 sm:$0xff]   ;;  %v8736_v18 = vmov 1966171168   ;;  %v8336_v21 = vld [vmem:[%s11613_s7 + $0x100] ss:$8 sps:$4 sm:$0xff]  }
  0x2a   : > { %1323 = vmatprep.subr.bf16.mxu1 %v8285_v25  ;;  %951 = vmatprep.mubr.bf16.mxu0 %v8735_v3  ;;  %v1051_v19 = vunpack.c.l.s4 %v8736_v18  ;;  %v8341_v22 = vld [vmem:[%s11613_s7 + $0x1f4] ss:$8 sps:$4 sm:$0xff]   ;;  %v9060_v24 = vshrl.u32 %v1053_v20, 7  ;;  %v8339_v25 = vld [vmem:[%s11613_s7 + $0x1f0] ss:$8 sps:$4 sm:$0xff]  }
  0x2b   : > { %1717 = vmatpush1.bf16.msra.mxu0 %v8318_v6  ;;  %v7313_v26 = vld.sshfl [vmem:[%s11638_s28] sm:$0x11 pattern:$0x75316420]  ;;  %v8356_v49 = vld [vmem:[%s11613_s7 + $0x1a4] ss:$8 sps:$4 sm:$0xff]   ;;  %s11433_s28 = scalar_lea.vmem %s11642_s27, %s8882_s29 }
  0x2c   : > { %1718 = vmatprep.subr.bf16.mxu0 %v8323_v7  ;;  %v1052_v23 = vunpack.c.0.s8 %v1051_v19  ;;  %v1049_v29 = vcombine.high %v7313_v26, %v7313_v26  ;;  %v8342_v30 = vld [vmem:[%s11613_s7 + $0x1e0] ss:$8 sps:$4 sm:$0xff]  }
  0x2d   : > { %1324 = vmatpush1.bf16.msra.mxu1 %v8287_v27  ;;  %v8344_v27 = vld [vmem:[%s11613_s7 + $0x1e4] ss:$8 sps:$4 sm:$0xff]  }
  0x2e   : > { %1325 = vmatprep.subr.bf16.mxu1 %v8288_v28  ;;  %v9072_v28 = vsub.s32 %v1052_v23, %v9060_v24 }
  0x2f   : > { %1719 = vmatpush1.bf16.msra.mxu0 %v8321_v8 }
  0x30   : > { %1720 = vmatprep.subr.bf16.mxu0 %v8326_v9 }
  0x31   : > { %1326 = vmatpush1.bf16.msra.mxu1 %v8290_v31  ;;  %7306 = vmatmul.mubr.msk.bf16.gmra.mxu0 %vm851_vm1, %v839_v34  ;;  %v8347_v31 = vld [vmem:[%s11613_s7 + $0x1d4] ss:$8 sps:$4 sm:$0xff]   ;;  %v8345_v34 = vld [vmem:[%s11613_s7 + $0x1d0] ss:$8 sps:$4 sm:$0xff]  }
  0x32   : > { %1327 = vmatprep.subr.bf16.mxu1 %v8291_v32  ;;  %961 = vmatprep.mubr.bf16.mxu0 %v8735_v3  ;;  %v1056_v32 = vrot.slane %v7313_v26, %v9072_v28 }
  0x33   : > { %1721 = vmatpush1.bf16.msra.mxu0 %v8324_v10 }
  0x34   : > { %1722 = vmatprep.subr.bf16.mxu0 %v8329_v11  ;;  %v1065_v37 = vpack.i.b16 %v1056_v32, %v1056_v32 }
  0x35   : > { %1328 = vmatpush2.bf16.msra.mxu1 %v8293_v33  ;;  %v1063_v33 = vrot.slane %v1049_v29, %v9072_v28 }
  0x36   : > { %1329 = vmatprep.subr.bf16.mxu1 %v8294_v35  ;;  %v8350_v35 = vld [vmem:[%s11613_s7 + $0x1c4] ss:$8 sps:$4 sm:$0xff]  }
  0x37   : > { %1723 = vmatpush1.bf16.msra.mxu0 %v8327_v12 }
  0x38   : > { %1724 = vmatprep.subr.bf16.mxu0 %v8332_v13 }
  0x39   : > { %1330 = vmatpush2.bf16.msra.mxu1 %v8296_v38  ;;  %7307 = vmatmul.mubr.msk.bf16.gmra.mxu0 %vm851_vm1, %v840_v41  ;;  %v9089_v38 = vsub.s32 0, %v9060_v24 }
  0x3a   : > { %1331 = vmatprep.subr.bf16.mxu1 %v8297_v39  ;;  %971 = vmatprep.mubr.bf16.mxu0 %v8735_v3  ;;  %v1072_v39 = vpack.i.b16 %v1063_v33, %v1063_v33 }
  0x3b   : > { %1725 = vmatpush1.bf16.msra.mxu0 %v8330_v14  ;;  %v9098_v44 = vrot.slane %v1065_v37, %v9089_v38 }
  0x3c   : > { %1726 = vmatprep.subr.bf16.mxu0 %v8335_v15 }
  0x3d   : > { %1332 = vmatpush2.bf16.msra.mxu1 %v8299_v40  ;;  %v8348_v40 = vld [vmem:[%s11613_s7 + $0x1c0] ss:$8 sps:$4 sm:$0xff]  }
  0x3e   : > { %1333 = vmatprep.subr.bf16.mxu1 %v8300_v42  ;;  %v8353_v42 = vld [vmem:[%s11613_s7 + $0x1b4] ss:$8 sps:$4 sm:$0xff]  }
  0x3f   : > { %1727 = vmatpush1.bf16.msra.mxu0 %v8333_v16 }
  0x40   : > { %1728 = vmatprep.subr.bf16.mxu0 %v8338_v17 }
  0x41   : > { %1334 = vmatpush2.bf16.msra.mxu1 %v8302_v45  ;;  %7308 = vmatmul.mubr.msk.bf16.gmra.mxu0 %vm851_vm1, %v841_v48 }
  0x42   : > { %1335 = vmatprep.subr.bf16.mxu1 %v8303_v46  ;;  %981 = vmatprep.mubr.bf16.mxu0 %v8735_v3  ;;  %v9101_v46 = vrot.slane %v1072_v39, %v9089_v38 }
  0x43   : > { %1729 = vmatpush1.bf16.msra.mxu0 %v8336_v21 }
  0x44   : > { %1730 = vmatprep.subr.bf16.mxu0 %v8341_v22 }
  0x45   : > { %1336 = vmatpush2.bf16.msra.mxu1 %v8305_v47  ;;  %v8351_v47 = vld [vmem:[%s11613_s7 + $0x1b0] ss:$8 sps:$4 sm:$0xff]  }
  0x46   : > { %1337 = vmatprep.subr.bf16.mxu1 %v8306_v59 }
  0x47   : > { %1731 = vmatpush2.bf16.msra.mxu0 %v8339_v25 }
  0x48   : > { %1732 = vmatprep.subr.bf16.mxu0 %v8344_v27 }
  0x49   : > { %7309 = vmatmul.mubr.msk.bf16.gmra.mxu0 %vm851_vm1, %v842_v51  ;;  %1338 = vmatpush2.bf16.msra.mxu1 %v8308_v60 }
  0x4a   : > { %991 = vmatprep.mubr.bf16.mxu0 %v8735_v3  ;;  %1339 = vmatprep.subr.bf16.mxu1 %v8309_v62 }
  0x4b   : > { %1733 = vmatpush2.bf16.msra.mxu0 %v8342_v30 }
  0x4c   : > { %1734 = vmatprep.subr.bf16.mxu0 %v8347_v31 }
  0x4d   : > { %1340 = vmatpush2.bf16.msra.mxu1 %v8311_v63 }
  0x4e   : > { %1341 = vmatprep.subr.bf16.mxu1 %v8312_v0 }
  0x4f   : > { %1735 = vmatpush2.bf16.msra.mxu0 %v8345_v34 }
  0x50   : > { %1736 = vmatprep.subr.bf16.mxu0 %v8350_v35 }
  0x51   : > { %7310 = vmatmul.mubr.msk.bf16.gmra.mxu0 %vm851_vm1, %v843_v54  ;;  %1342 = vmatpush2.bf16.msra.mxu1 %v8314_v1  ;;  %v8354_v54 = vld [vmem:[%s11613_s7 + $0x1a0] ss:$8 sps:$4 sm:$0xff]  }
  0x52   : > { %1001 = vmatprep.mubr.bf16.mxu0 %v8735_v3 }
  0x53   : > { %1737 = vmatpush2.bf16.msra.mxu0 %v8348_v40 }
  0x54   : > { %1738 = vmatprep.subr.bf16.mxu0 %v8353_v42 }
  0x57   : > { %1739 = vmatpush2.bf16.msra.mxu0 %v8351_v47 }
  0x58   : > { %1740 = vmatprep.subr.bf16.mxu0 %v8356_v49 }
  0x59   : > { %7311 = vmatmul.mubr.msk.bf16.gmra.mxu0 %vm851_vm1, %v844_v57 }
  0x5a   : > { %1011 = vmatprep.mubr.bf16.mxu0 %v8735_v3 }
  0x5b   : > { %1741 = vmatpush2.bf16.msra.mxu0 %v8354_v54 }
  0x61   : > { %7312 = vmatmul.mubr.msk.bf16.gmra.mxu0 %vm851_vm1, %v845_v61 }
  0xd9   : > { %v923_v36 = vpop.f32.mrf.mxu0 }
  0xdb   : > { %v925_v41 = vpop.f32.mrf.mxu0 }
  0xdd   : > { %v927_v43 = vpop.f32.mrf.mxu0 }
  0xde   : > { %v1020_v45 = vpack.c.bf16 %v927_v43, %v923_v36 }
  0xdf   : > { %v929_v48 = vpop.f32.mrf.mxu0 }
  0xe0   : > { %v1021_v50 = vpack.c.bf16 %v929_v48, %v925_v41  ;;  %v1078_v51 = vadd.bf16 %v9098_v44, %v1020_v45 }
  0xe1   : > { %v933_v52 = vpop.f32.mrf.mxu0 }
  0xe2   : > { %v1079_v53 = vadd.bf16 %v9101_v46, %v1021_v50  ;;  %v1099_v58 = vmax.bf16 %v8735_v3, %v1078_v51 }
  0xe3   : > { %v935_v55 = vpop.f32.mrf.mxu0 }
  0xe4   : > { %v1100_v56 = vmax.bf16 %v8735_v3, %v1079_v53 }
  0xe5   : > { %v937_v57 = vpop.f32.mrf.mxu0 }
  0xe6   : > { %v1022_v59 = vpack.c.bf16 %v937_v57, %v933_v52  ;;  %1343 = vmatprep.mubr.bf16.mxu1 %v1100_v56 }
  0xe7   : > { %v939_v60 = vpop.f32.mrf.mxu0  ;;  %1344 = vmatmul.mubr.bf16.vlgmr.msra.gmra.mxu1 %v1099_v58 }
  0xe8   : > { %v1023_v61 = vpack.c.bf16 %v939_v60, %v935_v55  ;;  %v1080_v62 = vadd.bf16 %v9098_v44, %v1022_v59 }
  0xe9   : > { %v943_v63 = vpop.f32.mrf.mxu0 }
  0xea   : > { %v1081_v0 = vadd.bf16 %v9101_v46, %v1023_v61  ;;  %v1101_v5 = vmax.bf16 %v8735_v3, %v1080_v62 }
  0xeb   : > { %v945_v1 = vpop.f32.mrf.mxu0 }
  0xec   : > { %v1102_v2 = vmax.bf16 %v8735_v3, %v1081_v0 }
  0xed   : > { %v947_v4 = vpop.f32.mrf.mxu0 }
  0xee   : > { %v1024_v6 = vpack.c.bf16 %v947_v4, %v943_v63  ;;  %1353 = vmatprep.mubr.bf16.mxu1 %v1102_v2 }
  0xef   : > { %v949_v7 = vpop.f32.mrf.mxu0  ;;  %1354 = vmatmul.mubr.bf16.gmra.mxu1 %v1101_v5 }
  0xf0   : > { %v1025_v8 = vpack.c.bf16 %v949_v7, %v945_v1  ;;  %v1082_v9 = vadd.bf16 %v9098_v44, %v1024_v6 }
  0xf1   : > { %v953_v10 = vpop.f32.mrf.mxu0 }
  0xf2   : > { %v1083_v11 = vadd.bf16 %v9101_v46, %v1025_v8  ;;  %v1103_v15 = vmax.bf16 %v8735_v3, %v1082_v9 }
  0xf3   : > { %v955_v12 = vpop.f32.mrf.mxu0 }
  0xf4   : > { %v1104_v13 = vmax.bf16 %v8735_v3, %v1083_v11 }
  0xf5   : > { %v957_v14 = vpop.f32.mrf.mxu0 }
  0xf6   : > { %v1026_v16 = vpack.c.bf16 %v957_v14, %v953_v10  ;;  %1363 = vmatprep.mubr.bf16.mxu1 %v1104_v13 }
  0xf7   : > { %v959_v17 = vpop.f32.mrf.mxu0  ;;  %1364 = vmatmul.mubr.bf16.gmra.mxu1 %v1103_v15 }
  0xf8   : > { %v1027_v18 = vpack.c.bf16 %v959_v17, %v955_v12  ;;  %v1084_v19 = vadd.bf16 %v9098_v44, %v1026_v16 }
  0xf9   : > { %v963_v20 = vpop.f32.mrf.mxu0 }
  0xfa   : > { %v1085_v21 = vadd.bf16 %v9101_v46, %v1027_v18  ;;  %v1105_v26 = vmax.bf16 %v8735_v3, %v1084_v19 }
  0xfb   : > { %v965_v22 = vpop.f32.mrf.mxu0 }
  0xfc   : > { %v1106_v23 = vmax.bf16 %v8735_v3, %v1085_v21 }
  0xfd   : > { %v967_v25 = vpop.f32.mrf.mxu0 }
  0xfe   : > { %v1028_v27 = vpack.c.bf16 %v967_v25, %v963_v20  ;;  %1373 = vmatprep.mubr.bf16.mxu1 %v1106_v23  ;;  %v8357_v25 = vld [vmem:[%s11613_s7 + $0x190] ss:$8 sps:$4 sm:$0xff]  }
  0xff   : > { %v969_v29 = vpop.f32.mrf.mxu0  ;;  %1374 = vmatmul.mubr.bf16.gmra.mxu1 %v1105_v26  ;;  %v8359_v26 = vld [vmem:[%s11613_s7 + $0x194] ss:$8 sps:$4 sm:$0xff]  }
 0x100   : > { %v1029_v30 = vpack.c.bf16 %v969_v29, %v965_v22  ;;  %v1086_v31 = vadd.bf16 %v9098_v44, %v1028_v27  ;;  %1742 = vmatprep.subr.bf16.mxu0 %v8359_v26  ;;  %v8365_v29 = vld [vmem:[%s11613_s7 + $0x270] ss:$8 sps:$4 sm:$0xff]  }
 0x101   : > { %v973_v32 = vpop.f32.mrf.mxu0  ;;  %1743 = vmatpush2.bf16.msra.mxu0 %v8357_v25 }
 0x102   : > { %v1087_v33 = vadd.bf16 %v9101_v46, %v1029_v30  ;;  %v1107_v37 = vmax.bf16 %v8735_v3, %v1086_v31  ;;  %v8367_v30 = vld [vmem:[%s11613_s7 + $0x274] ss:$8 sps:$4 sm:$0xff]   ;;  %v8370_v31 = vld [vmem:[%s11613_s7 + $0x264] ss:$8 sps:$4 sm:$0xff]  }
 0x103   : > { %v975_v34 = vpop.f32.mrf.mxu0  ;;  %2112 = vmatprep.subr.bf16.mxu1 %v8367_v30 }
 0x104   : > { %v1108_v35 = vmax.bf16 %v8735_v3, %v1087_v33  ;;  %2113 = vmatpush1.bf16.msra.mxu1 %v8365_v29  ;;  %v8373_v33 = vld [vmem:[%s11613_s7 + $0x254] ss:$8 sps:$4 sm:$0xff]  }
 0x105   : > { %v977_v36 = vpop.f32.mrf.mxu0  ;;  %2114 = vmatprep.subr.bf16.mxu1 %v8370_v31 }
 0x106   : > { %v1030_v39 = vpack.c.bf16 %v977_v36, %v973_v32  ;;  %1383 = vmatprep.mubr.bf16.mxu1 %v1108_v35  ;;  %v8368_v32 = vld [vmem:[%s11613_s7 + $0x260] ss:$8 sps:$4 sm:$0xff]   ;;  %v8376_v35 = vld [vmem:[%s11613_s7 + $0x244] ss:$8 sps:$4 sm:$0xff]  }
 0x107   : > { %v979_v40 = vpop.f32.mrf.mxu0  ;;  %1384 = vmatmul.mubr.bf16.gmra.mxu1 %v1107_v37  ;;  %v8374_v36 = vld [vmem:[%s11613_s7 + $0x240] ss:$8 sps:$4 sm:$0xff]   ;;  %v8379_v37 = vld [vmem:[%s11613_s7 + $0x234] ss:$8 sps:$4 sm:$0xff]  }
 0x108   : > { %v1031_v41 = vpack.c.bf16 %v979_v40, %v975_v34  ;;  %v1088_v42 = vadd.bf16 %v9098_v44, %v1030_v39  ;;  %2115 = vmatpush1.bf16.msra.mxu1 %v8368_v32  ;;  %v8371_v34 = vld [vmem:[%s11613_s7 + $0x250] ss:$8 sps:$4 sm:$0xff]   ;;  %v8382_v40 = vld [vmem:[%s11613_s7 + $0x224] ss:$8 sps:$4 sm:$0xff]  }
 0x109   : > { %v983_v43 = vpop.f32.mrf.mxu0  ;;  %2116 = vmatprep.subr.bf16.mxu1 %v8373_v33  ;;  %v8377_v39 = vld [vmem:[%s11613_s7 + $0x230] ss:$8 sps:$4 sm:$0xff]  }
 0x10a   : > { %v1089_v45 = vadd.bf16 %v9101_v46, %v1031_v41  ;;  %v1109_v50 = vmax.bf16 %v8735_v3, %v1088_v42  ;;  %v8380_v41 = vld [vmem:[%s11613_s7 + $0x220] ss:$8 sps:$4 sm:$0xff]   ;;  %v8385_v42 = vld [vmem:[%s11613_s7 + $0x214] ss:$8 sps:$4 sm:$0xff]  }
 0x10b   : > { %v985_v47 = vpop.f32.mrf.mxu0 }
 0x10c   : > { %v1110_v48 = vmax.bf16 %v8735_v3, %v1089_v45  ;;  %2117 = vmatpush1.bf16.msra.mxu1 %v8371_v34  ;;  %v8388_v45 = vld [vmem:[%s11613_s7 + $0x204] ss:$8 sps:$4 sm:$0xff]  }
 0x10d   : > { %v987_v49 = vpop.f32.mrf.mxu0  ;;  %2118 = vmatprep.subr.bf16.mxu1 %v8376_v35 }
 0x10e   : > { %v1032_v51 = vpack.c.bf16 %v987_v49, %v983_v43  ;;  %1393 = vmatprep.mubr.bf16.mxu1 %v1110_v48  ;;  %v8383_v43 = vld [vmem:[%s11613_s7 + $0x210] ss:$8 sps:$4 sm:$0xff]   ;;  %v8391_v48 = vld [vmem:[%s11613_s7 + $0x2f4] ss:$8 sps:$4 sm:$0xff]  }
 0x10f   : > { %v989_v52 = vpop.f32.mrf.mxu0  ;;  %1394 = vmatmul.mubr.bf16.gmra.mxu1 %v1109_v50  ;;  %v8389_v49 = vld [vmem:[%s11613_s7 + $0x2f0] ss:$8 sps:$4 sm:$0xff]   ;;  %v8394_v50 = vld [vmem:[%s11613_s7 + $0x2e4] ss:$8 sps:$4 sm:$0xff]  }
 0x110   : > { %v1033_v53 = vpack.c.bf16 %v989_v52, %v985_v47  ;;  %v1090_v54 = vadd.bf16 %v9098_v44, %v1032_v51  ;;  %2119 = vmatpush1.bf16.msra.mxu1 %v8374_v36  ;;  %v8386_v47 = vld [vmem:[%s11613_s7 + $0x200] ss:$8 sps:$4 sm:$0xff]  }
 0x111   : > { %v993_v55 = vpop.f32.mrf.mxu0  ;;  %2120 = vmatprep.subr.bf16.mxu1 %v8379_v37  ;;  %v1098_v51 = vld [vmem:[%s11614_s8] sm:$0xff] }
 0x112   : > { %v1091_v56 = vadd.bf16 %v9101_v46, %v1033_v53  ;;  %v1111_v60 = vmax.bf16 %v8735_v3, %v1090_v54  ;;  %v8392_v52 = vld [vmem:[%s11613_s7 + $0x2e0] ss:$8 sps:$4 sm:$0xff]   ;;  %v8397_v53 = vld [vmem:[%s11613_s7 + $0x2d4] ss:$8 sps:$4 sm:$0xff]   ;;  %v9230_v54 = vcombine.low %v1098_v51, %v1098_v51 }
 0x113   : > { %v995_v57 = vpop.f32.mrf.mxu0 }
 0x114   : > { %v1112_v58 = vmax.bf16 %v8735_v3, %v1091_v56  ;;  %2121 = vmatpush1.bf16.msra.mxu1 %v8377_v39  ;;  %v8395_v56 = vld [vmem:[%s11613_s7 + $0x2d0] ss:$8 sps:$4 sm:$0xff]  }
 0x115   : > { %v997_v59 = vpop.f32.mrf.mxu0  ;;  %2122 = vmatprep.subr.bf16.mxu1 %v8382_v40 }
 0x116   : > { %v1034_v61 = vpack.c.bf16 %v997_v59, %v993_v55  ;;  %1403 = vmatprep.mubr.bf16.mxu1 %v1112_v58  ;;  %v9232_v55 = vcombine.high %v1098_v51, %v1098_v51  ;;  %v9242_v59 = vpack.i.b16 %v9230_v54, %v9230_v54 }
 0x117   : > { %v999_v62 = vpop.f32.mrf.mxu0  ;;  %1404 = vmatmul.mubr.bf16.gmra.mxu1 %v1111_v60 }
 0x118   : > { %v1035_v63 = vpack.c.bf16 %v999_v62, %v995_v57  ;;  %v1092_v0 = vadd.bf16 %v9098_v44, %v1034_v61  ;;  %2123 = vmatpush1.bf16.msra.mxu1 %v8380_v41  ;;  %v8400_v57 = vld [vmem:[%s11613_s7 + $0x2c4] ss:$8 sps:$4 sm:$0xff]   ;;  %v9246_v60 = vpack.i.b16 %v9232_v55, %v9232_v55  ;;  %v8398_v61 = vld [vmem:[%s11613_s7 + $0x2c0] ss:$8 sps:$4 sm:$0xff]  }
 0x119   : > { %v1003_v1 = vpop.f32.mrf.mxu0  ;;  %2124 = vmatprep.subr.bf16.mxu1 %v8385_v42 }
 0x11a   : > { %v1093_v2 = vadd.bf16 %v9101_v46, %v1035_v63  ;;  %v1113_v7 = vmax.bf16 %v8735_v3, %v1092_v0  ;;  %v8403_v63 = vld [vmem:[%s11613_s7 + $0x2b4] ss:$8 sps:$4 sm:$0xff]  }
 0x11b   : > { %v1005_v4 = vpop.f32.mrf.mxu0 }
 0x11c   : > { %v1114_v5 = vmax.bf16 %v8735_v3, %v1093_v2  ;;  %2125 = vmatpush1.bf16.msra.mxu1 %v8383_v43 }
 0x11d   : > { %v1007_v6 = vpop.f32.mrf.mxu0  ;;  %2126 = vmatprep.subr.bf16.mxu1 %v8388_v45 }
 0x11e   : > { %v1036_v8 = vpack.c.bf16 %v1007_v6, %v1003_v1  ;;  %1413 = vmatprep.mubr.bf16.mxu1 %v1114_v5  ;;  %v9256_v1 = vrot.slane %v9242_v59, %v9089_v38  ;;  %v8401_v5 = vld [vmem:[%s11613_s7 + $0x2b0] ss:$8 sps:$4 sm:$0xff]  }
 0x11f   : > { %v1009_v9 = vpop.f32.mrf.mxu0  ;;  %1414 = vmatmul.mubr.bf16.gmra.mxu1 %v1113_v7  ;;  %v8406_v7 = vld [vmem:[%s11613_s7 + $0x2a4] ss:$8 sps:$4 sm:$0xff]  }
 0x120   : > { %v1037_v10 = vpack.c.bf16 %v1009_v9, %v1005_v4  ;;  %v1094_v11 = vadd.bf16 %v9098_v44, %v1036_v8  ;;  %2127 = vmatpush1.bf16.msra.mxu1 %v8386_v47  ;;  %v9260_v4 = vrot.slane %v9246_v60, %v9089_v38 }
 0x121   : > { %v1013_v12 = vpop.f32.mrf.mxu0  ;;  %2128 = vmatprep.subr.bf16.mxu1 %v8391_v48 }
 0x122   : > { %v1095_v13 = vadd.bf16 %v9101_v46, %v1037_v10  ;;  %v1038_v14 = vpack.c.bf16 %v1013_v12, %v1013_v12  ;;  %v1115_v18 = vmax.bf16 %v8735_v3, %v1094_v11  ;;  %v8404_v12 = vld [vmem:[%s11613_s7 + $0x2a0] ss:$8 sps:$4 sm:$0xff]  }
 0x123   : > { %v1015_v15 = vpop.f32.mrf.mxu0 }
 0x124   : > { %v1116_v16 = vmax.bf16 %v8735_v3, %v1095_v13  ;;  %v1039_v17 = vpack.c.bf16 %v1015_v15, %v1015_v15  ;;  %v1096_v21 = vadd.bf16 %v9098_v44, %v1038_v14  ;;  %v8364_v44 = vld [vmem:[%s11613_s7 + $0x184] ss:$8 sps:$4 sm:$0xff]   ;;  %2129 = vmatpush2.bf16.msra.mxu1 %v8389_v49 }
 0x125   : > { %v1017_v19 = vpop.f32.mrf.mxu0  ;;  %1744 = vmatprep.subr.bf16.mxu0 %v8364_v44  ;;  %2130 = vmatprep.subr.bf16.mxu1 %v8394_v50 }
 0x126   : > { %1423 = vmatprep.mubr.bf16.mxu1 %v1116_v16  ;;  %v1097_v20 = vadd.bf16 %v9101_v46, %v1039_v17  ;;  %v1117_v27 = vmax.bf16 %v8735_v3, %v1096_v21  ;;  %v8362_v46 = vld [vmem:[%s11613_s7 + $0x180] ss:$8 sps:$4 sm:$0xff]  }
 0x127   : > { %1424 = vmatmul.mubr.bf16.gmra.mxu1 %v1115_v18  ;;  %v1018_v22 = vpop.f32.mrf.mxu0  ;;  %1745 = vmatpush2.bf16.msra.mxu0 %v8362_v46 }
 0x128   : > { %v1118_v23 = vmax.bf16 %v8735_v3, %v1097_v20  ;;  %2131 = vmatpush2.bf16.msra.mxu1 %v8392_v52 }
 0x129   : > { %2132 = vmatprep.subr.bf16.mxu1 %v8397_v53 }
 0x12a   : > { %1433 = vmatprep.mubr.bf16.mxu1 %v1118_v23 }
 0x12c   : > { %2133 = vmatpush2.bf16.msra.mxu1 %v8395_v56 }
 0x12d   : > { %2134 = vmatprep.subr.bf16.mxu1 %v8400_v57 }
 0x12f   : > { %1434 = vmatmul.mubr.bf16.gmra.mxu1 %v1117_v27 }
 0x130   : > { %2135 = vmatpush2.bf16.msra.mxu1 %v8398_v61 }
 0x131   : > { %2136 = vmatprep.subr.bf16.mxu1 %v8403_v63 }
 0x134   : > { %2137 = vmatpush2.bf16.msra.mxu1 %v8401_v5 }
 0x135   : > { %2138 = vmatprep.subr.bf16.mxu1 %v8406_v7 }
 0x138   : > { %2139 = vmatpush2.bf16.msra.mxu1 %v8404_v12 }
 0x1a7   : > { %v1345_v58 = vpop.f32.mrf.mxu1 }
 0x1a9   : > { %v1347_v62 = vpop.f32.mrf.mxu1 }
 0x1ab   : > { %v1349_v0 = vpop.f32.mrf.mxu1 }
 0x1ac   : > { %v1442_v2 = vpack.c.bf16 %v1349_v0, %v1345_v58 }
 0x1ad   : > { %v1351_v6 = vpop.f32.mrf.mxu1 }
 0x1ae   : > { %v1443_v8 = vpack.c.bf16 %v1351_v6, %v1347_v62  ;;  %v1481_v9 = vadd.bf16 %v9256_v1, %v1442_v2 }
 0x1af   : > { %v1355_v10 = vpop.f32.mrf.mxu1 }
 0x1b0   : > { %v1482_v11 = vadd.bf16 %v9260_v4, %v1443_v8  ;;  %v1501_v15 = vmax.bf16 %v8735_v3, %v1481_v9 }
 0x1b1   : > { %v1357_v13 = vpop.f32.mrf.mxu1 }
 0x1b2   : > { %v1502_v14 = vmax.bf16 %v8735_v3, %v1482_v11 }
 0x1b3   : > { %v1359_v16 = vpop.f32.mrf.mxu1 }
 0x1b4   : > { %v1444_v17 = vpack.c.bf16 %v1359_v16, %v1355_v10  ;;  %1746 = vmatprep.mubr.bf16.mxu0 %v1502_v14 }
 0x1b5   : > { %v1361_v18 = vpop.f32.mrf.mxu1  ;;  %1747 = vmatmul.mubr.bf16.vlgmr.msra.gmra.mxu0 %v1501_v15 }
 0x1b6   : > { %v1445_v19 = vpack.c.bf16 %v1361_v18, %v1357_v13  ;;  %v1483_v20 = vadd.bf16 %v9256_v1, %v1444_v17 }
 0x1b7   : > { %v1365_v21 = vpop.f32.mrf.mxu1 }
 0x1b8   : > { %v1484_v22 = vadd.bf16 %v9260_v4, %v1445_v19  ;;  %v1503_v27 = vmax.bf16 %v8735_v3, %v1483_v20 }
 0x1b9   : > { %v1367_v23 = vpop.f32.mrf.mxu1 }
 0x1ba   : > { %v1504_v25 = vmax.bf16 %v8735_v3, %v1484_v22 }
 0x1bb   : > { %v1369_v26 = vpop.f32.mrf.mxu1 }
 0x1bc   : > { %v1446_v44 = vpack.c.bf16 %v1369_v26, %v1365_v21  ;;  %1756 = vmatprep.mubr.bf16.mxu0 %v1504_v25 }
 0x1bd   : > { %v1371_v46 = vpop.f32.mrf.mxu1  ;;  %1757 = vmatmul.mubr.bf16.gmra.mxu0 %v1503_v27 }
 0x1be   : > { %v1447_v29 = vpack.c.bf16 %v1371_v46, %v1367_v23  ;;  %v1485_v30 = vadd.bf16 %v9256_v1, %v1446_v44 }
 0x1bf   : > { %v1375_v31 = vpop.f32.mrf.mxu1 }
 0x1c0   : > { %v1486_v32 = vadd.bf16 %v9260_v4, %v1447_v29  ;;  %v1505_v36 = vmax.bf16 %v8735_v3, %v1485_v30 }
 0x1c1   : > { %v1377_v33 = vpop.f32.mrf.mxu1 }
 0x1c2   : > { %v1506_v34 = vmax.bf16 %v8735_v3, %v1486_v32 }
 0x1c3   : > { %v1379_v35 = vpop.f32.mrf.mxu1 }
 0x1c4   : > { %v1448_v37 = vpack.c.bf16 %v1379_v35, %v1375_v31  ;;  %1766 = vmatprep.mubr.bf16.mxu0 %v1506_v34 }
 0x1c5   : > { %v1381_v39 = vpop.f32.mrf.mxu1  ;;  %1767 = vmatmul.mubr.bf16.gmra.mxu0 %v1505_v36 }
 0x1c6   : > { %v1449_v40 = vpack.c.bf16 %v1381_v39, %v1377_v33  ;;  %v1487_v41 = vadd.bf16 %v9256_v1, %v1448_v37 }
 0x1c7   : > { %v1385_v42 = vpop.f32.mrf.mxu1 }
 0x1c8   : > { %v1488_v43 = vadd.bf16 %v9260_v4, %v1449_v40  ;;  %v1507_v49 = vmax.bf16 %v8735_v3, %v1487_v41 }
 0x1c9   : > { %v1387_v45 = vpop.f32.mrf.mxu1 }
 0x1ca   : > { %v1508_v47 = vmax.bf16 %v8735_v3, %v1488_v43 }
 0x1cb   : > { %v1389_v48 = vpop.f32.mrf.mxu1 }
 0x1cc   : > { %v1450_v50 = vpack.c.bf16 %v1389_v48, %v1385_v42  ;;  %1776 = vmatprep.mubr.bf16.mxu0 %v1508_v47 }
 0x1cd   : > { %v1391_v51 = vpop.f32.mrf.mxu1  ;;  %1777 = vmatmul.mubr.bf16.gmra.mxu0 %v1507_v49 }
 0x1ce   : > { %v1451_v52 = vpack.c.bf16 %v1391_v51, %v1387_v45  ;;  %v1489_v53 = vadd.bf16 %v9256_v1, %v1450_v50 }
 0x1cf   : > { %v1395_v56 = vpop.f32.mrf.mxu1 }
 0x1d0   : > { %v1490_v57 = vadd.bf16 %v9260_v4, %v1451_v52  ;;  %v1509_v63 = vmax.bf16 %v8735_v3, %v1489_v53  ;;  %v8407_v52 = vld [vmem:[%s11613_s7 + $0x290] ss:$8 sps:$4 sm:$0xff]   ;;  %v8409_v53 = vld [vmem:[%s11613_s7 + $0x294] ss:$8 sps:$4 sm:$0xff]  }
 0x1d1   : > { %v1397_v58 = vpop.f32.mrf.mxu1  ;;  %2140 = vmatprep.subr.bf16.mxu1 %v8409_v53 }
 0x1d2   : > { %v1510_v61 = vmax.bf16 %v8735_v3, %v1490_v57  ;;  %2141 = vmatpush2.bf16.msra.mxu1 %v8407_v52  ;;  %v8413_v57 = vld [vmem:[%s11613_s7 + $0x370] ss:$8 sps:$4 sm:$0xff]  }
 0x1d3   : > { %v1399_v62 = vpop.f32.mrf.mxu1 }
 0x1d4   : > { %v1452_v0 = vpack.c.bf16 %v1399_v62, %v1395_v56  ;;  %1786 = vmatprep.mubr.bf16.mxu0 %v1510_v61  ;;  %v8418_v61 = vld [vmem:[%s11613_s7 + $0x364] ss:$8 sps:$4 sm:$0xff]   ;;  %v8416_v62 = vld [vmem:[%s11613_s7 + $0x360] ss:$8 sps:$4 sm:$0xff]  }
 0x1d5   : > { %v1401_v2 = vpop.f32.mrf.mxu1  ;;  %1787 = vmatmul.mubr.bf16.gmra.mxu0 %v1509_v63  ;;  %v8421_v63 = vld [vmem:[%s11613_s7 + $0x354] ss:$8 sps:$4 sm:$0xff]  }
 0x1d6   : > { %v1453_v5 = vpack.c.bf16 %v1401_v2, %v1397_v58  ;;  %v1491_v6 = vadd.bf16 %v9256_v1, %v1452_v0  ;;  %v8415_v58 = vld [vmem:[%s11613_s7 + $0x374] ss:$8 sps:$4 sm:$0xff]   ;;  %v8419_v0 = vld [vmem:[%s11613_s7 + $0x350] ss:$8 sps:$4 sm:$0xff]   ;;  %v8424_v2 = vld [vmem:[%s11613_s7 + $0x344] ss:$8 sps:$4 sm:$0xff]  }
 0x1d7   : > { %v1405_v7 = vpop.f32.mrf.mxu1  ;;  %2504 = vmatprep.subr.bf16.mxu0 %v8415_v58 }
 0x1d8   : > { %v1492_v8 = vadd.bf16 %v9260_v4, %v1453_v5  ;;  %v1511_v12 = vmax.bf16 %v8735_v3, %v1491_v6  ;;  %2505 = vmatpush1.bf16.msra.mxu0 %v8413_v57  ;;  %v8422_v5 = vld [vmem:[%s11613_s7 + $0x340] ss:$8 sps:$4 sm:$0xff]   ;;  %v8427_v6 = vld [vmem:[%s11613_s7 + $0x334] ss:$8 sps:$4 sm:$0xff]  }
 0x1d9   : > { %v1407_v9 = vpop.f32.mrf.mxu1  ;;  %2506 = vmatprep.subr.bf16.mxu0 %v8418_v61 }
 0x1da   : > { %v1512_v10 = vmax.bf16 %v8735_v3, %v1492_v8  ;;  %v8430_v8 = vld [vmem:[%s11613_s7 + $0x324] ss:$8 sps:$4 sm:$0xff]  }
 0x1db   : > { %v1409_v11 = vpop.f32.mrf.mxu1 }
 0x1dc   : > { %v1454_v13 = vpack.c.bf16 %v1409_v11, %v1405_v7  ;;  %1796 = vmatprep.mubr.bf16.mxu0 %v1512_v10  ;;  %2507 = vmatpush1.bf16.msra.mxu0 %v8416_v62  ;;  %v8425_v7 = vld [vmem:[%s11613_s7 + $0x330] ss:$8 sps:$4 sm:$0xff]   ;;  %v8433_v10 = vld [vmem:[%s11613_s7 + $0x314] ss:$8 sps:$4 sm:$0xff]  }
 0x1dd   : > { %v1411_v14 = vpop.f32.mrf.mxu1  ;;  %1797 = vmatmul.mubr.bf16.gmra.mxu0 %v1511_v12  ;;  %2508 = vmatprep.subr.bf16.mxu0 %v8421_v63  ;;  %v8431_v11 = vld [vmem:[%s11613_s7 + $0x310] ss:$8 sps:$4 sm:$0xff]   ;;  %v8436_v12 = vld [vmem:[%s11613_s7 + $0x304] ss:$8 sps:$4 sm:$0xff]  }
 0x1de   : > { %v1455_v15 = vpack.c.bf16 %v1411_v14, %v1407_v9  ;;  %v1493_v16 = vadd.bf16 %v9256_v1, %v1454_v13  ;;  %v8428_v9 = vld [vmem:[%s11613_s7 + $0x320] ss:$8 sps:$4 sm:$0xff]   ;;  %v8439_v14 = vld [vmem:[%s11613_s7 + $0x3f4] ss:$8 sps:$4 sm:$0xff]  }
 0x1df   : > { %v1415_v17 = vpop.f32.mrf.mxu1  ;;  %v8434_v13 = vld [vmem:[%s11613_s7 + $0x300] ss:$8 sps:$4 sm:$0xff]  }
 0x1e0   : > { %v1494_v18 = vadd.bf16 %v9260_v4, %v1455_v15  ;;  %v1513_v22 = vmax.bf16 %v8735_v3, %v1493_v16  ;;  %2509 = vmatpush1.bf16.msra.mxu0 %v8419_v0  ;;  %v8437_v15 = vld [vmem:[%s11613_s7 + $0x3f0] ss:$8 sps:$4 sm:$0xff]   ;;  %v8442_v16 = vld [vmem:[%s11613_s7 + $0x3e4] ss:$8 sps:$4 sm:$0xff]  }
 0x1e1   : > { %v1417_v19 = vpop.f32.mrf.mxu1  ;;  %2510 = vmatprep.subr.bf16.mxu0 %v8424_v2 }
 0x1e2   : > { %v1514_v20 = vmax.bf16 %v8735_v3, %v1494_v18  ;;  %v8445_v18 = vld [vmem:[%s11613_s7 + $0x3d4] ss:$8 sps:$4 sm:$0xff]  }
 0x1e3   : > { %v1419_v21 = vpop.f32.mrf.mxu1 }
 0x1e4   : > { %v1456_v23 = vpack.c.bf16 %v1419_v21, %v1415_v17  ;;  %1806 = vmatprep.mubr.bf16.mxu0 %v1514_v20  ;;  %2511 = vmatpush1.bf16.msra.mxu0 %v8422_v5  ;;  %v8440_v17 = vld [vmem:[%s11613_s7 + $0x3e0] ss:$8 sps:$4 sm:$0xff]   ;;  %v1872_v20 = vshrl.u32 %v9232_v55, 16  ;;  %v8443_v21 = vld [vmem:[%s11613_s7 + $0x3d0] ss:$8 sps:$4 sm:$0xff]  }
 0x1e5   : > { %v1421_v25 = vpop.f32.mrf.mxu1  ;;  %1807 = vmatmul.mubr.bf16.gmra.mxu0 %v1513_v22  ;;  %2512 = vmatprep.subr.bf16.mxu0 %v8427_v6  ;;  %v8448_v22 = vld [vmem:[%s11613_s7 + $0x3c4] ss:$8 sps:$4 sm:$0xff]  }
 0x1e6   : > { %v1457_v26 = vpack.c.bf16 %v1421_v25, %v1417_v19  ;;  %v1495_v27 = vadd.bf16 %v9256_v1, %v1456_v23  ;;  %v1865_v19 = vshrl.u32 %v9230_v54, 16  ;;  %v8446_v54 = vld [vmem:[%s11613_s7 + $0x3c0] ss:$8 sps:$4 sm:$0xff]  }
 0x1e7   : > { %v1425_v44 = vpop.f32.mrf.mxu1 }
 0x1e8   : > { %v1496_v46 = vadd.bf16 %v9260_v4, %v1457_v26  ;;  %v1515_v32 = vmax.bf16 %v8735_v3, %v1495_v27  ;;  %2513 = vmatpush1.bf16.msra.mxu0 %v8425_v7  ;;  %v9394_v25 = vpack.i.b16 %v1865_v19, %v1865_v19  ;;  %v9396_v26 = vpack.i.b16 %v1872_v20, %v1872_v20  ;;  %v8451_v27 = vld [vmem:[%s11613_s7 + $0x3b4] ss:$8 sps:$4 sm:$0xff]  }
 0x1e9   : > { %v1427_v29 = vpop.f32.mrf.mxu1  ;;  %2514 = vmatprep.subr.bf16.mxu0 %v8430_v8 }
 0x1ea   : > { %v1516_v30 = vmax.bf16 %v8735_v3, %v1496_v46  ;;  %v9406_v46 = vrot.slane %v9394_v25, %v9089_v38 }
 0x1eb   : > { %v1429_v31 = vpop.f32.mrf.mxu1 }
 0x1ec   : > { %v1458_v33 = vpack.c.bf16 %v1429_v31, %v1425_v44  ;;  %1816 = vmatprep.mubr.bf16.mxu0 %v1516_v30  ;;  %2515 = vmatpush1.bf16.msra.mxu0 %v8428_v9  ;;  %v9410_v30 = vrot.slane %v9396_v26, %v9089_v38  ;;  %v8449_v31 = vld [vmem:[%s11613_s7 + $0x3b0] ss:$8 sps:$4 sm:$0xff]  }
 0x1ed   : > { %v1431_v34 = vpop.f32.mrf.mxu1  ;;  %1817 = vmatmul.mubr.bf16.gmra.mxu0 %v1515_v32  ;;  %2516 = vmatprep.subr.bf16.mxu0 %v8433_v10 }
 0x1ee   : > { %v1459_v35 = vpack.c.bf16 %v1431_v34, %v1427_v29  ;;  %v1497_v36 = vadd.bf16 %v9256_v1, %v1458_v33  ;;  %v8454_v33 = vld [vmem:[%s11613_s7 + $0x3a4] ss:$8 sps:$4 sm:$0xff]  }
 0x1ef   : > { %v1435_v37 = vpop.f32.mrf.mxu1 }
 0x1f0   : > { %v1498_v39 = vadd.bf16 %v9260_v4, %v1459_v35  ;;  %v1460_v40 = vpack.c.bf16 %v1435_v37, %v1435_v37  ;;  %v1517_v45 = vmax.bf16 %v8735_v3, %v1497_v36  ;;  %2517 = vmatpush1.bf16.msra.mxu0 %v8431_v11 }
 0x1f1   : > { %v1437_v41 = vpop.f32.mrf.mxu1  ;;  %2518 = vmatprep.subr.bf16.mxu0 %v8436_v12 }
 0x1f2   : > { %v1518_v42 = vmax.bf16 %v8735_v3, %v1498_v39  ;;  %v1461_v43 = vpack.c.bf16 %v1437_v41, %v1437_v41  ;;  %v1499_v49 = vadd.bf16 %v9256_v1, %v1460_v40  ;;  %v8412_v1 = vld [vmem:[%s11613_s7 + $0x284] ss:$8 sps:$4 sm:$0xff]   ;;  %v8452_v39 = vld [vmem:[%s11613_s7 + $0x3a0] ss:$8 sps:$4 sm:$0xff]  }
 0x1f3   : > { %v1439_v47 = vpop.f32.mrf.mxu1  ;;  %2142 = vmatprep.subr.bf16.mxu1 %v8412_v1 }
 0x1f4   : > { %1826 = vmatprep.mubr.bf16.mxu0 %v1518_v42  ;;  %v1500_v48 = vadd.bf16 %v9260_v4, %v1461_v43  ;;  %v1519_v56 = vmax.bf16 %v8735_v3, %v1499_v49  ;;  %v8410_v4 = vld [vmem:[%s11613_s7 + $0x280] ss:$8 sps:$4 sm:$0xff]   ;;  %2519 = vmatpush1.bf16.msra.mxu0 %v8434_v13 }
 0x1f5   : > { %1827 = vmatmul.mubr.bf16.gmra.mxu0 %v1517_v45  ;;  %v1440_v50 = vpop.f32.mrf.mxu1  ;;  %2143 = vmatpush2.bf16.msra.mxu1 %v8410_v4 }
 0x1f6   : > { %v1520_v51 = vmax.bf16 %v8735_v3, %v1500_v48  ;;  %2520 = vmatprep.subr.bf16.mxu0 %v8439_v14 }
 0x1f8   : > { %1836 = vmatprep.mubr.bf16.mxu0 %v1520_v51  ;;  %2521 = vmatpush2.bf16.msra.mxu0 %v8437_v15 }
 0x1f9   : > { %2522 = vmatprep.subr.bf16.mxu0 %v8442_v16 }
 0x1fc   : > { %2523 = vmatpush2.bf16.msra.mxu0 %v8440_v17 }
 0x1fd   : > { %1837 = vmatmul.mubr.bf16.gmra.mxu0 %v1519_v56  ;;  %2524 = vmatprep.subr.bf16.mxu0 %v8445_v18 }
 0x200   : > { %2525 = vmatpush2.bf16.msra.mxu0 %v8443_v21 }
 0x201   : > { %2526 = vmatprep.subr.bf16.mxu0 %v8448_v22 }
 0x204   : > { %2527 = vmatpush2.bf16.msra.mxu0 %v8446_v54 }
 0x205   : > { %2528 = vmatprep.subr.bf16.mxu0 %v8451_v27 }
 0x208   : > { %2529 = vmatpush2.bf16.msra.mxu0 %v8449_v31 }
 0x209   : > { %2530 = vmatprep.subr.bf16.mxu0 %v8454_v33 }
 0x20c   : > { %2531 = vmatpush2.bf16.msra.mxu0 %v8452_v39 }
 0x275   : > { %v1748_v23 = vpop.f32.mrf.mxu0 }
 0x277   : > { %v1750_v55 = vpop.f32.mrf.mxu0 }
 0x279   : > { %v1752_v44 = vpop.f32.mrf.mxu0 }
 0x27a   : > { %v1845_v29 = vpack.c.bf16 %v1752_v44, %v1748_v23 }
 0x27b   : > { %v1754_v32 = vpop.f32.mrf.mxu0 }
 0x27c   : > { %v1846_v34 = vpack.c.bf16 %v1754_v32, %v1750_v55  ;;  %v1879_v35 = vadd.bf16 %v9406_v46, %v1845_v29 }
 0x27d   : > { %v1758_v36 = vpop.f32.mrf.mxu0 }
 0x27e   : > { %v1880_v37 = vadd.bf16 %v9410_v30, %v1846_v34  ;;  %v1899_v42 = vmax.bf16 %v8735_v3, %v1879_v35 }
 0x27f   : > { %v1760_v40 = vpop.f32.mrf.mxu0 }
 0x280   : > { %v1900_v41 = vmax.bf16 %v8735_v3, %v1880_v37 }
 0x281   : > { %v1762_v43 = vpop.f32.mrf.mxu0 }
 0x282   : > { %v1847_v45 = vpack.c.bf16 %v1762_v43, %v1758_v36  ;;  %2144 = vmatprep.mubr.bf16.mxu1 %v1900_v41 }
 0x283   : > { %v1764_v47 = vpop.f32.mrf.mxu0  ;;  %2145 = vmatmul.mubr.bf16.vlgmr.msra.gmra.mxu1 %v1899_v42 }
 0x284   : > { %v1848_v48 = vpack.c.bf16 %v1764_v47, %v1760_v40  ;;  %v1881_v49 = vadd.bf16 %v9406_v46, %v1847_v45 }
 0x285   : > { %v1768_v50 = vpop.f32.mrf.mxu0 }
 0x286   : > { %v1882_v51 = vadd.bf16 %v9410_v30, %v1848_v48  ;;  %v1901_v1 = vmax.bf16 %v8735_v3, %v1881_v49 }
 0x287   : > { %v1770_v52 = vpop.f32.mrf.mxu0 }
 0x288   : > { %v1902_v53 = vmax.bf16 %v8735_v3, %v1882_v51 }
 0x289   : > { %v1772_v56 = vpop.f32.mrf.mxu0 }
 0x28a   : > { %v1849_v4 = vpack.c.bf16 %v1772_v56, %v1768_v50  ;;  %2154 = vmatprep.mubr.bf16.mxu1 %v1902_v53 }
 0x28b   : > { %v1774_v57 = vpop.f32.mrf.mxu0  ;;  %2155 = vmatmul.mubr.bf16.gmra.mxu1 %v1901_v1 }
 0x28c   : > { %v1850_v58 = vpack.c.bf16 %v1774_v57, %v1770_v52  ;;  %v1883_v61 = vadd.bf16 %v9406_v46, %v1849_v4 }
 0x28d   : > { %v1778_v62 = vpop.f32.mrf.mxu0 }
 0x28e   : > { %v1884_v63 = vadd.bf16 %v9410_v30, %v1850_v58  ;;  %v1903_v6 = vmax.bf16 %v8735_v3, %v1883_v61 }
 0x28f   : > { %v1780_v0 = vpop.f32.mrf.mxu0 }
 0x290   : > { %v1904_v2 = vmax.bf16 %v8735_v3, %v1884_v63 }
 0x291   : > { %v1782_v5 = vpop.f32.mrf.mxu0 }
 0x292   : > { %v1851_v7 = vpack.c.bf16 %v1782_v5, %v1778_v62  ;;  %2164 = vmatprep.mubr.bf16.mxu1 %v1904_v2 }
 0x293   : > { %v1784_v8 = vpop.f32.mrf.mxu0  ;;  %2165 = vmatmul.mubr.bf16.gmra.mxu1 %v1903_v6 }
 0x294   : > { %v1852_v9 = vpack.c.bf16 %v1784_v8, %v1780_v0  ;;  %v1885_v10 = vadd.bf16 %v9406_v46, %v1851_v7 }
 0x295   : > { %v1788_v11 = vpop.f32.mrf.mxu0 }
 0x296   : > { %v1886_v12 = vadd.bf16 %v9410_v30, %v1852_v9  ;;  %v1905_v16 = vmax.bf16 %v8735_v3, %v1885_v10 }
 0x297   : > { %v1790_v13 = vpop.f32.mrf.mxu0 }
 0x298   : > { %v1906_v14 = vmax.bf16 %v8735_v3, %v1886_v12 }
 0x299   : > { %v1792_v15 = vpop.f32.mrf.mxu0 }
 0x29a   : > { %v1853_v17 = vpack.c.bf16 %v1792_v15, %v1788_v11  ;;  %2174 = vmatprep.mubr.bf16.mxu1 %v1906_v14 }
 0x29b   : > { %v1794_v18 = vpop.f32.mrf.mxu0  ;;  %2175 = vmatmul.mubr.bf16.gmra.mxu1 %v1905_v16 }
 0x29c   : > { %v1854_v19 = vpack.c.bf16 %v1794_v18, %v1790_v13  ;;  %v1887_v20 = vadd.bf16 %v9406_v46, %v1853_v17 }
 0x29d   : > { %v1798_v21 = vpop.f32.mrf.mxu0 }
 0x29e   : > { %v1888_v22 = vadd.bf16 %v9410_v30, %v1854_v19  ;;  %v1907_v27 = vmax.bf16 %v8735_v3, %v1887_v20  ;;  %v8455_v19 = vld [vmem:[%s11613_s7 + $0x390] ss:$8 sps:$4 sm:$0xff]   ;;  %v8457_v20 = vld [vmem:[%s11613_s7 + $0x394] ss:$8 sps:$4 sm:$0xff]  }
 0x29f   : > { %v1800_v23 = vpop.f32.mrf.mxu0  ;;  %2532 = vmatprep.subr.bf16.mxu0 %v8457_v20 }
 0x2a0   : > { %v1908_v54 = vmax.bf16 %v8735_v3, %v1888_v22  ;;  %2533 = vmatpush2.bf16.msra.mxu0 %v8455_v19  ;;  %v8461_v22 = vld [vmem:[%s11613_s7 + $0x470] ss:$8 sps:$4 sm:$0xff]  }
 0x2a1   : > { %v1802_v55 = vpop.f32.mrf.mxu0 }
 0x2a2   : > { %v1855_v44 = vpack.c.bf16 %v1802_v55, %v1798_v21  ;;  %2184 = vmatprep.mubr.bf16.mxu1 %v1908_v54  ;;  %v8466_v54 = vld [vmem:[%s11613_s7 + $0x464] ss:$8 sps:$4 sm:$0xff]   ;;  %v8464_v55 = vld [vmem:[%s11613_s7 + $0x460] ss:$8 sps:$4 sm:$0xff]  }
 0x2a3   : > { %v1804_v29 = vpop.f32.mrf.mxu0  ;;  %2185 = vmatmul.mubr.bf16.gmra.mxu1 %v1907_v27  ;;  %v8469_v27 = vld [vmem:[%s11613_s7 + $0x454] ss:$8 sps:$4 sm:$0xff]  }
 0x2a4   : > { %v1856_v31 = vpack.c.bf16 %v1804_v29, %v1800_v23  ;;  %v1889_v32 = vadd.bf16 %v9406_v46, %v1855_v44  ;;  %v8463_v23 = vld [vmem:[%s11613_s7 + $0x474] ss:$8 sps:$4 sm:$0xff]   ;;  %v8467_v44 = vld [vmem:[%s11613_s7 + $0x450] ss:$8 sps:$4 sm:$0xff]   ;;  %v8472_v29 = vld [vmem:[%s11613_s7 + $0x444] ss:$8 sps:$4 sm:$0xff]  }
 0x2a5   : > { %v1808_v33 = vpop.f32.mrf.mxu0  ;;  %2896 = vmatprep.subr.bf16.mxu1 %v8463_v23 }
 0x2a6   : > { %v1890_v34 = vadd.bf16 %v9410_v30, %v1856_v31  ;;  %v1909_v39 = vmax.bf16 %v8735_v3, %v1889_v32  ;;  %2897 = vmatpush1.bf16.msra.mxu1 %v8461_v22  ;;  %v8470_v31 = vld [vmem:[%s11613_s7 + $0x440] ss:$8 sps:$4 sm:$0xff]   ;;  %v8475_v32 = vld [vmem:[%s11613_s7 + $0x434] ss:$8 sps:$4 sm:$0xff]  }
 0x2a7   : > { %v1810_v35 = vpop.f32.mrf.mxu0  ;;  %2898 = vmatprep.subr.bf16.mxu1 %v8466_v54 }
 0x2a8   : > { %v1910_v36 = vmax.bf16 %v8735_v3, %v1890_v34  ;;  %v8478_v34 = vld [vmem:[%s11613_s7 + $0x424] ss:$8 sps:$4 sm:$0xff]  }
 0x2a9   : > { %v1812_v37 = vpop.f32.mrf.mxu0 }
 0x2aa   : > { %v1857_v40 = vpack.c.bf16 %v1812_v37, %v1808_v33  ;;  %2194 = vmatprep.mubr.bf16.mxu1 %v1910_v36  ;;  %2899 = vmatpush1.bf16.msra.mxu1 %v8464_v55  ;;  %v8473_v33 = vld [vmem:[%s11613_s7 + $0x430] ss:$8 sps:$4 sm:$0xff]   ;;  %v8481_v36 = vld [vmem:[%s11613_s7 + $0x414] ss:$8 sps:$4 sm:$0xff]  }
 0x2ab   : > { %v1814_v41 = vpop.f32.mrf.mxu0  ;;  %2195 = vmatmul.mubr.bf16.gmra.mxu1 %v1909_v39  ;;  %2900 = vmatprep.subr.bf16.mxu1 %v8469_v27  ;;  %v8479_v37 = vld [vmem:[%s11613_s7 + $0x410] ss:$8 sps:$4 sm:$0xff]   ;;  %v8484_v39 = vld [vmem:[%s11613_s7 + $0x404] ss:$8 sps:$4 sm:$0xff]  }
 0x2ac   : > { %v1858_v42 = vpack.c.bf16 %v1814_v41, %v1810_v35  ;;  %v1891_v43 = vadd.bf16 %v9406_v46, %v1857_v40  ;;  %v8476_v35 = vld [vmem:[%s11613_s7 + $0x420] ss:$8 sps:$4 sm:$0xff]   ;;  %v8487_v41 = vld [vmem:[%s11613_s7 + $0x4f4] ss:$8 sps:$4 sm:$0xff]  }
 0x2ad   : > { %v1818_v45 = vpop.f32.mrf.mxu0  ;;  %v8482_v40 = vld [vmem:[%s11613_s7 + $0x400] ss:$8 sps:$4 sm:$0xff]  }
 0x2ae   : > { %v1892_v47 = vadd.bf16 %v9410_v30, %v1858_v42  ;;  %v1911_v51 = vmax.bf16 %v8735_v3, %v1891_v43  ;;  %2901 = vmatpush1.bf16.msra.mxu1 %v8467_v44  ;;  %v8485_v42 = vld [vmem:[%s11613_s7 + $0x4f0] ss:$8 sps:$4 sm:$0xff]   ;;  %v8490_v43 = vld [vmem:[%s11613_s7 + $0x4e4] ss:$8 sps:$4 sm:$0xff]  }
 0x2af   : > { %v1820_v48 = vpop.f32.mrf.mxu0  ;;  %2902 = vmatprep.subr.bf16.mxu1 %v8472_v29 }
 0x2b0   : > { %v1912_v49 = vmax.bf16 %v8735_v3, %v1892_v47  ;;  %v8493_v47 = vld [vmem:[%s11613_s7 + $0x4d4] ss:$8 sps:$4 sm:$0xff]  }
 0x2b1   : > { %v1822_v50 = vpop.f32.mrf.mxu0 }
 0x2b2   : > { %v1859_v52 = vpack.c.bf16 %v1822_v50, %v1818_v45  ;;  %2204 = vmatprep.mubr.bf16.mxu1 %v1912_v49  ;;  %2903 = vmatpush1.bf16.msra.mxu1 %v8470_v31  ;;  %v8488_v45 = vld [vmem:[%s11613_s7 + $0x4e0] ss:$8 sps:$4 sm:$0xff]   ;;  %v8496_v49 = vld [vmem:[%s11613_s7 + $0x4c4] ss:$8 sps:$4 sm:$0xff]  }
 0x2b3   : > { %v1824_v53 = vpop.f32.mrf.mxu0  ;;  %2205 = vmatmul.mubr.bf16.gmra.mxu1 %v1911_v51  ;;  %2904 = vmatprep.subr.bf16.mxu1 %v8475_v32  ;;  %v9543_v51 = vsub.s32 1, %v9060_v24 }
 0x2b4   : > { %v1860_v56 = vpack.c.bf16 %v1824_v53, %v1820_v48  ;;  %v1893_v1 = vadd.bf16 %v9406_v46, %v1859_v52  ;;  %v8491_v48 = vld [vmem:[%s11613_s7 + $0x4d0] ss:$8 sps:$4 sm:$0xff]   ;;  %v8494_v52 = vld [vmem:[%s11613_s7 + $0x4c0] ss:$8 sps:$4 sm:$0xff]  }
 0x2b5   : > { %v1828_v4 = vpop.f32.mrf.mxu0 }
 0x2b6   : > { %v1894_v57 = vadd.bf16 %v9410_v30, %v1860_v56  ;;  %v1913_v63 = vmax.bf16 %v8735_v3, %v1893_v1  ;;  %2905 = vmatpush1.bf16.msra.mxu1 %v8473_v33  ;;  %v8499_v56 = vld [vmem:[%s11613_s7 + $0x4b4] ss:$8 sps:$4 sm:$0xff]  }
 0x2b7   : > { %v1830_v58 = vpop.f32.mrf.mxu0  ;;  %2906 = vmatprep.subr.bf16.mxu1 %v8478_v34 }
 0x2b8   : > { %v1914_v61 = vmax.bf16 %v8735_v3, %v1894_v57 }
 0x2b9   : > { %v1832_v62 = vpop.f32.mrf.mxu0 }
 0x2ba   : > { %v1861_v0 = vpack.c.bf16 %v1832_v62, %v1828_v4  ;;  %2214 = vmatprep.mubr.bf16.mxu1 %v1914_v61  ;;  %2907 = vmatpush1.bf16.msra.mxu1 %v8476_v35  ;;  %v9553_v4 = vrot.slane %v9242_v59, %v9543_v51  ;;  %v8497_v61 = vld [vmem:[%s11613_s7 + $0x4b0] ss:$8 sps:$4 sm:$0xff]  }
 0x2bb   : > { %v1834_v2 = vpop.f32.mrf.mxu0  ;;  %2215 = vmatmul.mubr.bf16.gmra.mxu1 %v1913_v63  ;;  %2908 = vmatprep.subr.bf16.mxu1 %v8481_v36  ;;  %v8502_v63 = vld [vmem:[%s11613_s7 + $0x4a4] ss:$8 sps:$4 sm:$0xff]  }
 0x2bc   : > { %v1862_v5 = vpack.c.bf16 %v1834_v2, %v1830_v58  ;;  %v1895_v6 = vadd.bf16 %v9406_v46, %v1861_v0  ;;  %v9557_v58 = vrot.slane %v9246_v60, %v9543_v51 }
 0x2bd   : > { %v1838_v7 = vpop.f32.mrf.mxu0 }
 0x2be   : > { %v1896_v8 = vadd.bf16 %v9410_v30, %v1862_v5  ;;  %v1863_v9 = vpack.c.bf16 %v1838_v7, %v1838_v7  ;;  %v1915_v13 = vmax.bf16 %v8735_v3, %v1895_v6  ;;  %2909 = vmatpush1.bf16.msra.mxu1 %v8479_v37  ;;  %v8500_v7 = vld [vmem:[%s11613_s7 + $0x4a0] ss:$8 sps:$4 sm:$0xff]  }
 0x2bf   : > { %v1840_v10 = vpop.f32.mrf.mxu0  ;;  %2910 = vmatprep.subr.bf16.mxu1 %v8484_v39 }
 0x2c0   : > { %v1916_v11 = vmax.bf16 %v8735_v3, %v1896_v8  ;;  %v1864_v12 = vpack.c.bf16 %v1840_v10, %v1840_v10  ;;  %v1897_v16 = vadd.bf16 %v9406_v46, %v1863_v9  ;;  %v8460_v46 = vld [vmem:[%s11613_s7 + $0x384] ss:$8 sps:$4 sm:$0xff]  }
 0x2c1   : > { %v1842_v14 = vpop.f32.mrf.mxu0  ;;  %2534 = vmatprep.subr.bf16.mxu0 %v8460_v46 }
 0x2c2   : > { %2224 = vmatprep.mubr.bf16.mxu1 %v1916_v11  ;;  %v1898_v15 = vadd.bf16 %v9410_v30, %v1864_v12  ;;  %v1917_v21 = vmax.bf16 %v8735_v3, %v1897_v16  ;;  %v8458_v30 = vld [vmem:[%s11613_s7 + $0x380] ss:$8 sps:$4 sm:$0xff]   ;;  %2911 = vmatpush1.bf16.msra.mxu1 %v8482_v40 }
 0x2c3   : > { %2225 = vmatmul.mubr.bf16.gmra.mxu1 %v1915_v13  ;;  %v1843_v17 = vpop.f32.mrf.mxu0  ;;  %2535 = vmatpush2.bf16.msra.mxu0 %v8458_v30 }
 0x2c4   : > { %v1918_v18 = vmax.bf16 %v8735_v3, %v1898_v15  ;;  %2912 = vmatprep.subr.bf16.mxu1 %v8487_v41 }
 0x2c6   : > { %2234 = vmatprep.mubr.bf16.mxu1 %v1918_v18  ;;  %2913 = vmatpush2.bf16.msra.mxu1 %v8485_v42 }
 0x2c7   : > { %2914 = vmatprep.subr.bf16.mxu1 %v8490_v43 }
 0x2ca   : > { %2915 = vmatpush2.bf16.msra.mxu1 %v8488_v45 }
 0x2cb   : > { %2235 = vmatmul.mubr.bf16.gmra.mxu1 %v1917_v21  ;;  %2916 = vmatprep.subr.bf16.mxu1 %v8493_v47 }
 0x2ce   : > { %2917 = vmatpush2.bf16.msra.mxu1 %v8491_v48 }
 0x2cf   : > { %2918 = vmatprep.subr.bf16.mxu1 %v8496_v49 }
 0x2d2   : > { %2919 = vmatpush2.bf16.msra.mxu1 %v8494_v52 }
 0x2d3   : > { %2920 = vmatprep.subr.bf16.mxu1 %v8499_v56 }
 0x2d6   : > { %2921 = vmatpush2.bf16.msra.mxu1 %v8497_v61 }
 0x2d7   : > { %2922 = vmatprep.subr.bf16.mxu1 %v8502_v63 }
 0x2da   : > { %2923 = vmatpush2.bf16.msra.mxu1 %v8500_v7 }
 0x343   : > { %v2146_v50 = vpop.f32.mrf.mxu1 }
 0x345   : > { %v2148_v53 = vpop.f32.mrf.mxu1 }
 0x347   : > { %v2150_v1 = vpop.f32.mrf.mxu1 }
 0x348   : > { %v2243_v57 = vpack.c.bf16 %v2150_v1, %v2146_v50 }
 0x349   : > { %v2152_v62 = vpop.f32.mrf.mxu1 }
 0x34a   : > { %v2244_v0 = vpack.c.bf16 %v2152_v62, %v2148_v53  ;;  %v2271_v2 = vadd.bf16 %v9553_v4, %v2243_v57 }
 0x34b   : > { %v2156_v5 = vpop.f32.mrf.mxu1 }
 0x34c   : > { %v2272_v6 = vadd.bf16 %v9557_v58, %v2244_v0  ;;  %v2291_v10 = vmax.bf16 %v8735_v3, %v2271_v2 }
 0x34d   : > { %v2158_v8 = vpop.f32.mrf.mxu1 }
 0x34e   : > { %v2292_v9 = vmax.bf16 %v8735_v3, %v2272_v6 }
 0x34f   : > { %v2160_v11 = vpop.f32.mrf.mxu1 }
 0x350   : > { %v2245_v12 = vpack.c.bf16 %v2160_v11, %v2156_v5  ;;  %2536 = vmatprep.mubr.bf16.mxu0 %v2292_v9 }
 0x351   : > { %v2162_v13 = vpop.f32.mrf.mxu1  ;;  %2537 = vmatmul.mubr.bf16.vlgmr.msra.gmra.mxu0 %v2291_v10 }
 0x352   : > { %v2246_v14 = vpack.c.bf16 %v2162_v13, %v2158_v8  ;;  %v2273_v15 = vadd.bf16 %v9553_v4, %v2245_v12 }
 0x353   : > { %v2166_v16 = vpop.f32.mrf.mxu1 }
 0x354   : > { %v2274_v17 = vadd.bf16 %v9557_v58, %v2246_v14  ;;  %v2293_v21 = vmax.bf16 %v8735_v3, %v2273_v15 }
 0x355   : > { %v2168_v18 = vpop.f32.mrf.mxu1 }
 0x356   : > { %v2294_v19 = vmax.bf16 %v8735_v3, %v2274_v17 }
 0x357   : > { %v2170_v20 = vpop.f32.mrf.mxu1 }
 0x358   : > { %v2247_v46 = vpack.c.bf16 %v2170_v20, %v2166_v16  ;;  %2546 = vmatprep.mubr.bf16.mxu0 %v2294_v19 }
 0x359   : > { %v2172_v30 = vpop.f32.mrf.mxu1  ;;  %2547 = vmatmul.mubr.bf16.gmra.mxu0 %v2293_v21 }
 0x35a   : > { %v2248_v22 = vpack.c.bf16 %v2172_v30, %v2168_v18  ;;  %v2275_v23 = vadd.bf16 %v9553_v4, %v2247_v46 }
 0x35b   : > { %v2176_v54 = vpop.f32.mrf.mxu1 }
 0x35c   : > { %v2276_v55 = vadd.bf16 %v9557_v58, %v2248_v22  ;;  %v2295_v31 = vmax.bf16 %v8735_v3, %v2275_v23 }
 0x35d   : > { %v2178_v27 = vpop.f32.mrf.mxu1 }
 0x35e   : > { %v2296_v44 = vmax.bf16 %v8735_v3, %v2276_v55 }
 0x35f   : > { %v2180_v29 = vpop.f32.mrf.mxu1 }
 0x360   : > { %v2249_v32 = vpack.c.bf16 %v2180_v29, %v2176_v54  ;;  %2556 = vmatprep.mubr.bf16.mxu0 %v2296_v44 }
 0x361   : > { %v2182_v33 = vpop.f32.mrf.mxu1  ;;  %2557 = vmatmul.mubr.bf16.gmra.mxu0 %v2295_v31 }
 0x362   : > { %v2250_v34 = vpack.c.bf16 %v2182_v33, %v2178_v27  ;;  %v2277_v35 = vadd.bf16 %v9553_v4, %v2249_v32 }
 0x363   : > { %v2186_v36 = vpop.f32.mrf.mxu1 }
 0x364   : > { %v2278_v37 = vadd.bf16 %v9557_v58, %v2250_v34  ;;  %v2297_v42 = vmax.bf16 %v8735_v3, %v2277_v35 }
 0x365   : > { %v2188_v39 = vpop.f32.mrf.mxu1 }
 0x366   : > { %v2298_v40 = vmax.bf16 %v8735_v3, %v2278_v37 }
 0x367   : > { %v2190_v41 = vpop.f32.mrf.mxu1 }
 0x368   : > { %v2251_v43 = vpack.c.bf16 %v2190_v41, %v2186_v36  ;;  %2566 = vmatprep.mubr.bf16.mxu0 %v2298_v40 }
 0x369   : > { %v2192_v45 = vpop.f32.mrf.mxu1  ;;  %2567 = vmatmul.mubr.bf16.gmra.mxu0 %v2297_v42 }
 0x36a   : > { %v2252_v47 = vpack.c.bf16 %v2192_v45, %v2188_v39  ;;  %v2279_v48 = vadd.bf16 %v9553_v4, %v2251_v43 }
 0x36b   : > { %v2196_v49 = vpop.f32.mrf.mxu1 }
 0x36c   : > { %v2280_v50 = vadd.bf16 %v9557_v58, %v2252_v47  ;;  %v2299_v1 = vmax.bf16 %v8735_v3, %v2279_v48  ;;  %v8503_v48 = vld [vmem:[%s11613_s7 + $0x490] ss:$8 sps:$4 sm:$0xff]  }
 0x36d   : > { %v2198_v52 = vpop.f32.mrf.mxu1 }
 0x36e   : > { %v2300_v53 = vmax.bf16 %v8735_v3, %v2280_v50 }
 0x36f   : > { %v2200_v56 = vpop.f32.mrf.mxu1 }
 0x370   : > { %v2253_v57 = vpack.c.bf16 %v2200_v56, %v2196_v49  ;;  %2576 = vmatprep.mubr.bf16.mxu0 %v2300_v53  ;;  %v8505_v49 = vld [vmem:[%s11613_s7 + $0x494] ss:$8 sps:$4 sm:$0xff]   ;;  %v8514_v56 = vld [vmem:[%s11613_s7 + $0x564] ss:$8 sps:$4 sm:$0xff]  }
 0x371   : > { %v2202_v61 = vpop.f32.mrf.mxu1  ;;  %2577 = vmatmul.mubr.bf16.gmra.mxu0 %v2299_v1  ;;  %2924 = vmatprep.subr.bf16.mxu1 %v8505_v49  ;;  %v8511_v53 = vld [vmem:[%s11613_s7 + $0x574] ss:$8 sps:$4 sm:$0xff]   ;;  %v8512_v1 = vld [vmem:[%s11613_s7 + $0x560] ss:$8 sps:$4 sm:$0xff]  }
 0x372   : > { %v2254_v62 = vpack.c.bf16 %v2202_v61, %v2198_v52  ;;  %v2281_v63 = vadd.bf16 %v9553_v4, %v2253_v57  ;;  %2925 = vmatpush2.bf16.msra.mxu1 %v8503_v48  ;;  %v8509_v52 = vld [vmem:[%s11613_s7 + $0x570] ss:$8 sps:$4 sm:$0xff]   ;;  %3288 = vmatprep.subr.bf16.mxu0 %v8511_v53  ;;  %v8517_v57 = vld [vmem:[%s11613_s7 + $0x554] ss:$8 sps:$4 sm:$0xff]  }
 0x373   : > { %v2206_v0 = vpop.f32.mrf.mxu1  ;;  %3289 = vmatpush1.bf16.msra.mxu0 %v8509_v52  ;;  %v8515_v61 = vld [vmem:[%s11613_s7 + $0x550] ss:$8 sps:$4 sm:$0xff]  }
 0x374   : > { %v2282_v2 = vadd.bf16 %v9557_v58, %v2254_v62  ;;  %v2301_v8 = vmax.bf16 %v8735_v3, %v2281_v63  ;;  %3290 = vmatprep.subr.bf16.mxu0 %v8514_v56  ;;  %v8520_v62 = vld [vmem:[%s11613_s7 + $0x544] ss:$8 sps:$4 sm:$0xff]   ;;  %v8518_v63 = vld [vmem:[%s11613_s7 + $0x540] ss:$8 sps:$4 sm:$0xff]  }
 0x375   : > { %v2208_v5 = vpop.f32.mrf.mxu1 }
 0x376   : > { %v2302_v6 = vmax.bf16 %v8735_v3, %v2282_v2  ;;  %v8521_v2 = vld [vmem:[%s11613_s7 + $0x530] ss:$8 sps:$4 sm:$0xff]  }
 0x377   : > { %v2210_v7 = vpop.f32.mrf.mxu1  ;;  %3291 = vmatpush1.bf16.msra.mxu0 %v8512_v1 }
 0x378   : > { %v2255_v9 = vpack.c.bf16 %v2210_v7, %v2206_v0  ;;  %2586 = vmatprep.mubr.bf16.mxu0 %v2302_v6  ;;  %3292 = vmatprep.subr.bf16.mxu0 %v8517_v57  ;;  %v8523_v0 = vld [vmem:[%s11613_s7 + $0x534] ss:$8 sps:$4 sm:$0xff]   ;;  %v8524_v6 = vld [vmem:[%s11613_s7 + $0x520] ss:$8 sps:$4 sm:$0xff]  }
 0x379   : > { %v2212_v10 = vpop.f32.mrf.mxu1  ;;  %2587 = vmatmul.mubr.bf16.gmra.mxu0 %v2301_v8  ;;  %v8529_v7 = vld [vmem:[%s11613_s7 + $0x514] ss:$8 sps:$4 sm:$0xff]   ;;  %v8527_v8 = vld [vmem:[%s11613_s7 + $0x510] ss:$8 sps:$4 sm:$0xff]  }
 0x37a   : > { %v2256_v11 = vpack.c.bf16 %v2212_v10, %v2208_v5  ;;  %v2283_v12 = vadd.bf16 %v9553_v4, %v2255_v9  ;;  %v8526_v5 = vld [vmem:[%s11613_s7 + $0x524] ss:$8 sps:$4 sm:$0xff]   ;;  %v8530_v10 = vld [vmem:[%s11613_s7 + $0x500] ss:$8 sps:$4 sm:$0xff]  }
 0x37b   : > { %v2216_v13 = vpop.f32.mrf.mxu1  ;;  %3293 = vmatpush1.bf16.msra.mxu0 %v8515_v61  ;;  %v8532_v9 = vld [vmem:[%s11613_s7 + $0x504] ss:$8 sps:$4 sm:$0xff]  }
 0x37c   : > { %v2284_v14 = vadd.bf16 %v9557_v58, %v2256_v11  ;;  %v2303_v18 = vmax.bf16 %v8735_v3, %v2283_v12  ;;  %3294 = vmatprep.subr.bf16.mxu0 %v8520_v62  ;;  %v8535_v11 = vld [vmem:[%s11613_s7 + $0x5f4] ss:$8 sps:$4 sm:$0xff]   ;;  %v8533_v12 = vld [vmem:[%s11613_s7 + $0x5f0] ss:$8 sps:$4 sm:$0xff]  }
 0x37d   : > { %v2218_v15 = vpop.f32.mrf.mxu1 }
 0x37e   : > { %v2304_v16 = vmax.bf16 %v8735_v3, %v2284_v14  ;;  %v8536_v14 = vld [vmem:[%s11613_s7 + $0x5e0] ss:$8 sps:$4 sm:$0xff]  }
 0x37f   : > { %v2220_v17 = vpop.f32.mrf.mxu1  ;;  %3295 = vmatpush1.bf16.msra.mxu0 %v8518_v63 }
 0x380   : > { %v2257_v19 = vpack.c.bf16 %v2220_v17, %v2216_v13  ;;  %2596 = vmatprep.mubr.bf16.mxu0 %v2304_v16  ;;  %3296 = vmatprep.subr.bf16.mxu0 %v8523_v0  ;;  %v8538_v13 = vld [vmem:[%s11613_s7 + $0x5e4] ss:$8 sps:$4 sm:$0xff]   ;;  %v8539_v16 = vld [vmem:[%s11613_s7 + $0x5d0] ss:$8 sps:$4 sm:$0xff]  }
 0x381   : > { %v2222_v20 = vpop.f32.mrf.mxu1  ;;  %2597 = vmatmul.mubr.bf16.gmra.mxu0 %v2303_v18  ;;  %v8544_v17 = vld [vmem:[%s11613_s7 + $0x5c4] ss:$8 sps:$4 sm:$0xff]  }
 0x382   : > { %v2258_v21 = vpack.c.bf16 %v2222_v20, %v2218_v15  ;;  %v2285_v46 = vadd.bf16 %v9553_v4, %v2257_v19  ;;  %v8541_v15 = vld [vmem:[%s11613_s7 + $0x5d4] ss:$8 sps:$4 sm:$0xff]   ;;  %v8542_v19 = vld [vmem:[%s11613_s7 + $0x5c0] ss:$8 sps:$4 sm:$0xff]  }
 0x383   : > { %v2226_v30 = vpop.f32.mrf.mxu1  ;;  %3297 = vmatpush1.bf16.msra.mxu0 %v8521_v2 }
 0x384   : > { %v2286_v22 = vadd.bf16 %v9557_v58, %v2258_v21  ;;  %v2305_v27 = vmax.bf16 %v8735_v3, %v2285_v46  ;;  %3298 = vmatprep.subr.bf16.mxu0 %v8526_v5  ;;  %v8547_v21 = vld [vmem:[%s11613_s7 + $0x5b4] ss:$8 sps:$4 sm:$0xff]  }
 0x385   : > { %v2228_v23 = vpop.f32.mrf.mxu1 }
 0x386   : > { %v2306_v54 = vmax.bf16 %v8735_v3, %v2286_v22 }
 0x387   : > { %v2230_v55 = vpop.f32.mrf.mxu1  ;;  %3299 = vmatpush1.bf16.msra.mxu0 %v8524_v6 }
 0x388   : > { %v2259_v44 = vpack.c.bf16 %v2230_v55, %v2226_v30  ;;  %2606 = vmatprep.mubr.bf16.mxu0 %v2306_v54  ;;  %3300 = vmatprep.subr.bf16.mxu0 %v8529_v7  ;;  %v9697_v30 = vrot.slane %v9394_v25, %v9543_v51  ;;  %v8545_v54 = vld [vmem:[%s11613_s7 + $0x5b0] ss:$8 sps:$4 sm:$0xff]  }
 0x389   : > { %v2232_v29 = vpop.f32.mrf.mxu1  ;;  %2607 = vmatmul.mubr.bf16.gmra.mxu0 %v2305_v27  ;;  %v8550_v27 = vld [vmem:[%s11613_s7 + $0x5a4] ss:$8 sps:$4 sm:$0xff]  }
 0x38a   : > { %v2260_v31 = vpack.c.bf16 %v2232_v29, %v2228_v23  ;;  %v2287_v32 = vadd.bf16 %v9553_v4, %v2259_v44  ;;  %v9701_v23 = vrot.slane %v9396_v26, %v9543_v51  ;;  %v8548_v51 = vld [vmem:[%s11613_s7 + $0x5a0] ss:$8 sps:$4 sm:$0xff]  }
 0x38b   : > { %v2236_v33 = vpop.f32.mrf.mxu1  ;;  %3301 = vmatpush1.bf16.msra.mxu0 %v8527_v8 }
 0x38c   : > { %v2288_v34 = vadd.bf16 %v9557_v58, %v2260_v31  ;;  %v2261_v35 = vpack.c.bf16 %v2236_v33, %v2236_v33  ;;  %v2307_v40 = vmax.bf16 %v8735_v3, %v2287_v32  ;;  %3302 = vmatprep.subr.bf16.mxu0 %v8532_v9 }
 0x38d   : > { %v2238_v36 = vpop.f32.mrf.mxu1 }
 0x38e   : > { %v2308_v37 = vmax.bf16 %v8735_v3, %v2288_v34  ;;  %v2262_v39 = vpack.c.bf16 %v2238_v36, %v2238_v36  ;;  %v2289_v43 = vadd.bf16 %v9553_v4, %v2261_v35  ;;  %v8508_v4 = vld [vmem:[%s11613_s7 + $0x484] ss:$8 sps:$4 sm:$0xff]  }
 0x38f   : > { %v2240_v41 = vpop.f32.mrf.mxu1  ;;  %2926 = vmatprep.subr.bf16.mxu1 %v8508_v4  ;;  %3303 = vmatpush1.bf16.msra.mxu0 %v8530_v10 }
 0x390   : > { %2616 = vmatprep.mubr.bf16.mxu0 %v2308_v37  ;;  %v2290_v42 = vadd.bf16 %v9557_v58, %v2262_v39  ;;  %v2309_v50 = vmax.bf16 %v8735_v3, %v2289_v43  ;;  %v8506_v58 = vld [vmem:[%s11613_s7 + $0x480] ss:$8 sps:$4 sm:$0xff]   ;;  %3304 = vmatprep.subr.bf16.mxu0 %v8535_v11 }
 0x391   : > { %2617 = vmatmul.mubr.bf16.gmra.mxu0 %v2307_v40  ;;  %v2241_v45 = vpop.f32.mrf.mxu1  ;;  %2927 = vmatpush2.bf16.msra.mxu1 %v8506_v58 }
 0x392   : > { %v2310_v47 = vmax.bf16 %v8735_v3, %v2290_v42 }
 0x393   : > { %3305 = vmatpush2.bf16.msra.mxu0 %v8533_v12 }
 0x394   : > { %2626 = vmatprep.mubr.bf16.mxu0 %v2310_v47  ;;  %3306 = vmatprep.subr.bf16.mxu0 %v8538_v13 }
 0x397   : > { %3307 = vmatpush2.bf16.msra.mxu0 %v8536_v14 }
 0x398   : > { %3308 = vmatprep.subr.bf16.mxu0 %v8541_v15 }
 0x399   : > { %2627 = vmatmul.mubr.bf16.gmra.mxu0 %v2309_v50 }
 0x39b   : > { %3309 = vmatpush2.bf16.msra.mxu0 %v8539_v16 }
 0x39c   : > { %3310 = vmatprep.subr.bf16.mxu0 %v8544_v17 }
 0x39f   : > { %3311 = vmatpush2.bf16.msra.mxu0 %v8542_v19 }
 0x3a0   : > { %3312 = vmatprep.subr.bf16.mxu0 %v8547_v21 }
 0x3a3   : > { %3313 = vmatpush2.bf16.msra.mxu0 %v8545_v54 }
 0x3a4   : > { %3314 = vmatprep.subr.bf16.mxu0 %v8550_v27 }
 0x3a7   : > { %3315 = vmatpush2.bf16.msra.mxu0 %v8548_v51 }
 0x411   : > { %v2538_v18 = vpop.f32.mrf.mxu0 }
 0x413   : > { %v2540_v20 = vpop.f32.mrf.mxu0 }
 0x415   : > { %v2542_v46 = vpop.f32.mrf.mxu0 }
 0x416   : > { %v2635_v22 = vpack.c.bf16 %v2542_v46, %v2538_v18 }
 0x417   : > { %v2544_v55 = vpop.f32.mrf.mxu0 }
 0x418   : > { %v2636_v44 = vpack.c.bf16 %v2544_v55, %v2540_v20  ;;  %v2663_v29 = vadd.bf16 %v9697_v30, %v2635_v22 }
 0x419   : > { %v2548_v31 = vpop.f32.mrf.mxu0 }
 0x41a   : > { %v2664_v32 = vadd.bf16 %v9701_v23, %v2636_v44  ;;  %v2683_v35 = vmax.bf16 %v8735_v3, %v2663_v29 }
 0x41b   : > { %v2550_v33 = vpop.f32.mrf.mxu0 }
 0x41c   : > { %v2684_v34 = vmax.bf16 %v8735_v3, %v2664_v32 }
 0x41d   : > { %v2552_v36 = vpop.f32.mrf.mxu0 }
 0x41e   : > { %v2637_v37 = vpack.c.bf16 %v2552_v36, %v2548_v31  ;;  %2928 = vmatprep.mubr.bf16.mxu1 %v2684_v34 }
 0x41f   : > { %v2554_v39 = vpop.f32.mrf.mxu0  ;;  %2929 = vmatmul.mubr.bf16.vlgmr.msra.gmra.mxu1 %v2683_v35 }
 0x420   : > { %v2638_v40 = vpack.c.bf16 %v2554_v39, %v2550_v33  ;;  %v2665_v41 = vadd.bf16 %v9697_v30, %v2637_v37 }
 0x421   : > { %v2558_v42 = vpop.f32.mrf.mxu0 }
 0x422   : > { %v2666_v43 = vadd.bf16 %v9701_v23, %v2638_v40  ;;  %v2685_v49 = vmax.bf16 %v8735_v3, %v2665_v41 }
 0x423   : > { %v2560_v45 = vpop.f32.mrf.mxu0 }
 0x424   : > { %v2686_v47 = vmax.bf16 %v8735_v3, %v2666_v43 }
 0x425   : > { %v2562_v48 = vpop.f32.mrf.mxu0 }
 0x426   : > { %v2639_v50 = vpack.c.bf16 %v2562_v48, %v2558_v42  ;;  %2938 = vmatprep.mubr.bf16.mxu1 %v2686_v47 }
 0x427   : > { %v2564_v4 = vpop.f32.mrf.mxu0  ;;  %2939 = vmatmul.mubr.bf16.gmra.mxu1 %v2685_v49 }
 0x428   : > { %v2640_v58 = vpack.c.bf16 %v2564_v4, %v2560_v45  ;;  %v2667_v52 = vadd.bf16 %v9697_v30, %v2639_v50 }
 0x429   : > { %v2568_v53 = vpop.f32.mrf.mxu0 }
 0x42a   : > { %v2668_v56 = vadd.bf16 %v9701_v23, %v2640_v58  ;;  %v2687_v62 = vmax.bf16 %v8735_v3, %v2667_v52 }
 0x42b   : > { %v2570_v1 = vpop.f32.mrf.mxu0 }
 0x42c   : > { %v2688_v57 = vmax.bf16 %v8735_v3, %v2668_v56 }
 0x42d   : > { %v2572_v61 = vpop.f32.mrf.mxu0 }
 0x42e   : > { %v2641_v63 = vpack.c.bf16 %v2572_v61, %v2568_v53  ;;  %2948 = vmatprep.mubr.bf16.mxu1 %v2688_v57 }
 0x42f   : > { %v2574_v0 = vpop.f32.mrf.mxu0  ;;  %2949 = vmatmul.mubr.bf16.gmra.mxu1 %v2687_v62 }
 0x430   : > { %v2642_v2 = vpack.c.bf16 %v2574_v0, %v2570_v1  ;;  %v2669_v5 = vadd.bf16 %v9697_v30, %v2641_v63 }
 0x431   : > { %v2578_v6 = vpop.f32.mrf.mxu0 }
 0x432   : > { %v2670_v7 = vadd.bf16 %v9701_v23, %v2642_v2  ;;  %v2689_v11 = vmax.bf16 %v8735_v3, %v2669_v5 }
 0x433   : > { %v2580_v8 = vpop.f32.mrf.mxu0 }
 0x434   : > { %v2690_v9 = vmax.bf16 %v8735_v3, %v2670_v7 }
 0x435   : > { %v2582_v10 = vpop.f32.mrf.mxu0 }
 0x436   : > { %v2643_v12 = vpack.c.bf16 %v2582_v10, %v2578_v6  ;;  %2958 = vmatprep.mubr.bf16.mxu1 %v2690_v9 }
 0x437   : > { %v2584_v13 = vpop.f32.mrf.mxu0  ;;  %2959 = vmatmul.mubr.bf16.gmra.mxu1 %v2689_v11 }
 0x438   : > { %v2644_v14 = vpack.c.bf16 %v2584_v13, %v2580_v8  ;;  %v2671_v15 = vadd.bf16 %v9697_v30, %v2643_v12 }
 0x439   : > { %v2588_v16 = vpop.f32.mrf.mxu0 }
 0x43a   : > { %v2672_v17 = vadd.bf16 %v9701_v23, %v2644_v14  ;;  %v2691_v21 = vmax.bf16 %v8735_v3, %v2671_v15  ;;  %v8551_v14 = vld [vmem:[%s11613_s7 + $0x590] ss:$8 sps:$4 sm:$0xff]   ;;  %v8553_v15 = vld [vmem:[%s11613_s7 + $0x594] ss:$8 sps:$4 sm:$0xff]  }
 0x43b   : > { %v2590_v18 = vpop.f32.mrf.mxu0  ;;  %3316 = vmatprep.subr.bf16.mxu0 %v8553_v15 }
 0x43c   : > { %v2692_v19 = vmax.bf16 %v8735_v3, %v2672_v17  ;;  %3317 = vmatpush2.bf16.msra.mxu0 %v8551_v14  ;;  %v8557_v17 = vld [vmem:[%s11613_s7 + $0x670] ss:$8 sps:$4 sm:$0xff]  }
 0x43d   : > { %v2592_v20 = vpop.f32.mrf.mxu0 }
 0x43e   : > { %v2645_v46 = vpack.c.bf16 %v2592_v20, %v2588_v16  ;;  %2968 = vmatprep.mubr.bf16.mxu1 %v2692_v19  ;;  %v8556_v16 = vld [vmem:[%s11613_s7 + $0x584] ss:$8 sps:$4 sm:$0xff]   ;;  %v8560_v20 = vld [vmem:[%s11613_s7 + $0x660] ss:$8 sps:$4 sm:$0xff]  }
 0x43f   : > { %v2594_v22 = vpop.f32.mrf.mxu0  ;;  %2969 = vmatmul.mubr.bf16.gmra.mxu1 %v2691_v21  ;;  %3318 = vmatprep.subr.bf16.mxu0 %v8556_v16  ;;  %v8562_v19 = vld [vmem:[%s11613_s7 + $0x664] ss:$8 sps:$4 sm:$0xff]   ;;  %v8565_v21 = vld [vmem:[%s11613_s7 + $0x654] ss:$8 sps:$4 sm:$0xff]  }
 0x440   : > { %v2646_v54 = vpack.c.bf16 %v2594_v22, %v2590_v18  ;;  %v2673_v55 = vadd.bf16 %v9697_v30, %v2645_v46  ;;  %v8559_v18 = vld [vmem:[%s11613_s7 + $0x674] ss:$8 sps:$4 sm:$0xff]   ;;  %v8563_v46 = vld [vmem:[%s11613_s7 + $0x650] ss:$8 sps:$4 sm:$0xff]   ;;  %v8568_v22 = vld [vmem:[%s11613_s7 + $0x644] ss:$8 sps:$4 sm:$0xff]  }
 0x441   : > { %v2598_v27 = vpop.f32.mrf.mxu0  ;;  %3680 = vmatprep.subr.bf16.mxu1 %v8559_v18 }
 0x442   : > { %v2674_v44 = vadd.bf16 %v9701_v23, %v2646_v54  ;;  %v2693_v51 = vmax.bf16 %v8735_v3, %v2673_v55  ;;  %3681 = vmatpush1.bf16.msra.mxu1 %v8557_v17  ;;  %v8566_v54 = vld [vmem:[%s11613_s7 + $0x640] ss:$8 sps:$4 sm:$0xff]   ;;  %v8571_v55 = vld [vmem:[%s11613_s7 + $0x634] ss:$8 sps:$4 sm:$0xff]  }
 0x443   : > { %v2600_v29 = vpop.f32.mrf.mxu0  ;;  %3682 = vmatprep.subr.bf16.mxu1 %v8562_v19 }
 0x444   : > { %v2694_v31 = vmax.bf16 %v8735_v3, %v2674_v44  ;;  %v8574_v44 = vld [vmem:[%s11613_s7 + $0x624] ss:$8 sps:$4 sm:$0xff]  }
 0x445   : > { %v2602_v32 = vpop.f32.mrf.mxu0 }
 0x446   : > { %v2647_v33 = vpack.c.bf16 %v2602_v32, %v2598_v27  ;;  %2978 = vmatprep.mubr.bf16.mxu1 %v2694_v31  ;;  %3683 = vmatpush1.bf16.msra.mxu1 %v8560_v20  ;;  %v8569_v27 = vld [vmem:[%s11613_s7 + $0x630] ss:$8 sps:$4 sm:$0xff]   ;;  %v8577_v31 = vld [vmem:[%s11613_s7 + $0x614] ss:$8 sps:$4 sm:$0xff]  }
 0x447   : > { %v2604_v34 = vpop.f32.mrf.mxu0  ;;  %2979 = vmatmul.mubr.bf16.gmra.mxu1 %v2693_v51  ;;  %3684 = vmatprep.subr.bf16.mxu1 %v8565_v21  ;;  %v8575_v32 = vld [vmem:[%s11613_s7 + $0x610] ss:$8 sps:$4 sm:$0xff]   ;;  %v8580_v51 = vld [vmem:[%s11613_s7 + $0x604] ss:$8 sps:$4 sm:$0xff]  }
 0x448   : > { %v2648_v35 = vpack.c.bf16 %v2604_v34, %v2600_v29  ;;  %v2675_v36 = vadd.bf16 %v9697_v30, %v2647_v33  ;;  %v8572_v29 = vld [vmem:[%s11613_s7 + $0x620] ss:$8 sps:$4 sm:$0xff]   ;;  %v8583_v34 = vld [vmem:[%s11613_s7 + $0x6f4] ss:$8 sps:$4 sm:$0xff]  }
 0x449   : > { %v2608_v37 = vpop.f32.mrf.mxu0  ;;  %v8578_v33 = vld [vmem:[%s11613_s7 + $0x600] ss:$8 sps:$4 sm:$0xff]  }
 0x44a   : > { %v2676_v39 = vadd.bf16 %v9701_v23, %v2648_v35  ;;  %v2695_v43 = vmax.bf16 %v8735_v3, %v2675_v36  ;;  %3685 = vmatpush1.bf16.msra.mxu1 %v8563_v46  ;;  %v8581_v35 = vld [vmem:[%s11613_s7 + $0x6f0] ss:$8 sps:$4 sm:$0xff]   ;;  %v8586_v36 = vld [vmem:[%s11613_s7 + $0x6e4] ss:$8 sps:$4 sm:$0xff]  }
 0x44b   : > { %v2610_v40 = vpop.f32.mrf.mxu0  ;;  %3686 = vmatprep.subr.bf16.mxu1 %v8568_v22 }
 0x44c   : > { %v2696_v41 = vmax.bf16 %v8735_v3, %v2676_v39  ;;  %v8589_v39 = vld [vmem:[%s11613_s7 + $0x6d4] ss:$8 sps:$4 sm:$0xff]  }
 0x44d   : > { %v2612_v42 = vpop.f32.mrf.mxu0 }
 0x44e   : > { %v2649_v45 = vpack.c.bf16 %v2612_v42, %v2608_v37  ;;  %2988 = vmatprep.mubr.bf16.mxu1 %v2696_v41  ;;  %3687 = vmatpush1.bf16.msra.mxu1 %v8566_v54  ;;  %v8584_v37 = vld [vmem:[%s11613_s7 + $0x6e0] ss:$8 sps:$4 sm:$0xff]   ;;  %v8592_v41 = vld [vmem:[%s11613_s7 + $0x6c4] ss:$8 sps:$4 sm:$0xff]  }
 0x44f   : > { %v2614_v47 = vpop.f32.mrf.mxu0  ;;  %2989 = vmatmul.mubr.bf16.gmra.mxu1 %v2695_v43  ;;  %3688 = vmatprep.subr.bf16.mxu1 %v8571_v55  ;;  %v9834_v43 = vsub.s32 2, %v9060_v24 }
 0x450   : > { %v2650_v48 = vpack.c.bf16 %v2614_v47, %v2610_v40  ;;  %v2677_v49 = vadd.bf16 %v9697_v30, %v2649_v45  ;;  %v8587_v40 = vld [vmem:[%s11613_s7 + $0x6d0] ss:$8 sps:$4 sm:$0xff]   ;;  %v8590_v45 = vld [vmem:[%s11613_s7 + $0x6c0] ss:$8 sps:$4 sm:$0xff]  }
 0x451   : > { %v2618_v50 = vpop.f32.mrf.mxu0 }
 0x452   : > { %v2678_v4 = vadd.bf16 %v9701_v23, %v2650_v48  ;;  %v2697_v56 = vmax.bf16 %v8735_v3, %v2677_v49  ;;  %3689 = vmatpush1.bf16.msra.mxu1 %v8569_v27  ;;  %v8595_v48 = vld [vmem:[%s11613_s7 + $0x6b4] ss:$8 sps:$4 sm:$0xff]  }
 0x453   : > { %v2620_v58 = vpop.f32.mrf.mxu0  ;;  %3690 = vmatprep.subr.bf16.mxu1 %v8574_v44 }
 0x454   : > { %v2698_v52 = vmax.bf16 %v8735_v3, %v2678_v4 }
 0x455   : > { %v2622_v53 = vpop.f32.mrf.mxu0 }
 0x456   : > { %v2651_v1 = vpack.c.bf16 %v2622_v53, %v2618_v50  ;;  %2998 = vmatprep.mubr.bf16.mxu1 %v2698_v52  ;;  %3691 = vmatpush1.bf16.msra.mxu1 %v8572_v29  ;;  %v9844_v50 = vrot.slane %v9242_v59, %v9834_v43  ;;  %v8593_v52 = vld [vmem:[%s11613_s7 + $0x6b0] ss:$8 sps:$4 sm:$0xff]  }
 0x457   : > { %v2624_v57 = vpop.f32.mrf.mxu0  ;;  %2999 = vmatmul.mubr.bf16.gmra.mxu1 %v2697_v56  ;;  %3692 = vmatprep.subr.bf16.mxu1 %v8577_v31  ;;  %v8598_v56 = vld [vmem:[%s11613_s7 + $0x6a4] ss:$8 sps:$4 sm:$0xff]  }
 0x458   : > { %v2652_v61 = vpack.c.bf16 %v2624_v57, %v2620_v58  ;;  %v2679_v62 = vadd.bf16 %v9697_v30, %v2651_v1  ;;  %v9848_v58 = vrot.slane %v9246_v60, %v9834_v43 }
 0x459   : > { %v2628_v63 = vpop.f32.mrf.mxu0 }
 0x45a   : > { %v2680_v0 = vadd.bf16 %v9701_v23, %v2652_v61  ;;  %v2699_v7 = vmax.bf16 %v8735_v3, %v2679_v62  ;;  %v2653_v8 = vpack.c.bf16 %v2628_v63, %v2628_v63  ;;  %3693 = vmatpush1.bf16.msra.mxu1 %v8575_v32  ;;  %v8596_v63 = vld [vmem:[%s11613_s7 + $0x6a0] ss:$8 sps:$4 sm:$0xff]  }
 0x45b   : > { %v2630_v2 = vpop.f32.mrf.mxu0  ;;  %3694 = vmatprep.subr.bf16.mxu1 %v8580_v51 }
 0x45c   : > { %v2654_v5 = vpack.c.bf16 %v2630_v2, %v2630_v2  ;;  %v2700_v6 = vmax.bf16 %v8735_v3, %v2680_v0  ;;  %v2681_v13 = vadd.bf16 %v9697_v30, %v2653_v8  ;;  %v8554_v30 = vld [vmem:[%s11613_s7 + $0x580] ss:$8 sps:$4 sm:$0xff]  }
 0x45d   : > { %v2632_v9 = vpop.f32.mrf.mxu0  ;;  %3319 = vmatpush2.bf16.msra.mxu0 %v8554_v30 }
 0x45e   : > { %v2682_v10 = vadd.bf16 %v9701_v23, %v2654_v5  ;;  %3008 = vmatprep.mubr.bf16.mxu1 %v2700_v6  ;;  %v2701_v23 = vmax.bf16 %v8735_v3, %v2681_v13  ;;  %3695 = vmatpush1.bf16.msra.mxu1 %v8578_v33 }
 0x45f   : > { %v2633_v11 = vpop.f32.mrf.mxu0  ;;  %3009 = vmatmul.mubr.bf16.gmra.mxu1 %v2699_v7  ;;  %3696 = vmatprep.subr.bf16.mxu1 %v8583_v34 }
 0x460   : > { %v2702_v12 = vmax.bf16 %v8735_v3, %v2682_v10 }
 0x462   : > { %3018 = vmatprep.mubr.bf16.mxu1 %v2702_v12  ;;  %3697 = vmatpush2.bf16.msra.mxu1 %v8581_v35 }
 0x463   : > { %3698 = vmatprep.subr.bf16.mxu1 %v8586_v36 }
 0x466   : > { %3699 = vmatpush2.bf16.msra.mxu1 %v8584_v37 }
 0x467   : > { %3019 = vmatmul.mubr.bf16.gmra.mxu1 %v2701_v23  ;;  %3700 = vmatprep.subr.bf16.mxu1 %v8589_v39 }
 0x46a   : > { %3701 = vmatpush2.bf16.msra.mxu1 %v8587_v40 }
 0x46b   : > { %3702 = vmatprep.subr.bf16.mxu1 %v8592_v41 }
 0x46e   : > { %3703 = vmatpush2.bf16.msra.mxu1 %v8590_v45 }
 0x46f   : > { %3704 = vmatprep.subr.bf16.mxu1 %v8595_v48 }
 0x472   : > { %3705 = vmatpush2.bf16.msra.mxu1 %v8593_v52 }
 0x473   : > { %3706 = vmatprep.subr.bf16.mxu1 %v8598_v56 }
 0x476   : > { %3707 = vmatpush2.bf16.msra.mxu1 %v8596_v63 }
 0x4df   : > { %v2930_v42 = vpop.f32.mrf.mxu1 }
 0x4e1   : > { %v2932_v47 = vpop.f32.mrf.mxu1 }
 0x4e3   : > { %v2934_v49 = vpop.f32.mrf.mxu1 }
 0x4e4   : > { %v3027_v4 = vpack.c.bf16 %v2934_v49, %v2930_v42 }
 0x4e5   : > { %v2936_v53 = vpop.f32.mrf.mxu1 }
 0x4e6   : > { %v3028_v1 = vpack.c.bf16 %v2936_v53, %v2932_v47  ;;  %v3055_v57 = vadd.bf16 %v9844_v50, %v3027_v4 }
 0x4e7   : > { %v2940_v61 = vpop.f32.mrf.mxu1 }
 0x4e8   : > { %v3056_v62 = vadd.bf16 %v9848_v58, %v3028_v1  ;;  %v3075_v5 = vmax.bf16 %v8735_v3, %v3055_v57 }
 0x4e9   : > { %v2942_v0 = vpop.f32.mrf.mxu1 }
 0x4ea   : > { %v3076_v2 = vmax.bf16 %v8735_v3, %v3056_v62 }
 0x4eb   : > { %v2944_v6 = vpop.f32.mrf.mxu1 }
 0x4ec   : > { %v3029_v7 = vpack.c.bf16 %v2944_v6, %v2940_v61  ;;  %3320 = vmatprep.mubr.bf16.mxu0 %v3076_v2 }
 0x4ed   : > { %v2946_v8 = vpop.f32.mrf.mxu1  ;;  %3321 = vmatmul.mubr.bf16.vlgmr.msra.gmra.mxu0 %v3075_v5 }
 0x4ee   : > { %v3030_v9 = vpack.c.bf16 %v2946_v8, %v2942_v0  ;;  %v3057_v10 = vadd.bf16 %v9844_v50, %v3029_v7 }
 0x4ef   : > { %v2950_v11 = vpop.f32.mrf.mxu1 }
 0x4f0   : > { %v3058_v12 = vadd.bf16 %v9848_v58, %v3030_v9  ;;  %v3077_v15 = vmax.bf16 %v8735_v3, %v3057_v10 }
 0x4f1   : > { %v2952_v13 = vpop.f32.mrf.mxu1 }
 0x4f2   : > { %v3078_v14 = vmax.bf16 %v8735_v3, %v3058_v12 }
 0x4f3   : > { %v2954_v23 = vpop.f32.mrf.mxu1 }
 0x4f4   : > { %v3031_v16 = vpack.c.bf16 %v2954_v23, %v2950_v11  ;;  %3330 = vmatprep.mubr.bf16.mxu0 %v3078_v14 }
 0x4f5   : > { %v2956_v30 = vpop.f32.mrf.mxu1  ;;  %3331 = vmatmul.mubr.bf16.gmra.mxu0 %v3077_v15 }
 0x4f6   : > { %v3032_v17 = vpack.c.bf16 %v2956_v30, %v2952_v13  ;;  %v3059_v18 = vadd.bf16 %v9844_v50, %v3031_v16 }
 0x4f7   : > { %v2960_v19 = vpop.f32.mrf.mxu1 }
 0x4f8   : > { %v3060_v20 = vadd.bf16 %v9848_v58, %v3032_v17  ;;  %v3079_v22 = vmax.bf16 %v8735_v3, %v3059_v18 }
 0x4f9   : > { %v2962_v21 = vpop.f32.mrf.mxu1 }
 0x4fa   : > { %v3080_v46 = vmax.bf16 %v8735_v3, %v3060_v20 }
 0x4fb   : > { %v2964_v54 = vpop.f32.mrf.mxu1 }
 0x4fc   : > { %v3033_v55 = vpack.c.bf16 %v2964_v54, %v2960_v19  ;;  %3340 = vmatprep.mubr.bf16.mxu0 %v3080_v46 }
 0x4fd   : > { %v2966_v27 = vpop.f32.mrf.mxu1  ;;  %3341 = vmatmul.mubr.bf16.gmra.mxu0 %v3079_v22 }
 0x4fe   : > { %v3034_v44 = vpack.c.bf16 %v2966_v27, %v2962_v21  ;;  %v3061_v29 = vadd.bf16 %v9844_v50, %v3033_v55 }
 0x4ff   : > { %v2970_v31 = vpop.f32.mrf.mxu1 }
 0x500   : > { %v3062_v32 = vadd.bf16 %v9848_v58, %v3034_v44  ;;  %v3081_v34 = vmax.bf16 %v8735_v3, %v3061_v29 }
 0x501   : > { %v2972_v51 = vpop.f32.mrf.mxu1 }
 0x502   : > { %v3082_v33 = vmax.bf16 %v8735_v3, %v3062_v32 }
 0x503   : > { %v2974_v35 = vpop.f32.mrf.mxu1 }
 0x504   : > { %v3035_v36 = vpack.c.bf16 %v2974_v35, %v2970_v31  ;;  %3350 = vmatprep.mubr.bf16.mxu0 %v3082_v33 }
 0x505   : > { %v2976_v37 = vpop.f32.mrf.mxu1  ;;  %3351 = vmatmul.mubr.bf16.gmra.mxu0 %v3081_v34 }
 0x506   : > { %v3036_v39 = vpack.c.bf16 %v2976_v37, %v2972_v51  ;;  %v3063_v40 = vadd.bf16 %v9844_v50, %v3035_v36 }
 0x507   : > { %v2980_v41 = vpop.f32.mrf.mxu1 }
 0x508   : > { %v3064_v42 = vadd.bf16 %v9848_v58, %v3036_v39  ;;  %v3083_v48 = vmax.bf16 %v8735_v3, %v3063_v40  ;;  %v8599_v40 = vld [vmem:[%s11613_s7 + $0x690] ss:$8 sps:$4 sm:$0xff]  }
 0x509   : > { %v2982_v45 = vpop.f32.mrf.mxu1 }
 0x50a   : > { %v3084_v47 = vmax.bf16 %v8735_v3, %v3064_v42  ;;  %v8604_v42 = vld [vmem:[%s11613_s7 + $0x684] ss:$8 sps:$4 sm:$0xff]  }
 0x50b   : > { %v2984_v49 = vpop.f32.mrf.mxu1 }
 0x50c   : > { %v3037_v4 = vpack.c.bf16 %v2984_v49, %v2980_v41  ;;  %3360 = vmatprep.mubr.bf16.mxu0 %v3084_v47  ;;  %v8601_v41 = vld [vmem:[%s11613_s7 + $0x694] ss:$8 sps:$4 sm:$0xff]   ;;  %v3939_v47 = vld [vmem:[%s11615_s9 + $0x1e0] sm:$0xff] }
 0x50d   : > { %v2986_v52 = vpop.f32.mrf.mxu1  ;;  %3361 = vmatmul.mubr.bf16.gmra.mxu0 %v3083_v48  ;;  %3708 = vmatprep.subr.bf16.mxu1 %v8601_v41  ;;  %v3927_v48 = vld [vmem:[%s11615_s9 + $0x180] sm:$0xff] }
 0x50e   : > { %v3038_v53 = vpack.c.bf16 %v2986_v52, %v2982_v45  ;;  %v3065_v56 = vadd.bf16 %v9844_v50, %v3037_v4  ;;  %3709 = vmatpush2.bf16.msra.mxu1 %v8599_v40  ;;  %v3935_v45 = vld [vmem:[%s11615_s9 + $0x1c0] sm:$0xff] }
 0x50f   : > { %v2990_v1 = vpop.f32.mrf.mxu1  ;;  %3710 = vmatprep.subr.bf16.mxu1 %v8604_v42  ;;  %v7788_v49 = vcombine.low %v3935_v45, %v3939_v47  ;;  %v7789_v4 = vcombine.high %v3935_v45, %v3939_v47  ;;  %v3931_v52 = vld [vmem:[%s11615_s9 + $0x1a0] sm:$0xff] }
 0x510   : > { %v3066_v57 = vadd.bf16 %v9848_v58, %v3038_v53  ;;  %v3085_v63 = vmax.bf16 %v8735_v3, %v3065_v56  ;;  %v7781_v53 = vcombine.high %v3927_v48, %v3931_v52  ;;  %v3919_v56 = vld [vmem:[%s11615_s9 + $0x140] sm:$0xff] }
 0x511   : > { %v2992_v61 = vpop.f32.mrf.mxu1  ;;  %4647 = vmatprep.subr.bf16.mxu0 %v7789_v4  ;;  %v3967_v41 = vld [vmem:[%s11615_s9 + $0x2c0] sm:$0xff] }
 0x512   : > { %v3086_v62 = vmax.bf16 %v8735_v3, %v3066_v57  ;;  %v9932_v57 = vld [vmem:[%s11615_s9 + $0x1c8] sm:$0xff]  ;;  %4648 = vmatpush1.bf16.msra.mxu0 %v7788_v49  ;;  %v3959_v49 = vld [vmem:[%s11615_s9 + $0x280] sm:$0xff] }
 0x513   : > { %v2994_v0 = vpop.f32.mrf.mxu1  ;;  %4649 = vmatprep.subr.bf16.mxu0 %v7781_v53  ;;  %v3963_v4 = vld [vmem:[%s11615_s9 + $0x2a0] sm:$0xff]  ;;  %v10013_v53 = vrot.slane %v9396_v26, %v9834_v43  ;;  %v3932_v26 = vld [vmem:[%s11615_s9 + $0x1a8] sm:$0xff] }
 0x514   : > { %v3039_v2 = vpack.c.bf16 %v2994_v0, %v2990_v1  ;;  %3370 = vmatprep.mubr.bf16.mxu0 %v3086_v62  ;;  %v3923_v1 = vld [vmem:[%s11615_s9 + $0x160] sm:$0xff]  ;;  %v7780_v62 = vcombine.low %v3927_v48, %v3931_v52  ;;  %v10003_v48 = vrot.slane %v9394_v25, %v9834_v43  ;;  %v7813_v25 = vcombine.high %v3959_v49, %v3963_v4 }
 0x515   : > { %v2996_v5 = vpop.f32.mrf.mxu1  ;;  %3371 = vmatmul.mubr.bf16.gmra.mxu0 %v3085_v63  ;;  %v7773_v0 = vcombine.high %v3919_v56, %v3923_v1 }
 0x516   : > { %v3040_v6 = vpack.c.bf16 %v2996_v5, %v2992_v61  ;;  %v3067_v7 = vadd.bf16 %v9844_v50, %v3039_v2  ;;  %v9937_v61 = vld [vmem:[%s11615_s9 + $0x1e8] sm:$0xff]  ;;  %v3911_v2 = vld [vmem:[%s11615_s9 + $0x100] sm:$0xff]  ;;  %4650 = vmatpush1.bf16.msra.mxu0 %v7780_v62 }
 0x517   : > { %v3000_v8 = vpop.f32.mrf.mxu1  ;;  %v7791_v63 = vcombine.high %v9932_v57, %v9937_v61  ;;  %v3915_v5 = vld [vmem:[%s11615_s9 + $0x120] sm:$0xff]  ;;  %4651 = vmatprep.subr.bf16.mxu0 %v7773_v0 }
 0x518   : > { %v3068_v9 = vadd.bf16 %v9848_v58, %v3040_v6  ;;  %v3087_v12 = vmax.bf16 %v8735_v3, %v3067_v7  ;;  %v7772_v6 = vcombine.low %v3919_v56, %v3923_v1  ;;  %v7765_v7 = vcombine.high %v3911_v2, %v3915_v5 }
 0x519   : > { %v3002_v10 = vpop.f32.mrf.mxu1 }
 0x51a   : > { %v3088_v11 = vmax.bf16 %v8735_v3, %v3068_v9  ;;  %v3907_v9 = vld [vmem:[%s11615_s9 + $0xe0] sm:$0xff]  ;;  %4652 = vmatpush1.bf16.msra.mxu0 %v7772_v6  ;;  %v7812_v6 = vcombine.low %v3959_v49, %v3963_v4  ;;  %v3888_v49 = vld [vmem:[%s11615_s9 + $0x48] sm:$0xff] }
 0x51b   : > { %v3004_v13 = vpop.f32.mrf.mxu1  ;;  %4653 = vmatprep.subr.bf16.mxu0 %v7765_v7  ;;  %v3892_v4 = vld [vmem:[%s11615_s9 + $0x68] sm:$0xff] }
 0x51c   : > { %v3041_v14 = vpack.c.bf16 %v3004_v13, %v3000_v8  ;;  %3380 = vmatprep.mubr.bf16.mxu0 %v3088_v11  ;;  %v3903_v8 = vld [vmem:[%s11615_s9 + $0xc0] sm:$0xff] }
 0x51d   : > { %v3006_v15 = vpop.f32.mrf.mxu1  ;;  %3381 = vmatmul.mubr.bf16.gmra.mxu0 %v3087_v12  ;;  %v7757_v11 = vcombine.high %v3903_v8, %v3907_v9  ;;  %v3895_v12 = vld [vmem:[%s11615_s9 + $0x80] sm:$0xff] }
 0x51e   : > { %v3042_v23 = vpack.c.bf16 %v3006_v15, %v3002_v10  ;;  %v3069_v16 = vadd.bf16 %v9844_v50, %v3041_v14  ;;  %v7764_v10 = vcombine.low %v3911_v2, %v3915_v5  ;;  %v3899_v13 = vld [vmem:[%s11615_s9 + $0xa0] sm:$0xff]  ;;  %v7756_v14 = vcombine.low %v3903_v8, %v3907_v9  ;;  %v3928_v5 = vld [vmem:[%s11615_s9 + $0x188] sm:$0xff] }
 0x51f   : > { %v3010_v30 = vpop.f32.mrf.mxu1  ;;  %v7749_v15 = vcombine.high %v3895_v12, %v3899_v13  ;;  %v7790_v8 = vcombine.low %v9932_v57, %v9937_v61  ;;  %v7782_v57 = vcombine.low %v3928_v5, %v3932_v26 }
 0x520   : > { %v3070_v17 = vadd.bf16 %v9848_v58, %v3042_v23  ;;  %v3089_v20 = vmax.bf16 %v8735_v3, %v3069_v16  ;;  %4654 = vmatpush1.bf16.msra.mxu0 %v7764_v10  ;;  %v3887_v23 = vld [vmem:[%s11615_s9 + $0x40] sm:$0xff] }
 0x521   : > { %v3012_v18 = vpop.f32.mrf.mxu1  ;;  %4655 = vmatprep.subr.bf16.mxu0 %v7757_v11  ;;  %v3891_v16 = vld [vmem:[%s11615_s9 + $0x60] sm:$0xff]  ;;  %v7783_v11 = vcombine.high %v3928_v5, %v3932_v26  ;;  %v3884_v5 = vld [vmem:[%s11615_s9 + $0x28] sm:$0xff] }
 0x522   : > { %v3090_v19 = vmax.bf16 %v8735_v3, %v3070_v17  ;;  %v7741_v17 = vcombine.high %v3887_v23, %v3891_v16 }
 0x523   : > { %v3014_v21 = vpop.f32.mrf.mxu1 }
 0x524   : > { %v3043_v46 = vpack.c.bf16 %v3014_v21, %v3010_v30  ;;  %3390 = vmatprep.mubr.bf16.mxu0 %v3090_v19  ;;  %4656 = vmatpush1.bf16.msra.mxu0 %v7756_v14  ;;  %v7748_v30 = vcombine.low %v3895_v12, %v3899_v13  ;;  %v3883_v19 = vld [vmem:[%s11615_s9 + $0x20] sm:$0xff]  ;;  %v3920_v13 = vld [vmem:[%s11615_s9 + $0x148] sm:$0xff] }
 0x525   : > { %v3016_v22 = vpop.f32.mrf.mxu1  ;;  %3391 = vmatmul.mubr.bf16.gmra.mxu0 %v3089_v20  ;;  %4657 = vmatprep.subr.bf16.mxu0 %v7749_v15  ;;  %v7740_v20 = vcombine.low %v3887_v23, %v3891_v16  ;;  %v3924_v14 = vld [vmem:[%s11615_s9 + $0x168] sm:$0xff] }
 0x526   : > { %v3044_v54 = vpack.c.bf16 %v3016_v22, %v3012_v18  ;;  %v3071_v55 = vadd.bf16 %v9844_v50, %v3043_v46  ;;  %v3879_v18 = vld [vmem:[%s11615_s9] sm:$0xff] }
 0x527   : > { %v3020_v27 = vpop.f32.mrf.mxu1  ;;  %v7733_v21 = vcombine.high %v3879_v18, %v3883_v19  ;;  %v3999_v46 = vld [vmem:[%s11615_s9 + $0x3c0] sm:$0xff] }
 0x528   : > { %v3072_v44 = vadd.bf16 %v9848_v58, %v3044_v54  ;;  %v3091_v51 = vmax.bf16 %v8735_v3, %v3071_v55  ;;  %v3045_v33 = vpack.c.bf16 %v3020_v27, %v3020_v27  ;;  %4658 = vmatpush1.bf16.msra.mxu0 %v7748_v30  ;;  %v4003_v22 = vld [vmem:[%s11615_s9 + $0x3e0] sm:$0xff]  ;;  %v7732_v54 = vcombine.low %v3879_v18, %v3883_v19  ;;  %v3912_v18 = vld [vmem:[%s11615_s9 + $0x108] sm:$0xff] }
 0x529   : > { %v3022_v29 = vpop.f32.mrf.mxu1  ;;  %4659 = vmatprep.subr.bf16.mxu0 %v7741_v17  ;;  %v7853_v55 = vcombine.high %v3999_v46, %v4003_v22  ;;  %v3991_v27 = vld [vmem:[%s11615_s9 + $0x380] sm:$0xff]  ;;  %v7775_v30 = vcombine.high %v3920_v13, %v3924_v14  ;;  %v3916_v19 = vld [vmem:[%s11615_s9 + $0x128] sm:$0xff] }
 0x52a   : > { %v3046_v31 = vpack.c.bf16 %v3022_v29, %v3022_v29  ;;  %v3092_v32 = vmax.bf16 %v8735_v3, %v3072_v44  ;;  %v3073_v39 = vadd.bf16 %v9844_v50, %v3045_v33  ;;  %v8602_v50 = vld [vmem:[%s11613_s7 + $0x680] ss:$8 sps:$4 sm:$0xff]   ;;  %v7852_v29 = vcombine.low %v3999_v46, %v4003_v22 }
 0x52b   : > { %v3024_v34 = vpop.f32.mrf.mxu1  ;;  %3711 = vmatpush2.bf16.msra.mxu1 %v8602_v50  ;;  %v3995_v44 = vld [vmem:[%s11615_s9 + $0x3a0] sm:$0xff]  ;;  %v7774_v46 = vcombine.low %v3920_v13, %v3924_v14 }
 0x52c   : > { %v3074_v35 = vadd.bf16 %v9848_v58, %v3046_v31  ;;  %3400 = vmatprep.mubr.bf16.mxu0 %v3092_v32  ;;  %v3093_v58 = vmax.bf16 %v8735_v3, %v3073_v39  ;;  %4778 = vmatprep.subr.bf16.mxu1 %v7791_v63  ;;  %v7845_v31 = vcombine.high %v3991_v27, %v3995_v44  ;;  %v3983_v32 = vld [vmem:[%s11615_s9 + $0x340] sm:$0xff] }
 0x52d   : > { %v3025_v36 = vpop.f32.mrf.mxu1  ;;  %3401 = vmatmul.mubr.bf16.gmra.mxu0 %v3091_v51  ;;  %v3987_v51 = vld [vmem:[%s11615_s9 + $0x360] sm:$0xff]  ;;  %v7844_v33 = vcombine.low %v3991_v27, %v3995_v44  ;;  %v3904_v44 = vld [vmem:[%s11615_s9 + $0xc8] sm:$0xff] }
 0x52e   : > { %v3094_v37 = vmax.bf16 %v8735_v3, %v3074_v35  ;;  %4660 = vmatpush1.bf16.msra.mxu0 %v7740_v20  ;;  %v7837_v34 = vcombine.high %v3983_v32, %v3987_v51  ;;  %v3975_v35 = vld [vmem:[%s11615_s9 + $0x300] sm:$0xff] }
 0x52f   : > { %4661 = vmatprep.subr.bf16.mxu0 %v7733_v21  ;;  %v3979_v36 = vld [vmem:[%s11615_s9 + $0x320] sm:$0xff] }
 0x530   : > { %3410 = vmatprep.mubr.bf16.mxu0 %v3094_v37  ;;  %v7836_v37 = vcombine.low %v3983_v32, %v3987_v51  ;;  %v7829_v39 = vcombine.high %v3975_v35, %v3979_v36  ;;  %v7828_v50 = vcombine.low %v3975_v35, %v3979_v36  ;;  %v7766_v51 = vcombine.low %v3912_v18, %v3916_v19 }
 0x532   : > { %4662 = vmatpush1.bf16.msra.mxu0 %v7732_v54 }
 0x533   : > { %4663 = vmatprep.subr.bf16.mxu0 %v7853_v55  ;;  %v7767_v55 = vcombine.high %v3912_v18, %v3916_v19 }
 0x535   : > { %3411 = vmatmul.mubr.bf16.gmra.mxu0 %v3093_v58  ;;  %v3971_v58 = vld [vmem:[%s11615_s9 + $0x2e0] sm:$0xff] }
 0x536   : > { %4664 = vmatpush2.bf16.msra.mxu0 %v7852_v29  ;;  %v7821_v45 = vcombine.high %v3967_v41, %v3971_v58  ;;  %v7820_v1 = vcombine.low %v3967_v41, %v3971_v58  ;;  %v3908_v29 = vld [vmem:[%s11615_s9 + $0xe8] sm:$0xff] }
 0x537   : > { %4665 = vmatprep.subr.bf16.mxu0 %v7845_v31  ;;  %v7759_v35 = vcombine.high %v3904_v44, %v3908_v29  ;;  %v7758_v58 = vcombine.low %v3904_v44, %v3908_v29 }
 0x53a   : > { %4666 = vmatpush2.bf16.msra.mxu0 %v7844_v33 }
 0x53b   : > { %4667 = vmatprep.subr.bf16.mxu0 %v7837_v34 }
 0x53e   : > { %4668 = vmatpush2.bf16.msra.mxu0 %v7836_v37  ;;  %v3896_v37 = vld [vmem:[%s11615_s9 + $0x88] sm:$0xff] }
 0x53f   : > { %4669 = vmatprep.subr.bf16.mxu0 %v7829_v39  ;;  %v3900_v39 = vld [vmem:[%s11615_s9 + $0xa8] sm:$0xff] }
 0x542   : > { %4670 = vmatpush2.bf16.msra.mxu0 %v7828_v50 }
 0x543   : > { %4671 = vmatprep.subr.bf16.mxu0 %v7821_v45  ;;  %v7751_v45 = vcombine.high %v3896_v37, %v3900_v39 }
 0x546   : > { %4672 = vmatpush2.bf16.msra.mxu0 %v7820_v1  ;;  %v7750_v1 = vcombine.low %v3896_v37, %v3900_v39 }
 0x547   : > { %4673 = vmatprep.subr.bf16.mxu0 %v7813_v25 }
 0x54a   : > { %4674 = vmatpush2.bf16.msra.mxu0 %v7812_v6  ;;  %v7742_v6 = vcombine.low %v3888_v49, %v3892_v4 }
 0x5ad   : > { %v3322_v40 = vpop.f32.mrf.mxu0 }
 0x5af   : > { %v3324_v42 = vpop.f32.mrf.mxu0 }
 0x5b1   : > { %v3326_v47 = vpop.f32.mrf.mxu0 }
 0x5b2   : > { %v3419_v52 = vpack.c.bf16 %v3326_v47, %v3322_v40 }
 0x5b3   : > { %v3328_v56 = vpop.f32.mrf.mxu0 }
 0x5b4   : > { %v3420_v62 = vpack.c.bf16 %v3328_v56, %v3324_v42  ;;  %v3447_v63 = vadd.bf16 %v10003_v48, %v3419_v52 }
 0x5b5   : > { %v3332_v0 = vpop.f32.mrf.mxu0 }
 0x5b6   : > { %v3448_v2 = vadd.bf16 %v10013_v53, %v3420_v62  ;;  %v3467_v9 = vmax.bf16 %v8735_v3, %v3447_v63  ;;  %v7743_v63 = vcombine.high %v3888_v49, %v3892_v4 }
 0x5b7   : > { %v3334_v43 = vpop.f32.mrf.mxu0 }
 0x5b8   : > { %v3468_v7 = vmax.bf16 %v8735_v3, %v3448_v2  ;;  %v3880_v2 = vld [vmem:[%s11615_s9 + $0x8] sm:$0xff] }
 0x5b9   : > { %v3336_v10 = vpop.f32.mrf.mxu0 }
 0x5ba   : > { %v3421_v12 = vpack.c.bf16 %v3336_v10, %v3332_v0  ;;  %3712 = vmatprep.mubr.bf16.mxu1 %v3468_v7 }
 0x5bb   : > { %v3338_v15 = vpop.f32.mrf.mxu0  ;;  %3713 = vmatmul.mubr.bf16.vlgmr.msra.gmra.mxu1 %v3467_v9  ;;  %v7735_v9 = vcombine.high %v3880_v2, %v3884_v5 }
 0x5bc   : > { %v3422_v23 = vpack.c.bf16 %v3338_v15, %v3334_v43  ;;  %4779 = vmatpush1.bf16.msra.mxu1 %v7790_v8  ;;  %v3449_v61 = vadd.bf16 %v10003_v48, %v3421_v12  ;;  %v4004_v12 = vld [vmem:[%s11615_s9 + $0x3e8] sm:$0xff]  ;;  %v7734_v15 = vcombine.low %v3880_v2, %v3884_v5 }
 0x5bd   : > { %v3342_v16 = vpop.f32.mrf.mxu0  ;;  %4780 = vmatprep.subr.bf16.mxu1 %v7783_v11  ;;  %v4000_v11 = vld [vmem:[%s11615_s9 + $0x3c8] sm:$0xff] }
 0x5be   : > { %v3450_v17 = vadd.bf16 %v10013_v53, %v3422_v23  ;;  %v3469_v22 = vmax.bf16 %v8735_v3, %v3449_v61  ;;  %v7855_v61 = vcombine.high %v4000_v11, %v4004_v12 }
 0x5bf   : > { %v3344_v20 = vpop.f32.mrf.mxu0 }
 0x5c0   : > { %v3470_v21 = vmax.bf16 %v8735_v3, %v3450_v17  ;;  %4781 = vmatpush1.bf16.msra.mxu1 %v7782_v57  ;;  %v3996_v17 = vld [vmem:[%s11615_s9 + $0x3a8] sm:$0xff] }
 0x5c1   : > { %v3346_v54 = vpop.f32.mrf.mxu0  ;;  %4782 = vmatprep.subr.bf16.mxu1 %v7775_v30  ;;  %v3992_v30 = vld [vmem:[%s11615_s9 + $0x388] sm:$0xff] }
 0x5c2   : > { %v3423_v27 = vpack.c.bf16 %v3346_v54, %v3342_v16  ;;  %3722 = vmatprep.mubr.bf16.mxu1 %v3470_v21 }
 0x5c3   : > { %v3348_v31 = vpop.f32.mrf.mxu0  ;;  %3723 = vmatmul.mubr.bf16.gmra.mxu1 %v3469_v22  ;;  %v7847_v22 = vcombine.high %v3992_v30, %v3996_v17 }
 0x5c4   : > { %v3424_v32 = vpack.c.bf16 %v3348_v31, %v3344_v20  ;;  %4783 = vmatpush1.bf16.msra.mxu1 %v7774_v46  ;;  %v3451_v33 = vadd.bf16 %v10003_v48, %v3423_v27  ;;  %v7854_v20 = vcombine.low %v4000_v11, %v4004_v12  ;;  %v3988_v27 = vld [vmem:[%s11615_s9 + $0x368] sm:$0xff]  ;;  %v7846_v31 = vcombine.low %v3992_v30, %v3996_v17 }
 0x5c5   : > { %v3352_v34 = vpop.f32.mrf.mxu0  ;;  %4784 = vmatprep.subr.bf16.mxu1 %v7767_v55  ;;  %v3984_v55 = vld [vmem:[%s11615_s9 + $0x348] sm:$0xff] }
 0x5c6   : > { %v3452_v36 = vadd.bf16 %v10013_v53, %v3424_v32  ;;  %v3471_v42 = vmax.bf16 %v8735_v3, %v3451_v33  ;;  %v7839_v33 = vcombine.high %v3984_v55, %v3988_v27 }
 0x5c7   : > { %v3354_v40 = vpop.f32.mrf.mxu0 }
 0x5c8   : > { %v3472_v41 = vmax.bf16 %v8735_v3, %v3452_v36  ;;  %4785 = vmatpush1.bf16.msra.mxu1 %v7766_v51  ;;  %v3980_v36 = vld [vmem:[%s11615_s9 + $0x328] sm:$0xff] }
 0x5c9   : > { %v3356_v50 = vpop.f32.mrf.mxu0  ;;  %4786 = vmatprep.subr.bf16.mxu1 %v7759_v35  ;;  %v3976_v35 = vld [vmem:[%s11615_s9 + $0x308] sm:$0xff] }
 0x5ca   : > { %v3425_v47 = vpack.c.bf16 %v3356_v50, %v3352_v34  ;;  %3732 = vmatprep.mubr.bf16.mxu1 %v3472_v41 }
 0x5cb   : > { %v3358_v52 = vpop.f32.mrf.mxu0  ;;  %3733 = vmatmul.mubr.bf16.gmra.mxu1 %v3471_v42  ;;  %v7831_v42 = vcombine.high %v3976_v35, %v3980_v36 }
 0x5cc   : > { %v3426_v56 = vpack.c.bf16 %v3358_v52, %v3354_v40  ;;  %4787 = vmatpush1.bf16.msra.mxu1 %v7758_v58  ;;  %v3453_v62 = vadd.bf16 %v10003_v48, %v3425_v47  ;;  %v7838_v40 = vcombine.low %v3984_v55, %v3988_v27  ;;  %v3972_v47 = vld [vmem:[%s11615_s9 + $0x2e8] sm:$0xff]  ;;  %v7830_v52 = vcombine.low %v3976_v35, %v3980_v36 }
 0x5cd   : > { %v3362_v25 = vpop.f32.mrf.mxu0  ;;  %4788 = vmatprep.subr.bf16.mxu1 %v7751_v45  ;;  %v3968_v45 = vld [vmem:[%s11615_s9 + $0x2c8] sm:$0xff] }
 0x5ce   : > { %v3454_v0 = vadd.bf16 %v10013_v53, %v3426_v56  ;;  %v3473_v7 = vmax.bf16 %v8735_v3, %v3453_v62  ;;  %v7823_v62 = vcombine.high %v3968_v45, %v3972_v47  ;;  %v7822_v2 = vcombine.low %v3968_v45, %v3972_v47  ;;  %v3964_v55 = vld [vmem:[%s11615_s9 + $0x2a8] sm:$0xff] }
 0x5cf   : > { %v3364_v26 = vpop.f32.mrf.mxu0  ;;  %v3952_v35 = vld [vmem:[%s11615_s9 + $0x248] sm:$0xff] }
 0x5d0   : > { %v3474_v43 = vmax.bf16 %v8735_v3, %v3454_v0  ;;  %4789 = vmatpush1.bf16.msra.mxu1 %v7750_v1 }
 0x5d1   : > { %v3366_v8 = vpop.f32.mrf.mxu0  ;;  %4790 = vmatprep.subr.bf16.mxu1 %v7743_v63 }
 0x5d2   : > { %v3427_v10 = vpack.c.bf16 %v3366_v8, %v3362_v25  ;;  %3742 = vmatprep.mubr.bf16.mxu1 %v3474_v43 }
 0x5d3   : > { %v3368_v13 = vpop.f32.mrf.mxu0  ;;  %3743 = vmatmul.mubr.bf16.gmra.mxu1 %v3473_v7 }
 0x5d4   : > { %v3428_v14 = vpack.c.bf16 %v3368_v13, %v3364_v26  ;;  %4791 = vmatpush1.bf16.msra.mxu1 %v7742_v6  ;;  %v3455_v23 = vadd.bf16 %v10003_v48, %v3427_v10 }
 0x5d5   : > { %v3372_v57 = vpop.f32.mrf.mxu0  ;;  %4792 = vmatprep.subr.bf16.mxu1 %v7735_v9 }
 0x5d6   : > { %v3456_v16 = vadd.bf16 %v10013_v53, %v3428_v14  ;;  %v3475_v21 = vmax.bf16 %v8735_v3, %v3455_v23 }
 0x5d7   : > { %v3374_v18 = vpop.f32.mrf.mxu0 }
 0x5d8   : > { %v3476_v19 = vmax.bf16 %v8735_v3, %v3456_v16  ;;  %4793 = vmatpush1.bf16.msra.mxu1 %v7734_v15 }
 0x5d9   : > { %v3376_v46 = vpop.f32.mrf.mxu0  ;;  %4794 = vmatprep.subr.bf16.mxu1 %v7855_v61 }
 0x5da   : > { %v3429_v54 = vpack.c.bf16 %v3376_v46, %v3372_v57  ;;  %3752 = vmatprep.mubr.bf16.mxu1 %v3476_v19 }
 0x5db   : > { %v3378_v44 = vpop.f32.mrf.mxu0  ;;  %3753 = vmatmul.mubr.bf16.gmra.mxu1 %v3475_v21 }
 0x5dc   : > { %v3430_v29 = vpack.c.bf16 %v3378_v44, %v3374_v18  ;;  %4795 = vmatpush2.bf16.msra.mxu1 %v7854_v20  ;;  %v3457_v32 = vadd.bf16 %v10003_v48, %v3429_v54  ;;  %v3960_v54 = vld [vmem:[%s11615_s9 + $0x288] sm:$0xff] }
 0x5dd   : > { %v3382_v51 = vpop.f32.mrf.mxu0  ;;  %4796 = vmatprep.subr.bf16.mxu1 %v7847_v22  ;;  %v7815_v44 = vcombine.high %v3960_v54, %v3964_v55 }
 0x5de   : > { %v3458_v34 = vadd.bf16 %v10013_v53, %v3430_v29  ;;  %v3477_v41 = vmax.bf16 %v8735_v3, %v3457_v32 }
 0x5df   : > { %v3384_v37 = vpop.f32.mrf.mxu0 }
 0x5e0   : > { %v3478_v39 = vmax.bf16 %v8735_v3, %v3458_v34  ;;  %4797 = vmatpush2.bf16.msra.mxu1 %v7846_v31  ;;  %v7814_v31 = vcombine.low %v3960_v54, %v3964_v55 }
 0x5e1   : > { %v3386_v58 = vpop.f32.mrf.mxu0  ;;  %4798 = vmatprep.subr.bf16.mxu1 %v7839_v33 }
 0x5e2   : > { %v3431_v50 = vpack.c.bf16 %v3386_v58, %v3382_v51  ;;  %3762 = vmatprep.mubr.bf16.mxu1 %v3478_v39  ;;  %v3955_v51 = vld [vmem:[%s11615_s9 + $0x260] sm:$0xff]  ;;  %v3944_v58 = vld [vmem:[%s11615_s9 + $0x208] sm:$0xff] }
 0x5e3   : > { %v3388_v49 = vpop.f32.mrf.mxu0  ;;  %3763 = vmatmul.mubr.bf16.gmra.mxu1 %v3477_v41  ;;  %v3947_v41 = vld [vmem:[%s11615_s9 + $0x220] sm:$0xff] }
 0x5e4   : > { %v3432_v4 = vpack.c.bf16 %v3388_v49, %v3384_v37  ;;  %4799 = vmatpush2.bf16.msra.mxu1 %v7838_v40  ;;  %v3459_v56 = vadd.bf16 %v10003_v48, %v3431_v50  ;;  %v3943_v40 = vld [vmem:[%s11615_s9 + $0x200] sm:$0xff]  ;;  %v3948_v50 = vld [vmem:[%s11615_s9 + $0x228] sm:$0xff] }
 0x5e5   : > { %v3392_v1 = vpop.f32.mrf.mxu0  ;;  %4800 = vmatprep.subr.bf16.mxu1 %v7831_v42  ;;  %v7797_v42 = vcombine.high %v3943_v40, %v3947_v41  ;;  %v7796_v45 = vcombine.low %v3943_v40, %v3947_v41  ;;  %v7798_v47 = vcombine.low %v3944_v58, %v3948_v50  ;;  %v7799_v49 = vcombine.high %v3944_v58, %v3948_v50  ;;  %v3905_v58 = vld [vmem:[%s11615_s9 + $0xd0] sm:$0xff] }
 0x5e6   : > { %v3460_v25 = vadd.bf16 %v10013_v53, %v3432_v4  ;;  %v3479_v5 = vmax.bf16 %v8735_v3, %v3459_v56  ;;  %v3937_v4 = vld [vmem:[%s11615_s9 + $0x1d0] sm:$0xff] }
 0x5e7   : > { %v3394_v63 = vpop.f32.mrf.mxu0 }
 0x5e8   : > { %v3480_v0 = vmax.bf16 %v8735_v3, %v3460_v25  ;;  %4801 = vmatpush2.bf16.msra.mxu1 %v7830_v52  ;;  %v3941_v52 = vld [vmem:[%s11615_s9 + $0x1f0] sm:$0xff]  ;;  %v3942_v25 = vld [vmem:[%s11615_s9 + $0x1f8] sm:$0xff] }
 0x5e9   : > { %v3396_v26 = vpop.f32.mrf.mxu0  ;;  %4802 = vmatprep.subr.bf16.mxu1 %v7823_v62  ;;  %v7792_v56 = vcombine.low %v3937_v4, %v3941_v52  ;;  %v3938_v62 = vld [vmem:[%s11615_s9 + $0x1d8] sm:$0xff] }
 0x5ea   : > { %v3433_v43 = vpack.c.bf16 %v3396_v26, %v3392_v1  ;;  %3772 = vmatprep.mubr.bf16.mxu1 %v3480_v0  ;;  %v7793_v1 = vcombine.high %v3937_v4, %v3941_v52  ;;  %v7795_v0 = vcombine.high %v3938_v62, %v3942_v25 }
 0x5eb   : > { %v3398_v6 = vpop.f32.mrf.mxu0  ;;  %3773 = vmatmul.mubr.bf16.gmra.mxu1 %v3479_v5  ;;  %v3833_v5 = vsub.s32 3, %v9060_v24 }
 0x5ec   : > { %v3434_v7 = vpack.c.bf16 %v3398_v6, %v3394_v63  ;;  %4803 = vmatpush2.bf16.msra.mxu1 %v7822_v2  ;;  %v3461_v8 = vadd.bf16 %v10003_v48, %v3433_v43  ;;  %v7794_v63 = vcombine.low %v3938_v62, %v3942_v25 }
 0x5ed   : > { %v3402_v9 = vpop.f32.mrf.mxu0  ;;  %4804 = vmatprep.subr.bf16.mxu1 %v7815_v44  ;;  %v10173_v6 = vrot.slane %v9242_v59, %v3833_v5  ;;  %v3933_v59 = vld [vmem:[%s11615_s9 + $0x1b0] sm:$0xff] }
 0x5ee   : > { %v3462_v10 = vadd.bf16 %v10013_v53, %v3434_v7  ;;  %v3481_v13 = vmax.bf16 %v8735_v3, %v3461_v8  ;;  %v10176_v8 = vrot.slane %v9246_v60, %v3833_v5  ;;  %v3930_v60 = vld [vmem:[%s11615_s9 + $0x198] sm:$0xff] }
 0x5ef   : > { %v3404_v11 = vpop.f32.mrf.mxu0 }
 0x5f0   : > { %v3482_v12 = vmax.bf16 %v8735_v3, %v3462_v10  ;;  %4805 = vmatpush2.bf16.msra.mxu1 %v7814_v31  ;;  %v3913_v31 = vld [vmem:[%s11615_s9 + $0x110] sm:$0xff] }
 0x5f1   : > { %v3406_v14 = vpop.f32.mrf.mxu0 }
 0x5f2   : > { %v3435_v15 = vpack.c.bf16 %v3406_v14, %v3402_v9  ;;  %3782 = vmatprep.mubr.bf16.mxu1 %v3482_v12  ;;  %v3934_v14 = vld [vmem:[%s11615_s9 + $0x1b8] sm:$0xff] }
 0x5f3   : > { %v3408_v23 = vpop.f32.mrf.mxu0  ;;  %3783 = vmatmul.mubr.bf16.gmra.mxu1 %v3481_v13  ;;  %v3929_v13 = vld [vmem:[%s11615_s9 + $0x190] sm:$0xff]  ;;  %v7786_v55 = vcombine.low %v3930_v60, %v3934_v14 }
 0x5f4   : > { %v3436_v57 = vpack.c.bf16 %v3408_v23, %v3404_v11  ;;  %v3463_v61 = vadd.bf16 %v10003_v48, %v3435_v15  ;;  %v7784_v54 = vcombine.low %v3929_v13, %v3933_v59 }
 0x5f5   : > { %v3412_v16 = vpop.f32.mrf.mxu0 }
 0x5f6   : > { %v3464_v30 = vadd.bf16 %v10013_v53, %v3436_v57  ;;  %v3483_v20 = vmax.bf16 %v8735_v3, %v3463_v61  ;;  %v3437_v21 = vpack.c.bf16 %v3412_v16, %v3412_v16  ;;  %v7785_v16 = vcombine.high %v3929_v13, %v3933_v59 }
 0x5f7   : > { %v3414_v17 = vpop.f32.mrf.mxu0 }
 0x5f8   : > { %v3438_v18 = vpack.c.bf16 %v3414_v17, %v3414_v17  ;;  %v3484_v19 = vmax.bf16 %v8735_v3, %v3464_v30  ;;  %v3465_v32 = vadd.bf16 %v10003_v48, %v3437_v21  ;;  %v3956_v48 = vld [vmem:[%s11615_s9 + $0x268] sm:$0xff]  ;;  %v3921_v30 = vld [vmem:[%s11615_s9 + $0x150] sm:$0xff]  ;;  %v7787_v17 = vcombine.high %v3930_v60, %v3934_v14  ;;  %v3926_v21 = vld [vmem:[%s11615_s9 + $0x178] sm:$0xff] }
 0x5f9   : > { %v3416_v46 = vpop.f32.mrf.mxu0  ;;  %v7807_v36 = vcombine.high %v3952_v35, %v3956_v48  ;;  %v7806_v37 = vcombine.low %v3952_v35, %v3956_v48  ;;  %v3889_v60 = vld [vmem:[%s11615_s9 + $0x50] sm:$0xff] }
 0x5fa   : > { %v3466_v22 = vadd.bf16 %v10013_v53, %v3438_v18  ;;  %3792 = vmatprep.mubr.bf16.mxu1 %v3484_v19  ;;  %v3951_v53 = vld [vmem:[%s11615_s9 + $0x240] sm:$0xff]  ;;  %v3485_v39 = vmax.bf16 %v8735_v3, %v3465_v32  ;;  %v3925_v19 = vld [vmem:[%s11615_s9 + $0x170] sm:$0xff] }
 0x5fb   : > { %v3417_v27 = vpop.f32.mrf.mxu0  ;;  %3793 = vmatmul.mubr.bf16.gmra.mxu1 %v3483_v20  ;;  %v7804_v33 = vcombine.low %v3951_v53, %v3955_v51  ;;  %v7805_v34 = vcombine.high %v3951_v53, %v3955_v51  ;;  %4806 = vmatprep.subr.bf16.mxu1 %v7807_v36  ;;  %v3922_v20 = vld [vmem:[%s11615_s9 + $0x158] sm:$0xff]  ;;  %v3917_v51 = vld [vmem:[%s11615_s9 + $0x130] sm:$0xff]  ;;  %v7776_v36 = vcombine.low %v3921_v30, %v3925_v19 }
 0x5fc   : > { %v3486_v29 = vmax.bf16 %v8735_v3, %v3466_v22  ;;  %4807 = vmatpush2.bf16.msra.mxu1 %v7806_v37  ;;  %v7779_v32 = vcombine.high %v3922_v20, %v3926_v21  ;;  %v7778_v37 = vcombine.low %v3922_v20, %v3926_v21  ;;  %v7769_v41 = vcombine.high %v3913_v31, %v3917_v51 }
 0x5fd   : > { %4675 = vmatprep.subr.bf16.mxu0 %v7805_v34  ;;  %4808 = vmatprep.subr.bf16.mxu1 %v7799_v49  ;;  %v3918_v34 = vld [vmem:[%s11615_s9 + $0x138] sm:$0xff] }
 0x5fe   : > { %3802 = vmatprep.mubr.bf16.mxu1 %v3486_v29  ;;  %4676 = vmatpush2.bf16.msra.mxu0 %v7804_v33  ;;  %v7777_v29 = vcombine.high %v3921_v30, %v3925_v19  ;;  %v3914_v33 = vld [vmem:[%s11615_s9 + $0x118] sm:$0xff] }
 0x5ff   : > { %4677 = vmatprep.subr.bf16.mxu0 %v7797_v42  ;;  %v7771_v42 = vcombine.high %v3914_v33, %v3918_v34  ;;  %v3910_v49 = vld [vmem:[%s11615_s9 + $0xf8] sm:$0xff] }
 0x600   : > { %4809 = vmatpush2.bf16.msra.mxu1 %v7798_v47  ;;  %v3906_v47 = vld [vmem:[%s11615_s9 + $0xd8] sm:$0xff] }
 0x601   : > { %5040 = vmatprep.subr.bf16.mxu1 %v7795_v0  ;;  %v3897_v0 = vld [vmem:[%s11615_s9 + $0x90] sm:$0xff]  ;;  %v3894_v30 = vld [vmem:[%s11615_s9 + $0x78] sm:$0xff] }
 0x602   : > { %4678 = vmatpush2.bf16.msra.mxu0 %v7796_v45  ;;  %v3909_v45 = vld [vmem:[%s11615_s9 + $0xf0] sm:$0xff] }
 0x603   : > { %3803 = vmatmul.mubr.bf16.gmra.mxu1 %v3485_v39  ;;  %4909 = vmatprep.subr.bf16.mxu0 %v7793_v1  ;;  %v7770_v1 = vcombine.low %v3914_v33, %v3918_v34 }
 0x67b   : > { %v3714_v2 = vpop.f32.mrf.mxu1 }
 0x67d   : > { %v3716_v26 = vpop.f32.mrf.mxu1 }
 0x67f   : > { %v3718_v43 = vpop.f32.mrf.mxu1 }
 0x680   : > { %v3811_v7 = vpack.c.bf16 %v3718_v43, %v3714_v2  ;;  %v7763_v2 = vcombine.high %v3906_v47, %v3910_v49  ;;  %v3898_v43 = vld [vmem:[%s11615_s9 + $0x98] sm:$0xff] }
 0x681   : > { %v3720_v9 = vpop.f32.mrf.mxu1 }
 0x682   : > { %v3812_v10 = vpack.c.bf16 %v3720_v9, %v3716_v26  ;;  %v3839_v11 = vadd.bf16 %v10173_v6, %v3811_v7  ;;  %v3901_v26 = vld [vmem:[%s11615_s9 + $0xb0] sm:$0xff]  ;;  %v3902_v7 = vld [vmem:[%s11615_s9 + $0xb8] sm:$0xff] }
 0x683   : > { %v3724_v12 = vpop.f32.mrf.mxu1  ;;  %v7753_v59 = vcombine.high %v3897_v0, %v3901_v26  ;;  %v7755_v14 = vcombine.high %v3898_v43, %v3902_v7  ;;  %v7752_v19 = vcombine.low %v3897_v0, %v3901_v26  ;;  %v7754_v20 = vcombine.low %v3898_v43, %v3902_v7  ;;  %v3997_v0 = vld [vmem:[%s11615_s9 + $0x3b0] sm:$0xff] }
 0x684   : > { %v3840_v24 = vadd.bf16 %v10176_v8, %v3812_v10  ;;  %v10196_v57 = vmax.bf16 %v8735_v3, %v3839_v11  ;;  %v7760_v11 = vcombine.low %v3905_v58, %v3909_v45 }
 0x685   : > { %v3726_v15 = vpop.f32.mrf.mxu1 }
 0x686   : > { %v10193_v23 = vmax.bf16 %v8735_v3, %v3840_v24 }
 0x687   : > { %v3728_v61 = vpop.f32.mrf.mxu1 }
 0x688   : > { %v3813_v18 = vpack.c.bf16 %v3728_v61, %v3724_v12  ;;  %4679 = vmatprep.mubr.bf16.mxu0 %v10193_v23  ;;  %4810 = vmatprep.mubr.bf16.mxu1 %v10193_v23  ;;  %v7762_v12 = vcombine.low %v3906_v47, %v3910_v49  ;;  %v3893_v61 = vld [vmem:[%s11615_s9 + $0x70] sm:$0xff] }
 0x689   : > { %v3730_v46 = vpop.f32.mrf.mxu1  ;;  %4680 = vmatmul.mubr.bf16.vlgmr.msra.gmra.mxu0 %v10196_v57  ;;  %4811 = vmatmul.mubr.bf16.vlgmr.msra.gmra.mxu1 %v10196_v57 }
 0x68a   : > { %v3814_v22 = vpack.c.bf16 %v3730_v46, %v3726_v15  ;;  %4910 = vmatpush1.bf16.msra.mxu0 %v7792_v56  ;;  %5041 = vmatpush1.bf16.msra.mxu1 %v7794_v63  ;;  %v3841_v27 = vadd.bf16 %v10173_v6, %v3813_v18  ;;  %v7768_v56 = vcombine.low %v3913_v31, %v3917_v51  ;;  %v3886_v31 = vld [vmem:[%s11615_s9 + $0x38] sm:$0xff] }
 0x68b   : > { %v3734_v44 = vpop.f32.mrf.mxu1  ;;  %4911 = vmatprep.subr.bf16.mxu0 %v7785_v16  ;;  %5042 = vmatprep.subr.bf16.mxu1 %v7787_v17  ;;  %v7761_v63 = vcombine.high %v3905_v58, %v3909_v45  ;;  %v3890_v16 = vld [vmem:[%s11615_s9 + $0x58] sm:$0xff]  ;;  %v7744_v51 = vcombine.low %v3889_v60, %v3893_v61  ;;  %v4005_v58 = vld [vmem:[%s11615_s9 + $0x3f0] sm:$0xff] }
 0x68c   : > { %v3842_v53 = vadd.bf16 %v10176_v8, %v3814_v22  ;;  %v10232_v39 = vmax.bf16 %v8735_v3, %v3841_v27  ;;  %v7745_v22 = vcombine.high %v3889_v60, %v3893_v61  ;;  %v7746_v33 = vcombine.low %v3890_v16, %v3894_v30  ;;  %v3986_v61 = vld [vmem:[%s11615_s9 + $0x358] sm:$0xff] }
 0x68d   : > { %v3736_v35 = vpop.f32.mrf.mxu1 }
 0x68e   : > { %v10229_v48 = vmax.bf16 %v8735_v3, %v3842_v53  ;;  %4912 = vmatpush1.bf16.msra.mxu0 %v7784_v54  ;;  %5043 = vmatpush1.bf16.msra.mxu1 %v7786_v55  ;;  %v3881_v54 = vld [vmem:[%s11615_s9 + $0x10] sm:$0xff]  ;;  %v7747_v55 = vcombine.high %v3890_v16, %v3894_v30  ;;  %v3990_v16 = vld [vmem:[%s11615_s9 + $0x378] sm:$0xff] }
 0x68f   : > { %v3738_v40 = vpop.f32.mrf.mxu1  ;;  %4913 = vmatprep.subr.bf16.mxu0 %v7777_v29  ;;  %5044 = vmatprep.subr.bf16.mxu1 %v7779_v32  ;;  %v3882_v29 = vld [vmem:[%s11615_s9 + $0x18] sm:$0xff] }
 0x690   : > { %v3815_v50 = vpack.c.bf16 %v3738_v40, %v3734_v44  ;;  %4689 = vmatprep.mubr.bf16.mxu0 %v10229_v48  ;;  %4820 = vmatprep.mubr.bf16.mxu1 %v10229_v48  ;;  %v3885_v44 = vld [vmem:[%s11615_s9 + $0x30] sm:$0xff]  ;;  %v7739_v40 = vcombine.high %v3882_v29, %v3886_v31 }
 0x691   : > { %v3740_v4 = vpop.f32.mrf.mxu1  ;;  %4690 = vmatmul.mubr.bf16.gmra.mxu0 %v10232_v39  ;;  %4821 = vmatmul.mubr.bf16.gmra.mxu1 %v10232_v39  ;;  %v7736_v49 = vcombine.low %v3881_v54, %v3885_v44 }
 0x692   : > { %v3816_v52 = vpack.c.bf16 %v3740_v4, %v3736_v35  ;;  %4914 = vmatpush1.bf16.msra.mxu0 %v7776_v36  ;;  %5045 = vmatpush1.bf16.msra.mxu1 %v7778_v37  ;;  %v3843_v62 = vadd.bf16 %v10173_v6, %v3815_v50  ;;  %v7737_v36 = vcombine.high %v3881_v54, %v3885_v44  ;;  %v4001_v37 = vld [vmem:[%s11615_s9 + $0x3d0] sm:$0xff]  ;;  %v4006_v50 = vld [vmem:[%s11615_s9 + $0x3f8] sm:$0xff] }
 0x693   : > { %v3744_v25 = vpop.f32.mrf.mxu1  ;;  %4915 = vmatprep.subr.bf16.mxu0 %v7769_v41  ;;  %5046 = vmatprep.subr.bf16.mxu1 %v7771_v42  ;;  %v4002_v42 = vld [vmem:[%s11615_s9 + $0x3d8] sm:$0xff]  ;;  %v7738_v4 = vcombine.low %v3882_v29, %v3886_v31  ;;  %v7856_v7 = vcombine.low %v4001_v37, %v4005_v58  ;;  %v7843_v54 = vcombine.high %v3986_v61, %v3990_v16 }
 0x694   : > { %v3844_v5 = vadd.bf16 %v10176_v8, %v3816_v52  ;;  %v10268_v13 = vmax.bf16 %v8735_v3, %v3843_v62  ;;  %v3993_v62 = vld [vmem:[%s11615_s9 + $0x390] sm:$0xff]  ;;  %v3978_v44 = vld [vmem:[%s11615_s9 + $0x318] sm:$0xff] }
 0x695   : > { %v3746_v9 = vpop.f32.mrf.mxu1  ;;  %v3982_v29 = vld [vmem:[%s11615_s9 + $0x338] sm:$0xff] }
 0x696   : > { %v10265_v10 = vmax.bf16 %v8735_v3, %v3844_v5  ;;  %4916 = vmatpush1.bf16.msra.mxu0 %v7768_v56  ;;  %5047 = vmatpush1.bf16.msra.mxu1 %v7770_v1  ;;  %v7857_v1 = vcombine.high %v4001_v37, %v4005_v58  ;;  %v3998_v5 = vld [vmem:[%s11615_s9 + $0x3b8] sm:$0xff] }
 0x697   : > { %v3748_v24 = vpop.f32.mrf.mxu1  ;;  %4917 = vmatprep.subr.bf16.mxu0 %v7761_v63  ;;  %5048 = vmatprep.subr.bf16.mxu1 %v7763_v2  ;;  %v3994_v2 = vld [vmem:[%s11615_s9 + $0x398] sm:$0xff] }
 0x698   : > { %v3817_v15 = vpack.c.bf16 %v3748_v24, %v3744_v25  ;;  %4699 = vmatprep.mubr.bf16.mxu0 %v10265_v10  ;;  %4830 = vmatprep.mubr.bf16.mxu1 %v10265_v10  ;;  %v7859_v25 = vcombine.high %v4002_v42, %v4006_v50  ;;  %v7849_v24 = vcombine.high %v3993_v62, %v3997_v0 }
 0x699   : > { %v3750_v17 = vpop.f32.mrf.mxu1  ;;  %4700 = vmatmul.mubr.bf16.gmra.mxu0 %v10268_v13  ;;  %4831 = vmatmul.mubr.bf16.gmra.mxu1 %v10268_v13  ;;  %v7851_v60 = vcombine.high %v3994_v2, %v3998_v5 }
 0x69a   : > { %v3818_v18 = vpack.c.bf16 %v3750_v17, %v3746_v9  ;;  %4918 = vmatpush1.bf16.msra.mxu0 %v7760_v11  ;;  %5049 = vmatpush1.bf16.msra.mxu1 %v7762_v12  ;;  %v3845_v21 = vadd.bf16 %v10173_v6, %v3817_v15  ;;  %v7858_v9 = vcombine.low %v4002_v42, %v4006_v50  ;;  %v3989_v15 = vld [vmem:[%s11615_s9 + $0x370] sm:$0xff]  ;;  %v3970_v50 = vld [vmem:[%s11615_s9 + $0x2d8] sm:$0xff] }
 0x69b   : > { %v3754_v46 = vpop.f32.mrf.mxu1  ;;  %4919 = vmatprep.subr.bf16.mxu0 %v7753_v59  ;;  %5050 = vmatprep.subr.bf16.mxu1 %v7755_v14  ;;  %v3985_v59 = vld [vmem:[%s11615_s9 + $0x350] sm:$0xff] }
 0x69c   : > { %v3846_v27 = vadd.bf16 %v10176_v8, %v3818_v18  ;;  %v10304_v34 = vmax.bf16 %v8735_v3, %v3845_v21  ;;  %v7848_v18 = vcombine.low %v3993_v62, %v3997_v0  ;;  %v3973_v42 = vld [vmem:[%s11615_s9 + $0x2f0] sm:$0xff] }
 0x69d   : > { %v3756_v32 = vpop.f32.mrf.mxu1 }
 0x69e   : > { %v10301_v53 = vmax.bf16 %v8735_v3, %v3846_v27  ;;  %4920 = vmatpush1.bf16.msra.mxu0 %v7752_v19  ;;  %5051 = vmatpush1.bf16.msra.mxu1 %v7754_v20  ;;  %v7850_v19 = vcombine.low %v3994_v2, %v3998_v5  ;;  %v3981_v27 = vld [vmem:[%s11615_s9 + $0x330] sm:$0xff]  ;;  %v3962_v5 = vld [vmem:[%s11615_s9 + $0x298] sm:$0xff] }
 0x69f   : > { %v3758_v35 = vpop.f32.mrf.mxu1  ;;  %4921 = vmatprep.subr.bf16.mxu0 %v7745_v22  ;;  %5052 = vmatprep.subr.bf16.mxu1 %v7747_v55  ;;  %v3977_v22 = vld [vmem:[%s11615_s9 + $0x310] sm:$0xff] }
 0x6a0   : > { %v3819_v41 = vpack.c.bf16 %v3758_v35, %v3754_v46  ;;  %4709 = vmatprep.mubr.bf16.mxu0 %v10301_v53  ;;  %4840 = vmatprep.mubr.bf16.mxu1 %v10301_v53  ;;  %v7841_v46 = vcombine.high %v3985_v59, %v3989_v15  ;;  %v7833_v37 = vcombine.high %v3977_v22, %v3981_v27  ;;  %v3965_v2 = vld [vmem:[%s11615_s9 + $0x2b0] sm:$0xff] }
 0x6a1   : > { %v3760_v45 = vpop.f32.mrf.mxu1  ;;  %4710 = vmatmul.mubr.bf16.gmra.mxu0 %v10304_v34  ;;  %4841 = vmatmul.mubr.bf16.gmra.mxu1 %v10304_v34 }
 0x6a2   : > { %v3820_v47 = vpack.c.bf16 %v3760_v45, %v3756_v32  ;;  %4922 = vmatpush1.bf16.msra.mxu0 %v7744_v51  ;;  %5053 = vmatpush1.bf16.msra.mxu1 %v7746_v33  ;;  %v3847_v52 = vadd.bf16 %v10173_v6, %v3819_v41  ;;  %v7840_v51 = vcombine.low %v3985_v59, %v3989_v15  ;;  %v3974_v45 = vld [vmem:[%s11615_s9 + $0x2f8] sm:$0xff] }
 0x6a3   : > { %v3764_v56 = vpop.f32.mrf.mxu1  ;;  %4923 = vmatprep.subr.bf16.mxu0 %v7737_v36  ;;  %5054 = vmatprep.subr.bf16.mxu1 %v7739_v40  ;;  %v7842_v33 = vcombine.low %v3986_v61, %v3990_v16  ;;  %v3969_v40 = vld [vmem:[%s11615_s9 + $0x2d0] sm:$0xff]  ;;  %v7835_v41 = vcombine.high %v3978_v44, %v3982_v29 }
 0x6a4   : > { %v3848_v63 = vadd.bf16 %v10176_v8, %v3820_v47  ;;  %v10340_v11 = vmax.bf16 %v8735_v3, %v3847_v52  ;;  %v7834_v52 = vcombine.low %v3978_v44, %v3982_v29  ;;  %v7825_v62 = vcombine.high %v3969_v40, %v3973_v42  ;;  %v3953_v61 = vld [vmem:[%s11615_s9 + $0x250] sm:$0xff] }
 0x6a5   : > { %v3766_v26 = vpop.f32.mrf.mxu1  ;;  %v3945_v44 = vld [vmem:[%s11615_s9 + $0x210] sm:$0xff] }
 0x6a6   : > { %v10337_v43 = vmax.bf16 %v8735_v3, %v3848_v63  ;;  %4924 = vmatpush1.bf16.msra.mxu0 %v7736_v49  ;;  %5055 = vmatpush1.bf16.msra.mxu1 %v7738_v4  ;;  %v7832_v4 = vcombine.low %v3977_v22, %v3981_v27  ;;  %v7827_v63 = vcombine.high %v3970_v50, %v3974_v45 }
 0x6a7   : > { %v3768_v12 = vpop.f32.mrf.mxu1  ;;  %4925 = vmatprep.subr.bf16.mxu0 %v7857_v1  ;;  %5056 = vmatprep.subr.bf16.mxu1 %v7859_v25  ;;  %v3961_v25 = vld [vmem:[%s11615_s9 + $0x290] sm:$0xff] }
 0x6a8   : > { %v3821_v14 = vpack.c.bf16 %v3768_v12, %v3764_v56  ;;  %4719 = vmatprep.mubr.bf16.mxu0 %v10337_v43  ;;  %4850 = vmatprep.mubr.bf16.mxu1 %v10337_v43  ;;  %v7824_v12 = vcombine.low %v3969_v40, %v3973_v42 }
 0x6a9   : > { %v3770_v30 = vpop.f32.mrf.mxu1  ;;  %4720 = vmatmul.mubr.bf16.gmra.mxu0 %v10340_v11  ;;  %4851 = vmatmul.mubr.bf16.gmra.mxu1 %v10340_v11 }
 0x6aa   : > { %v3822_v17 = vpack.c.bf16 %v3770_v30, %v3766_v26  ;;  %4926 = vmatpush2.bf16.msra.mxu0 %v7856_v7  ;;  %5057 = vmatpush2.bf16.msra.mxu1 %v7858_v9  ;;  %v3849_v20 = vadd.bf16 %v10173_v6, %v3821_v14  ;;  %v3966_v26 = vld [vmem:[%s11615_s9 + $0x2b8] sm:$0xff]  ;;  %v7817_v14 = vcombine.high %v3961_v25, %v3965_v2  ;;  %v3957_v30 = vld [vmem:[%s11615_s9 + $0x270] sm:$0xff] }
 0x6ab   : > { %v3774_v21 = vpop.f32.mrf.mxu1  ;;  %4927 = vmatprep.subr.bf16.mxu0 %v7849_v24  ;;  %5058 = vmatprep.subr.bf16.mxu1 %v7851_v60  ;;  %v7826_v24 = vcombine.low %v3970_v50, %v3974_v45  ;;  %v7819_v15 = vcombine.high %v3962_v5, %v3966_v26  ;;  %v7808_v40 = vcombine.low %v3953_v61, %v3957_v30 }
 0x6ac   : > { %v3850_v55 = vadd.bf16 %v10176_v8, %v3822_v17  ;;  %v10376_v35 = vmax.bf16 %v8735_v3, %v3849_v20  ;;  %v3954_v17 = vld [vmem:[%s11615_s9 + $0x258] sm:$0xff] }
 0x6ad   : > { %v3776_v31 = vpop.f32.mrf.mxu1 }
 0x6ae   : > { %v10373_v32 = vmax.bf16 %v8735_v3, %v3850_v55  ;;  %4928 = vmatpush2.bf16.msra.mxu0 %v7848_v18  ;;  %5059 = vmatpush2.bf16.msra.mxu1 %v7850_v19  ;;  %v3958_v18 = vld [vmem:[%s11615_s9 + $0x278] sm:$0xff]  ;;  %v7809_v55 = vcombine.high %v3953_v61, %v3957_v30  ;;  %v8607_v30 = vld [vmem:[%s11617_s11 + $0x70] sm:$0xff]  }
 0x6af   : > { %v3778_v36 = vpop.f32.mrf.mxu1  ;;  %4929 = vmatprep.subr.bf16.mxu0 %v7841_v46  ;;  %5060 = vmatprep.subr.bf16.mxu1 %v7843_v54  ;;  %v7818_v46 = vcombine.low %v3962_v5, %v3966_v26  ;;  %v7811_v27 = vcombine.high %v3954_v17, %v3958_v18 }
 0x6b0   : > { %v3823_v58 = vpack.c.bf16 %v3778_v36, %v3774_v21  ;;  %4729 = vmatprep.mubr.bf16.mxu0 %v10373_v32  ;;  %4860 = vmatprep.mubr.bf16.mxu1 %v10373_v32  ;;  %v7816_v21 = vcombine.low %v3961_v25, %v3965_v2  ;;  %v8605_v25 = vld [vmem:[%s11617_s11 + $0x78] sm:$0xff]  }
 0x6b1   : > { %v3780_v47 = vpop.f32.mrf.mxu1  ;;  %4730 = vmatmul.mubr.bf16.gmra.mxu0 %v10376_v35  ;;  %4861 = vmatmul.mubr.bf16.gmra.mxu1 %v10376_v35 }
 0x6b2   : > { %v3824_v49 = vpack.c.bf16 %v3780_v47, %v3776_v31  ;;  %4930 = vmatpush2.bf16.msra.mxu0 %v7840_v51  ;;  %5061 = vmatpush2.bf16.msra.mxu1 %v7842_v33  ;;  %v3851_v56 = vadd.bf16 %v10173_v6, %v3823_v58  ;;  %v3949_v31 = vld [vmem:[%s11615_s9 + $0x230] sm:$0xff]  ;;  %v3946_v51 = vld [vmem:[%s11615_s9 + $0x218] sm:$0xff] }
 0x6b3   : > { %v3784_v1 = vpop.f32.mrf.mxu1  ;;  %4931 = vmatprep.subr.bf16.mxu0 %v7833_v37  ;;  %5062 = vmatprep.subr.bf16.mxu1 %v7835_v41  ;;  %v3950_v33 = vld [vmem:[%s11615_s9 + $0x238] sm:$0xff]  ;;  %v7810_v41 = vcombine.low %v3954_v17, %v3958_v18  ;;  %v7801_v50 = vcombine.high %v3945_v44, %v3949_v31  ;;  %v8619_v17 = vld [vmem:[%s11619_s13 + $0x70] sm:$0xff]  }
 0x6b4   : > { %v3852_v0 = vadd.bf16 %v10176_v8, %v3824_v49  ;;  %v10412_v59 = vmax.bf16 %v8735_v3, %v3851_v56  ;;  %v7803_v45 = vcombine.high %v3946_v51, %v3950_v33  ;;  %v7802_v56 = vcombine.low %v3946_v51, %v3950_v33  ;;  %v8620_v18 = vld [vmem:[%s11619_s13 + $0x30] sm:$0xff]   ;;  %v8623_v33 = vld [vmem:[%s11617_s11 + $0x48] sm:$0xff]  }
 0x6b5   : > { %v3786_v7 = vpop.f32.mrf.mxu1  ;;  %v8631_v51 = vld [vmem:[%s11619_s13 + $0x10] sm:$0xff]  }
 0x6b6   : > { %v10409_v9 = vmax.bf16 %v8735_v3, %v3852_v0  ;;  %4932 = vmatpush2.bf16.msra.mxu0 %v7832_v4  ;;  %5063 = vmatpush2.bf16.msra.mxu1 %v7834_v52  ;;  %v7800_v52 = vcombine.low %v3945_v44, %v3949_v31  ;;  %v8616_v44 = vld [vmem:[%s11617_s11 + $0x50] sm:$0xff]  }
 0x6b7   : > { %v3788_v60 = vpop.f32.mrf.mxu1  ;;  %4933 = vmatprep.subr.bf16.mxu0 %v7825_v62  ;;  %5064 = vmatprep.subr.bf16.mxu1 %v7827_v63  ;;  %v8615_v63 = vld [vmem:[%s11619_s13 + $0x78] sm:$0xff]   ;;  %v8618_v31 = vld [vmem:[%s11617_s11 + $0x10] sm:$0xff]  }
 0x6b8   : > { %v3825_v16 = vpack.c.bf16 %v3788_v60, %v3784_v1  ;;  %4739 = vmatprep.mubr.bf16.mxu0 %v10409_v9  ;;  %4870 = vmatprep.mubr.bf16.mxu1 %v10409_v9 }
 0x6b9   : > { %v3790_v19 = vpop.f32.mrf.mxu1  ;;  %4740 = vmatmul.mubr.bf16.gmra.mxu0 %v10412_v59  ;;  %4871 = vmatmul.mubr.bf16.gmra.mxu1 %v10412_v59 }
 0x6ba   : > { %v3826_v20 = vpack.c.bf16 %v3790_v19, %v3786_v7  ;;  %4934 = vmatpush2.bf16.msra.mxu0 %v7824_v12  ;;  %5065 = vmatpush2.bf16.msra.mxu1 %v7826_v24  ;;  %v3853_v22 = vadd.bf16 %v10173_v6, %v3825_v16  ;;  %v8606_v16 = vld [vmem:[%s11617_s11 + $0x38] sm:$0xff]   ;;  %v8609_v19 = vld [vmem:[%s11617_s11 + $0x68] sm:$0xff]  }
 0x6bb   : > { %v3794_v54 = vpop.f32.mrf.mxu1  ;;  %4935 = vmatprep.subr.bf16.mxu0 %v7817_v14  ;;  %5066 = vmatprep.subr.bf16.mxu1 %v7819_v15 }
 0x6bc   : > { %v3854_v29 = vadd.bf16 %v10176_v8, %v3826_v20  ;;  %v10448_v58 = vmax.bf16 %v8735_v3, %v3853_v22  ;;  %v8622_v20 = vld [vmem:[%s11619_s13 + $0x28] sm:$0xff]   ;;  %v8612_v22 = vld [vmem:[%s11617_s11 + $0x20] sm:$0xff]  }
 0x6bd   : > { %v3796_v36 = vpop.f32.mrf.mxu1 }
 0x6be   : > { %v10445_v37 = vmax.bf16 %v8735_v3, %v3854_v29  ;;  %4936 = vmatpush2.bf16.msra.mxu0 %v7816_v21  ;;  %5067 = vmatpush2.bf16.msra.mxu1 %v7818_v46  ;;  %v8611_v21 = vld [vmem:[%s11617_s11 + $0x60] sm:$0xff]   ;;  %v8629_v29 = vld [vmem:[%s11619_s13 + $0x50] sm:$0xff]  }
 0x6bf   : > { %v3798_v42 = vpop.f32.mrf.mxu1  ;;  %4937 = vmatprep.subr.bf16.mxu0 %v7809_v55  ;;  %5068 = vmatprep.subr.bf16.mxu1 %v7811_v27  ;;  %v8625_v46 = vld [vmem:[%s11619_s13 + $0x60] sm:$0xff]   ;;  %v8613_v55 = vld [vmem:[%s11617_s11 + $0x58] sm:$0xff]  }
 0x6c0   : > { %v3827_v47 = vpack.c.bf16 %v3798_v42, %v3794_v54  ;;  %4749 = vmatprep.mubr.bf16.mxu0 %v10445_v37  ;;  %4880 = vmatprep.mubr.bf16.mxu1 %v10445_v37  ;;  %v8626_v54 = vld [vmem:[%s11619_s13 + $0x20] sm:$0xff]   ;;  %v8628_v27 = vld [vmem:[%s11619_s13 + $0x18] sm:$0xff]  }
 0x6c1   : > { %v3800_v49 = vpop.f32.mrf.mxu1  ;;  %4750 = vmatmul.mubr.bf16.gmra.mxu0 %v10448_v58  ;;  %4881 = vmatmul.mubr.bf16.gmra.mxu1 %v10448_v58  ;;  %v8630_v42 = vld [vmem:[%s11617_s11 + $0x40] sm:$0xff]  }
 0x6c2   : > { %v3828_v4 = vpack.c.bf16 %v3800_v49, %v3796_v36  ;;  %4938 = vmatpush2.bf16.msra.mxu0 %v7808_v40  ;;  %5069 = vmatpush2.bf16.msra.mxu1 %v7810_v41  ;;  %v3855_v1 = vadd.bf16 %v10173_v6, %v3827_v47  ;;  %v6582_v36 = vld [vmem:[%s10574_s4] sm:$0xff]  ;;  %v8624_v40 = vld [vmem:[%s11617_s11 + $0x8] sm:$0xff]  }
 0x6c3   : > { %v3804_v62 = vpop.f32.mrf.mxu1  ;;  %4939 = vmatprep.subr.bf16.mxu0 %v7801_v50  ;;  %5070 = vmatprep.subr.bf16.mxu1 %v7803_v45  ;;  %v8634_v41 = vld [vmem:[%s11619_s13 + $0x8] sm:$0xff]   ;;  %v8635_v50 = vld [vmem:[%s11619_s13 + $0x40] sm:$0xff]   ;;  %v6585_v45 = vld [vmem:[%s10574_s4 + $0x18] sm:$0xff] }
 0x6c4   : > { %v3856_v0 = vadd.bf16 %v10176_v8, %v3828_v4  ;;  %v10466_v7 = vmax.bf16 %v8735_v3, %v3855_v1  ;;  %v3829_v12 = vpack.c.bf16 %v3804_v62, %v3804_v62  ;;  %v6583_v47 = vld [vmem:[%s10574_s4 + $0x8] sm:$0xff]  ;;  %v8632_v49 = vld [vmem:[%s11617_s11] sm:$0xff]   ;;  %v6588_v1 = vld [vmem:[%s10574_s4 + $0x30] sm:$0xff] }
 0x6c5   : > { %v3806_v2 = vpop.f32.mrf.mxu1  ;;  %v8636_v4 = vld [vmem:[%s11619_s13] sm:$0xff]  }
 0x6c6   : > { %v10463_v5 = vmax.bf16 %v8735_v3, %v3856_v0  ;;  %v3830_v26 = vpack.c.bf16 %v3806_v2, %v3806_v2  ;;  %4940 = vmatpush2.bf16.msra.mxu0 %v7800_v52  ;;  %5071 = vmatpush2.bf16.msra.mxu1 %v7802_v56  ;;  %v3857_v61 = vadd.bf16 %v10173_v6, %v3829_v12  ;;  %v8617_v6 = vld [vmem:[%s11619_s13 + $0x38] sm:$0xff]   ;;  %v6586_v52 = vld [vmem:[%s10574_s4 + $0x20] sm:$0xff] }
 0x6c7   : > { %v3808_v24 = vpop.f32.mrf.mxu1  ;;  %7930 = vmatprep.subr.bf16.mxu0 %v8605_v25  ;;  %8006 = vmatprep.subr.bf16.mxu1 %v8615_v63  ;;  %v6589_v56 = vld [vmem:[%s10574_s4 + $0x38] sm:$0xff]  ;;  %v6591_v63 = vld [vmem:[%s10574_s4 + $0x48] sm:$0xff] }
 0x6c8   : > { %v3858_v60 = vadd.bf16 %v10176_v8, %v3830_v26  ;;  %4759 = vmatprep.mubr.bf16.mxu0 %v10463_v5  ;;  %4890 = vmatprep.mubr.bf16.mxu1 %v10463_v5  ;;  %v10480_v8 = vmax.bf16 %v8735_v3, %v3857_v61  ;;  %v6593_v2 = vld [vmem:[%s10574_s4 + $0x58] sm:$0xff]  ;;  %v6592_v26 = vld [vmem:[%s10574_s4 + $0x50] sm:$0xff] }
 0x6c9   : > { %v3809_v14 = vpop.f32.mrf.mxu1  ;;  %4760 = vmatmul.mubr.bf16.gmra.mxu0 %v10466_v7  ;;  %4891 = vmatmul.mubr.bf16.gmra.mxu1 %v10466_v7  ;;  %v10650_v61 = vld [vmem:[%s11623_s17 + $0x78] sm:$0xff]  }
 0x6ca   : > { %v10474_v15 = vmax.bf16 %v8735_v3, %v3858_v60 }
 0x6cc   : > { %4769 = vmatprep.mubr.bf16.mxu0 %v10474_v15  ;;  %4900 = vmatprep.mubr.bf16.mxu1 %v10474_v15 }
 0x6d1   : > { %4770 = vmatmul.mubr.bf16.gmra.mxu0 %v10480_v8  ;;  %4901 = vmatmul.mubr.bf16.gmra.mxu1 %v10480_v8 }
 0x6d2   : > { %4941 = vmatprep.mubr.bf16.mxu0 %v10193_v23  ;;  %5072 = vmatprep.mubr.bf16.mxu1 %v10193_v23  ;;  %v8608_v23 = vld [vmem:[%s11617_s11 + $0x30] sm:$0xff]  }
 0x6d9   : > { %4942 = vmatmul.mubr.bf16.vlgmr.msra.gmra.mxu0 %v10196_v57  ;;  %5073 = vmatmul.mubr.bf16.vlgmr.msra.gmra.mxu1 %v10196_v57  ;;  %v8621_v57 = vld [vmem:[%s11619_s13 + $0x68] sm:$0xff]  }
 0x6da   : > { %4951 = vmatprep.mubr.bf16.mxu0 %v10229_v48  ;;  %5082 = vmatprep.mubr.bf16.mxu1 %v10229_v48  ;;  %v8610_v48 = vld [vmem:[%s11617_s11 + $0x28] sm:$0xff]  }
 0x6db   : > { %7931 = vmatpush3.bf16.msra.mxu0 %v8606_v16  ;;  %8007 = vmatpush3.bf16.msra.mxu1 %v8617_v6  ;;  %v6597_v16 = vld [vmem:[%s10574_s4 + $0x78] sm:$0xff]  ;;  %v6596_v6 = vld [vmem:[%s10574_s4 + $0x70] sm:$0xff] }
 0x6dc   : > { %7932 = vmatprep.subr.bf16.mxu0 %v8607_v30  ;;  %8008 = vmatprep.subr.bf16.mxu1 %v8619_v17  ;;  %v6598_v17 = vld [vmem:[%s10574_s4 + $0x80] sm:$0xff] }
 0x6df   : > { %7933 = vmatpush3.bf16.msra.mxu0 %v8608_v23  ;;  %8009 = vmatpush3.bf16.msra.mxu1 %v8620_v18 }
 0x6e0   : > { %7934 = vmatprep.subr.bf16.mxu0 %v8609_v19  ;;  %8010 = vmatprep.subr.bf16.mxu1 %v8621_v57  ;;  %v6600_v19 = vld [vmem:[%s10574_s4 + $0x90] sm:$0xff] }
 0x6e1   : > { %4952 = vmatmul.mubr.bf16.gmra.mxu0 %v10232_v39  ;;  %5083 = vmatmul.mubr.bf16.gmra.mxu1 %v10232_v39  ;;  %v8627_v39 = vld [vmem:[%s11619_s13 + $0x58] sm:$0xff]  }
 0x6e2   : > { %4961 = vmatprep.mubr.bf16.mxu0 %v10265_v10  ;;  %5092 = vmatprep.mubr.bf16.mxu1 %v10265_v10  ;;  %v8614_v10 = vld [vmem:[%s11617_s11 + $0x18] sm:$0xff]  }
 0x6e3   : > { %7935 = vmatpush3.bf16.msra.mxu0 %v8610_v48  ;;  %8011 = vmatpush3.bf16.msra.mxu1 %v8622_v20 }
 0x6e4   : > { %7936 = vmatprep.subr.bf16.mxu0 %v8611_v21  ;;  %8012 = vmatprep.subr.bf16.mxu1 %v8625_v46 }
 0x6e7   : > { %7937 = vmatpush3.bf16.msra.mxu0 %v8612_v22  ;;  %8013 = vmatpush3.bf16.msra.mxu1 %v8626_v54  ;;  %v8737_v22 = vmov 1  }
 0x6e8   : > { %7938 = vmatprep.subr.bf16.mxu0 %v8613_v55  ;;  %8014 = vmatprep.subr.bf16.mxu1 %v8627_v39 }
 0x6e9   : > { %4962 = vmatmul.mubr.bf16.gmra.mxu0 %v10268_v13  ;;  %5093 = vmatmul.mubr.bf16.gmra.mxu1 %v10268_v13  ;;  %v8633_v13 = vld [vmem:[%s11619_s13 + $0x48] sm:$0xff]  }
 0x6ea   : > { %4971 = vmatprep.mubr.bf16.mxu0 %v10301_v53  ;;  %5102 = vmatprep.mubr.bf16.mxu1 %v10301_v53  ;;  %v6584_v53 = vld [vmem:[%s10574_s4 + $0x10] sm:$0xff] }
 0x6eb   : > { %7939 = vmatpush3.bf16.msra.mxu0 %v8614_v10  ;;  %8015 = vmatpush3.bf16.msra.mxu1 %v8628_v27  ;;  %8670 = vtanh.f32 %v6584_v53 }
 0x6ec   : > { %7940 = vmatprep.subr.bf16.mxu0 %v8616_v44  ;;  %8016 = vmatprep.subr.bf16.mxu1 %v8629_v29  ;;  %8672 = vtanh.f32 %v6582_v36 }
 0x6ed   : > { %8674 = vtanh.f32 %v6585_v45 }
 0x6ee   : > { %8676 = vtanh.f32 %v6583_v47 }
 0x6ef   : > { %7941 = vmatpush3.bf16.msra.mxu0 %v8618_v31  ;;  %8017 = vmatpush3.bf16.msra.mxu1 %v8631_v51 }
 0x6f0   : > { %7942 = vmatprep.subr.bf16.mxu0 %v8623_v33  ;;  %8018 = vmatprep.subr.bf16.mxu1 %v8633_v13 }
 0x6f1   : > { %4972 = vmatmul.mubr.bf16.gmra.mxu0 %v10304_v34  ;;  %5103 = vmatmul.mubr.bf16.gmra.mxu1 %v10304_v34  ;;  %v8637_v34 = vld [vmem:[%s11621_s15 + $0x78] sm:$0xff]  }
 0x6f2   : > { %4981 = vmatprep.mubr.bf16.mxu0 %v10337_v43  ;;  %5112 = vmatprep.mubr.bf16.mxu1 %v10337_v43  ;;  %v6587_v43 = vld [vmem:[%s10574_s4 + $0x28] sm:$0xff] }
 0x6f3   : > { %7943 = vmatpush3.bf16.msra.mxu0 %v8624_v40  ;;  %8019 = vmatpush3.bf16.msra.mxu1 %v8634_v41  ;;  %8678 = vtanh.f32 %v6587_v43 }
 0x6f4   : > { %7944 = vmatprep.subr.bf16.mxu0 %v8630_v42  ;;  %8020 = vmatprep.subr.bf16.mxu1 %v8635_v50  ;;  %8680 = vtanh.f32 %v6586_v52 }
 0x6f5   : > { %8682 = vtanh.f32 %v6589_v56 }
 0x6f6   : > { %8684 = vtanh.f32 %v6588_v1 }
 0x6f7   : > { %7945 = vmatpush3.bf16.msra.mxu0 %v8632_v49  ;;  %8021 = vmatpush3.bf16.msra.mxu1 %v8636_v4  ;;  %8686 = vtanh.f32 %v6591_v63 }
 0x6f8   : > { %8082 = vmatprep.subr.bf16.mxu0 %v8637_v34  ;;  %v10613_v62 = vpop.eup %8670  ;;  %8234 = vmatprep.subr.bf16.mxu1 %v10650_v61 }
 0x6f9   : > { %4982 = vmatmul.mubr.bf16.gmra.mxu0 %v10340_v11  ;;  %5113 = vmatmul.mubr.bf16.gmra.mxu1 %v10340_v11  ;;  %v10615_v25 = vpop.eup %8672  ;;  %v6590_v11 = vld [vmem:[%s10574_s4 + $0x40] sm:$0xff] }
 0x6fa   : > { %4991 = vmatprep.mubr.bf16.mxu0 %v10373_v32  ;;  %5122 = vmatprep.mubr.bf16.mxu1 %v10373_v32  ;;  %v10621_v0 = vpop.eup %8674  ;;  %8688 = vtanh.f32 %v6590_v11 }
 0x6fb   : > { %6632 = vperm.xlu1 %8262, %v10613_v62   ;;  %6622 = vperm.xlu0 %8261, %v10615_v25   ;;  %v10623_v32 = vpop.eup %8676  ;;  %8690 = vtanh.f32 %v6593_v2 }
 0x6fc   : > { %8692 = vtanh.f32 %v6592_v26 }
 0x6ff   : > { %6637 = vperm.xlu1 %8262, %v10621_v0   ;;  %6627 = vperm.xlu0 %8261, %v10623_v32  }
 0x700   : > { %v10633_v12 = vpop.eup %8678 }
 0x701   : > { %4992 = vmatmul.mubr.bf16.gmra.mxu0 %v10376_v35  ;;  %5123 = vmatmul.mubr.bf16.gmra.mxu1 %v10376_v35  ;;  %v10635_v24 = vpop.eup %8680  ;;  %v6595_v35 = vld [vmem:[%s10574_s4 + $0x68] sm:$0xff] }
 0x702   : > { %5001 = vmatprep.mubr.bf16.mxu0 %v10409_v9  ;;  %5132 = vmatprep.mubr.bf16.mxu1 %v10409_v9  ;;  %v6594_v9 = vld [vmem:[%s10574_s4 + $0x60] sm:$0xff]  ;;  %v10641_v60 = vpop.eup %8682  ;;  %8694 = vtanh.f32 %v6595_v35 }
 0x703   : > { %6647 = vperm.xlu1 %8262, %v10633_v12   ;;  %6642 = vperm.xlu0 %8261, %v10635_v24   ;;  %v8685_v14 = vpop.eup %8684  ;;  %8696 = vtanh.f32 %v6594_v9 }
 0x704   : > { %v8687_v30 = vpop.eup %8686  ;;  %8698 = vtanh.f32 %v6597_v16  ;;  %v10714_v16 = vld [vmem:[%s11623_s17 + $0x38] sm:$0xff]  }
 0x705   : > { %8700 = vtanh.f32 %v6596_v6 }
 0x707   : > { %6657 = vperm.xlu1 %8262, %v10641_v60   ;;  %6652 = vperm.xlu0 %8261, %v8685_v14  }
 0x709   : > { %5002 = vmatmul.mubr.bf16.gmra.mxu0 %v10412_v59  ;;  %5133 = vmatmul.mubr.bf16.gmra.mxu1 %v10412_v59  ;;  %v8689_v59 = vpop.eup %8688 }
 0x70a   : > { %5011 = vmatprep.mubr.bf16.mxu0 %v10445_v37  ;;  %5142 = vmatprep.mubr.bf16.mxu1 %v10445_v37  ;;  %v6599_v37 = vld [vmem:[%s10574_s4 + $0x88] sm:$0xff]  ;;  %v8691_v23 = vpop.eup %8690  ;;  %s11152_s4 = scalar_lea.vmem %s11625_s19, %s8882_s29 }
 0x70b   : > { %6667 = vperm.xlu1 %8262, %v8687_v30   ;;  %6662 = vperm.xlu0 %8261, %v8689_v59   ;;  %8702 = vtanh.f32 %v6599_v37  ;;  %v8693_v18 = vpop.eup %8692 }
 0x70c   : > { %8704 = vtanh.f32 %v6598_v17 }
 0x70d   : > { %8706 = vtanh.f32 %v6600_v19  ;;  %v8640_v19 = vld [vmem:[%s11621_s15 + $0x30] sm:$0xff]  }
 0x70f   : > { %6677 = vperm.xlu1 %8262, %v8691_v23   ;;  %6672 = vperm.xlu0 %8261, %v8693_v18   ;;  %v8695_v57 = vpop.eup %8694 }
 0x710   : > { %v8697_v48 = vpop.eup %8696 }
 0x711   : > { %5012 = vmatmul.mubr.bf16.gmra.mxu0 %v10448_v58  ;;  %5143 = vmatmul.mubr.bf16.gmra.mxu1 %v10448_v58  ;;  %v8699_v20 = vpop.eup %8698 }
 0x712   : > { %5021 = vmatprep.mubr.bf16.mxu0 %v10463_v5  ;;  %5152 = vmatprep.mubr.bf16.mxu1 %v10463_v5  ;;  %v8701_v21 = vpop.eup %8700 }
 0x713   : > { %6687 = vperm.xlu1 %8262, %v8695_v57   ;;  %6682 = vperm.xlu0 %8261, %v8697_v48  }
 0x717   : > { %6697 = vperm.xlu1 %8262, %v8699_v20   ;;  %6692 = vperm.xlu0 %8261, %v8701_v21  }
 0x718   : > { %v8703_v58 = vpop.eup %8702 }
 0x719   : > { %5022 = vmatmul.mubr.bf16.gmra.mxu0 %v10466_v7  ;;  %5153 = vmatmul.mubr.bf16.gmra.mxu1 %v10466_v7  ;;  %v8705_v5 = vpop.eup %8704  ;;  %v10679_v7 = vld [vmem:[%s11616_s10] sm:$0xff] }
 0x71a   : > { %5031 = vmatprep.mubr.bf16.mxu0 %v10474_v15  ;;  %5162 = vmatprep.mubr.bf16.mxu1 %v10474_v15  ;;  %v8707_v46 = vpop.eup %8706  ;;  %v5260_v15 = vrot.slane %v10679_v7, %v9072_v28 }
 0x71b   : > { %6707 = vperm.xlu1 %8262, %v8703_v58   ;;  %6702 = vperm.xlu0 %8261, %v8705_v5  }
 0x71c   : > { %v5276_v54 = vrot.slane %v5260_v15, %v9072_v28 }
 0x71e   : > { %v5298_v39 = vcombine.high %v5276_v54, %v5276_v54  ;;  %v5303_v29 = vpack.i.b16 %v5276_v54, %v5276_v54 }
 0x71f   : > { %8263 = vset.pattern.permute.xlu1 %v8737_v22  ;;  %6712 = vperm.xlu0 %8261, %v8707_v46  }
 0x720   : > { %6793 = vperm.xlu1 %8263, %v10615_v25   ;;  %v5317_v31 = vpack.i.b16 %v5298_v39, %v5298_v39  ;;  %v10686_v40 = vrot.slane %v5303_v29, %v9089_v38  ;;  %v8642_v39 = vld [vmem:[%s11621_s15 + $0x28] sm:$0xff]  }
 0x721   : > { %5032 = vmatmul.mubr.bf16.gmra.mxu0 %v10480_v8  ;;  %5163 = vmatmul.mubr.bf16.gmra.mxu1 %v10480_v8  ;;  %v5268_v8 = vcombine.high %v5260_v15, %v5260_v15 }
 0x722   : > { %v10689_v42 = vrot.slane %v5317_v31, %v9089_v38  ;;  %v8643_v31 = vld [vmem:[%s11621_s15 + $0x60] sm:$0xff]  }
 0x723   : > { %8264 = vset.pattern.permute.xlu0 %v8737_v22  ;;  %v5290_v55 = vrot.slane %v5268_v8, %v9072_v28 }
 0x724   : > { %6797 = vperm.xlu0 %8264, %v10623_v32   ;;  %6801 = vperm.xlu1 %8263, %v10613_v62  }
 0x725   : > { %v5300_v10 = vcombine.high %v5290_v55, %v5290_v55  ;;  %v5310_v51 = vpack.i.b16 %v5290_v55, %v5290_v55 }
 0x727   : > { %v5324_v33 = vpack.i.b16 %v5300_v10, %v5300_v10  ;;  %v10692_v47 = vrot.slane %v5310_v51, %v9089_v38  ;;  %v10752_v51 = vld [vmem:[%s11623_s17 + $0x68] sm:$0xff]  }
 0x728   : > { %6805 = vperm.xlu1 %8263, %v10621_v0   ;;  %6809 = vperm.xlu0 %8264, %v10635_v24  }
 0x729   : > { %v10695_v49 = vrot.slane %v5324_v33, %v9089_v38 }
 0x72c   : > { %6813 = vperm.xlu1 %8263, %v10633_v12   ;;  %6817 = vperm.xlu0 %8264, %v8685_v14   ;;  %v8638_v12 = vld [vmem:[%s11621_s15 + $0x38] sm:$0xff]   ;;  %v8639_v14 = vld [vmem:[%s11621_s15 + $0x70] sm:$0xff]  }
 0x730   : > { %6821 = vperm.xlu1 %8263, %v10641_v60   ;;  %6825 = vperm.xlu0 %8264, %v8689_v59   ;;  %v10719_v59 = vld [vmem:[%s11623_s17 + $0x70] sm:$0xff]  }
 0x734   : > { %6829 = vperm.xlu1 %8263, %v8687_v30   ;;  %6833 = vperm.xlu0 %8264, %v8693_v18  }
 0x738   : > { %6837 = vperm.xlu1 %8263, %v8691_v23   ;;  %6841 = vperm.xlu0 %8264, %v8697_v48  }
 0x73c   : > { %6845 = vperm.xlu1 %8263, %v8695_v57   ;;  %6849 = vperm.xlu0 %8264, %v8701_v21  }
 0x740   : > { %6853 = vperm.xlu1 %8263, %v8699_v20   ;;  %6857 = vperm.xlu0 %8264, %v8705_v5   ;;  %v10733_v5 = vld [vmem:[%s11623_s17 + $0x30] sm:$0xff]  }
 0x744   : > { %6861 = vperm.xlu1 %8263, %v8703_v58   ;;  %6865 = vperm.xlu0 %8264, %v8707_v46   ;;  %v8641_v58 = vld [vmem:[%s11621_s15 + $0x68] sm:$0xff]  }
 0x749   : > { %v4681_v27 = vpop.f32.mrf.mxu0  ;;  %v4812_v44 = vpop.f32.mrf.mxu1 }
 0x74b   : > { %v4683_v13 = vpop.f32.mrf.mxu0  ;;  %v4814_v53 = vpop.f32.mrf.mxu1 }
 0x74d   : > { %v4685_v36 = vpop.f32.mrf.mxu0  ;;  %v4816_v41 = vpop.f32.mrf.mxu1 }
 0x74e   : > { %v5171_v50 = vpack.c.bf16 %v4685_v36, %v4681_v27  ;;  %v5173_v45 = vpack.c.bf16 %v4816_v41, %v4812_v44 }
 0x74f   : > { %v4687_v4 = vpop.f32.mrf.mxu0  ;;  %v4818_v34 = vpop.f32.mrf.mxu1 }
 0x750   : > { %v5172_v43 = vpack.c.bf16 %v4687_v4, %v4683_v13  ;;  %v5174_v52 = vpack.c.bf16 %v4818_v34, %v4814_v53  ;;  %v5358_v56 = vadd.bf16 %v10686_v40, %v5171_v50  ;;  %v5360_v1 = vadd.bf16 %v10689_v42, %v5173_v45  ;;  %v10757_v53 = vld [vmem:[%s11623_s17 + $0x28] sm:$0xff]   ;;  %v10762_v50 = vld [vmem:[%s11623_s17 + $0x60] sm:$0xff]  }
 0x751   : > { %v4691_v62 = vpop.f32.mrf.mxu0  ;;  %v4822_v25 = vpop.f32.mrf.mxu1  ;;  %v8644_v34 = vld [vmem:[%s11621_s15 + $0x20] sm:$0xff]  }
 0x752   : > { %v5359_v63 = vadd.bf16 %v10692_v47, %v5172_v43  ;;  %v5361_v11 = vadd.bf16 %v10695_v49, %v5174_v52  ;;  %v5438_v24 = vmax.bf16 %v8735_v3, %v5358_v56  ;;  %v5440_v35 = vmax.bf16 %v8735_v3, %v5360_v1 }
 0x753   : > { %v4693_v0 = vpop.f32.mrf.mxu0  ;;  %v4824_v32 = vpop.f32.mrf.mxu1 }
 0x754   : > { %v5439_v2 = vmax.bf16 %v8735_v3, %v5359_v63  ;;  %v5441_v26 = vmax.bf16 %v8735_v3, %v5361_v11 }
 0x755   : > { %v4695_v9 = vpop.f32.mrf.mxu0  ;;  %v4826_v60 = vpop.f32.mrf.mxu1 }
 0x756   : > { %v5179_v6 = vpack.c.bf16 %v4695_v9, %v4691_v62  ;;  %v5181_v30 = vpack.c.bf16 %v4826_v60, %v4822_v25  ;;  %5678 = vmatprep.mubr.bf16.mxu0 %v5439_v2  ;;  %5944 = vmatprep.mubr.bf16.mxu1 %v5441_v26  ;;  %v8645_v62 = vld [vmem:[%s11621_s15 + $0x58] sm:$0xff]   ;;  %v8647_v60 = vld [vmem:[%s11621_s15 + $0x50] sm:$0xff]  }
 0x757   : > { %v4697_v37 = vpop.f32.mrf.mxu0  ;;  %v4828_v17 = vpop.f32.mrf.mxu1  ;;  %5679 = vmatmul.mubr.bf16.vlgmr.msra.gmra.mxu0 %v5438_v24  ;;  %5945 = vmatmul.mubr.bf16.vlgmr.msra.gmra.mxu1 %v5440_v35  ;;  %v8646_v26 = vld [vmem:[%s11621_s15 + $0x18] sm:$0xff]  }
 0x758   : > { %v5180_v23 = vpack.c.bf16 %v4697_v37, %v4693_v0  ;;  %v5182_v18 = vpack.c.bf16 %v4828_v17, %v4824_v32  ;;  %8083 = vmatpush3.bf16.msra.mxu0 %v8638_v12  ;;  %v5366_v57 = vadd.bf16 %v10686_v40, %v5179_v6  ;;  %v5368_v48 = vadd.bf16 %v10689_v42, %v5181_v30  ;;  %v10795_v37 = vld [vmem:[%s11623_s17 + $0x58] sm:$0xff]  }
 0x759   : > { %v4701_v20 = vpop.f32.mrf.mxu0  ;;  %v4832_v21 = vpop.f32.mrf.mxu1  ;;  %8084 = vmatprep.subr.bf16.mxu0 %v8639_v14  ;;  %8242 = vmatpush3.bf16.msra.mxu1 %v10714_v16  ;;  %v10790_v14 = vld [vmem:[%s11623_s17 + $0x20] sm:$0xff]  }
 0x75a   : > { %v5367_v46 = vadd.bf16 %v10692_v47, %v5180_v23  ;;  %v5369_v22 = vadd.bf16 %v10695_v49, %v5182_v18  ;;  %8235 = vmatprep.subr.bf16.mxu1 %v10719_v59  ;;  %v5446_v10 = vmax.bf16 %v8735_v3, %v5366_v57  ;;  %v5448_v27 = vmax.bf16 %v8735_v3, %v5368_v48  ;;  %v8648_v57 = vld [vmem:[%s11621_s15 + $0x10] sm:$0xff]  }
 0x75b   : > { %v4703_v15 = vpop.f32.mrf.mxu0  ;;  %v4834_v8 = vpop.f32.mrf.mxu1 }
 0x75c   : > { %v5447_v54 = vmax.bf16 %v8735_v3, %v5367_v46  ;;  %v5449_v55 = vmax.bf16 %v8735_v3, %v5369_v22  ;;  %8085 = vmatpush3.bf16.msra.mxu0 %v8640_v19  ;;  %v8651_v46 = vld [vmem:[%s11621_s15 + $0x48] sm:$0xff]   ;;  %v10809_v22 = vld [vmem:[%s11623_s17 + $0x18] sm:$0xff]  }
 0x75d   : > { %v4705_v44 = vpop.f32.mrf.mxu0  ;;  %v4836_v29 = vpop.f32.mrf.mxu1  ;;  %8086 = vmatprep.subr.bf16.mxu0 %v8641_v58  ;;  %8243 = vmatpush3.bf16.msra.mxu1 %v10733_v5 }
 0x75e   : > { %v5187_v33 = vpack.c.bf16 %v4705_v44, %v4701_v20  ;;  %v5189_v13 = vpack.c.bf16 %v4836_v29, %v4832_v21  ;;  %5686 = vmatprep.mubr.bf16.mxu0 %v5447_v54  ;;  %5952 = vmatprep.mubr.bf16.mxu1 %v5449_v55 }
 0x75f   : > { %v4707_v36 = vpop.f32.mrf.mxu0  ;;  %v4838_v41 = vpop.f32.mrf.mxu1  ;;  %5687 = vmatmul.mubr.bf16.gmra.mxu0 %v5446_v10  ;;  %5953 = vmatmul.mubr.bf16.gmra.mxu1 %v5448_v27  ;;  %v8652_v27 = vld [vmem:[%s11621_s15 + $0x8] sm:$0xff]  }
 0x760   : > { %v5188_v45 = vpack.c.bf16 %v4707_v36, %v4703_v15  ;;  %v5190_v4 = vpack.c.bf16 %v4838_v41, %v4834_v8  ;;  %8087 = vmatpush3.bf16.msra.mxu0 %v8642_v39  ;;  %v5374_v43 = vadd.bf16 %v10686_v40, %v5187_v33  ;;  %v5376_v52 = vadd.bf16 %v10689_v42, %v5189_v13  ;;  %v8655_v13 = vld [vmem:[%s11621_s15 + $0x40] sm:$0xff]   ;;  %v10828_v36 = vld [vmem:[%s11623_s17 + $0x50] sm:$0xff]  }
 0x761   : > { %v4711_v56 = vpop.f32.mrf.mxu0  ;;  %v4842_v1 = vpop.f32.mrf.mxu1  ;;  %8088 = vmatprep.subr.bf16.mxu0 %v8643_v31  ;;  %8236 = vmatprep.subr.bf16.mxu1 %v10752_v51 }
 0x762   : > { %v5375_v25 = vadd.bf16 %v10692_v47, %v5188_v45  ;;  %v5377_v63 = vadd.bf16 %v10695_v49, %v5190_v4  ;;  %8244 = vmatpush3.bf16.msra.mxu1 %v10757_v53  ;;  %v5454_v12 = vmax.bf16 %v8735_v3, %v5374_v43  ;;  %v5456_v24 = vmax.bf16 %v8735_v3, %v5376_v52  ;;  %v10833_v4 = vld [vmem:[%s11623_s17 + $0x10] sm:$0xff]   ;;  %v10838_v52 = vld [vmem:[%s11623_s17 + $0x48] sm:$0xff]  }
 0x763   : > { %v4713_v11 = vpop.f32.mrf.mxu0  ;;  %v4844_v0 = vpop.f32.mrf.mxu1  ;;  %8237 = vmatprep.subr.bf16.mxu1 %v10762_v50 }
 0x764   : > { %v5455_v32 = vmax.bf16 %v8735_v3, %v5375_v25  ;;  %v5457_v2 = vmax.bf16 %v8735_v3, %v5377_v63  ;;  %8089 = vmatpush3.bf16.msra.mxu0 %v8644_v34 }
 0x765   : > { %v4715_v35 = vpop.f32.mrf.mxu0  ;;  %v4846_v9 = vpop.f32.mrf.mxu1  ;;  %8090 = vmatprep.subr.bf16.mxu0 %v8645_v62  ;;  %v8657_v62 = vld [vmem:[%s11621_s15] sm:$0xff]  }
 0x766   : > { %v5195_v6 = vpack.c.bf16 %v4715_v35, %v4711_v56  ;;  %v5197_v30 = vpack.c.bf16 %v4846_v9, %v4842_v1  ;;  %5694 = vmatprep.mubr.bf16.mxu0 %v5455_v32  ;;  %5960 = vmatprep.mubr.bf16.mxu1 %v5457_v2  ;;  %v10855_v9 = vld [vmem:[%s11623_s17 + $0x8] sm:$0xff]  }
 0x767   : > { %v4717_v17 = vpop.f32.mrf.mxu0  ;;  %v4848_v23 = vpop.f32.mrf.mxu1  ;;  %5695 = vmatmul.mubr.bf16.gmra.mxu0 %v5454_v12  ;;  %5961 = vmatmul.mubr.bf16.gmra.mxu1 %v5456_v24 }
 0x768   : > { %v5196_v18 = vpack.c.bf16 %v4717_v17, %v4713_v11  ;;  %v5198_v19 = vpack.c.bf16 %v4848_v23, %v4844_v0  ;;  %8091 = vmatpush3.bf16.msra.mxu0 %v8646_v26  ;;  %v5382_v48 = vadd.bf16 %v10686_v40, %v5195_v6  ;;  %v5384_v20 = vadd.bf16 %v10689_v42, %v5197_v30  ;;  %v10863_v23 = vld [vmem:[%s11623_s17 + $0x40] sm:$0xff]  }
 0x769   : > { %v4721_v21 = vpop.f32.mrf.mxu0  ;;  %v4852_v58 = vpop.f32.mrf.mxu1  ;;  %8092 = vmatprep.subr.bf16.mxu0 %v8647_v60  ;;  %8245 = vmatpush3.bf16.msra.mxu1 %v10790_v14 }
 0x76a   : > { %v5383_v15 = vadd.bf16 %v10692_v47, %v5196_v18  ;;  %v5385_v8 = vadd.bf16 %v10695_v49, %v5198_v19  ;;  %8238 = vmatprep.subr.bf16.mxu1 %v10795_v37  ;;  %v5462_v44 = vmax.bf16 %v8735_v3, %v5382_v48  ;;  %v5464_v29 = vmax.bf16 %v8735_v3, %v5384_v20 }
 0x76b   : > { %v4723_v54 = vpop.f32.mrf.mxu0  ;;  %v4854_v55 = vpop.f32.mrf.mxu1 }
 0x76c   : > { %v5463_v39 = vmax.bf16 %v8735_v3, %v5383_v15  ;;  %v5465_v10 = vmax.bf16 %v8735_v3, %v5385_v8  ;;  %8093 = vmatpush3.bf16.msra.mxu0 %v8648_v57 }
 0x76d   : > { %v4725_v31 = vpop.f32.mrf.mxu0  ;;  %v4856_v33 = vpop.f32.mrf.mxu1  ;;  %8094 = vmatprep.subr.bf16.mxu0 %v8651_v46  ;;  %8246 = vmatpush3.bf16.msra.mxu1 %v10809_v22 }
 0x76e   : > { %v5203_v41 = vpack.c.bf16 %v4725_v31, %v4721_v21  ;;  %v5205_v45 = vpack.c.bf16 %v4856_v33, %v4852_v58  ;;  %5702 = vmatprep.mubr.bf16.mxu0 %v5463_v39  ;;  %5968 = vmatprep.mubr.bf16.mxu1 %v5465_v10 }
 0x76f   : > { %v4727_v34 = vpop.f32.mrf.mxu0  ;;  %v4858_v43 = vpop.f32.mrf.mxu1  ;;  %5703 = vmatmul.mubr.bf16.gmra.mxu0 %v5462_v44  ;;  %5969 = vmatmul.mubr.bf16.gmra.mxu1 %v5464_v29 }
 0x770   : > { %v5204_v56 = vpack.c.bf16 %v4727_v34, %v4723_v54  ;;  %v5206_v1 = vpack.c.bf16 %v4858_v43, %v4854_v55  ;;  %8095 = vmatpush3.bf16.msra.mxu0 %v8652_v27  ;;  %v5390_v25 = vadd.bf16 %v10686_v40, %v5203_v41  ;;  %v5392_v63 = vadd.bf16 %v10689_v42, %v5205_v45 }
 0x771   : > { %v4731_v11 = vpop.f32.mrf.mxu0  ;;  %v4862_v0 = vpop.f32.mrf.mxu1  ;;  %8096 = vmatprep.subr.bf16.mxu0 %v8655_v13  ;;  %8239 = vmatprep.subr.bf16.mxu1 %v10828_v36 }
 0x772   : > { %v5391_v32 = vadd.bf16 %v10692_v47, %v5204_v56  ;;  %v5393_v2 = vadd.bf16 %v10695_v49, %v5206_v1  ;;  %8247 = vmatpush3.bf16.msra.mxu1 %v10833_v4  ;;  %v5470_v60 = vmax.bf16 %v8735_v3, %v5390_v25  ;;  %v5472_v6 = vmax.bf16 %v8735_v3, %v5392_v63 }
 0x773   : > { %v4733_v26 = vpop.f32.mrf.mxu0  ;;  %v4864_v12 = vpop.f32.mrf.mxu1  ;;  %8240 = vmatprep.subr.bf16.mxu1 %v10838_v52 }
 0x774   : > { %v5471_v24 = vmax.bf16 %v8735_v3, %v5391_v32  ;;  %v5473_v35 = vmax.bf16 %v8735_v3, %v5393_v2  ;;  %8097 = vmatpush3.bf16.msra.mxu0 %v8657_v62 }
 0x775   : > { %v4735_v30 = vpop.f32.mrf.mxu0  ;;  %v4866_v17 = vpop.f32.mrf.mxu1  ;;  %8158 = vmatprep.subr.bf16.mxu0 %v10650_v61  ;;  %v10869_v61 = vld [vmem:[%s11623_s17] sm:$0xff]  }
 0x776   : > { %v5211_v18 = vpack.c.bf16 %v4735_v30, %v4731_v11  ;;  %v5213_v19 = vpack.c.bf16 %v4866_v17, %v4862_v0  ;;  %5710 = vmatprep.mubr.bf16.mxu0 %v5471_v24  ;;  %5976 = vmatprep.mubr.bf16.mxu1 %v5473_v35 }
 0x777   : > { %v4737_v57 = vpop.f32.mrf.mxu0  ;;  %v4868_v48 = vpop.f32.mrf.mxu1  ;;  %5711 = vmatmul.mubr.bf16.gmra.mxu0 %v5470_v60  ;;  %5977 = vmatmul.mubr.bf16.gmra.mxu1 %v5472_v6 }
 0x778   : > { %v5212_v20 = vpack.c.bf16 %v4737_v57, %v4733_v26  ;;  %v5214_v21 = vpack.c.bf16 %v4868_v48, %v4864_v12  ;;  %8248 = vmatpush3.bf16.msra.mxu1 %v10855_v9  ;;  %v5398_v58 = vadd.bf16 %v10686_v40, %v5211_v18  ;;  %v5400_v46 = vadd.bf16 %v10689_v42, %v5213_v19 }
 0x779   : > { %v4741_v15 = vpop.f32.mrf.mxu0  ;;  %v4872_v8 = vpop.f32.mrf.mxu1  ;;  %8241 = vmatprep.subr.bf16.mxu1 %v10863_v23 }
 0x77a   : > { %v5399_v54 = vadd.bf16 %v10692_v47, %v5212_v20  ;;  %v5401_v55 = vadd.bf16 %v10695_v49, %v5214_v21  ;;  %v5478_v29 = vmax.bf16 %v8735_v3, %v5398_v58  ;;  %v5480_v31 = vmax.bf16 %v8735_v3, %v5400_v46 }
 0x77b   : > { %v4743_v39 = vpop.f32.mrf.mxu0  ;;  %v4874_v10 = vpop.f32.mrf.mxu1 }
 0x77c   : > { %v5479_v27 = vmax.bf16 %v8735_v3, %v5399_v54  ;;  %v5481_v44 = vmax.bf16 %v8735_v3, %v5401_v55  ;;  %8249 = vmatpush3.bf16.msra.mxu1 %v10869_v61 }
 0x77d   : > { %v4745_v33 = vpop.f32.mrf.mxu0  ;;  %v4876_v13 = vpop.f32.mrf.mxu1 }
 0x77e   : > { %v5219_v41 = vpack.c.bf16 %v4745_v33, %v4741_v15  ;;  %v5221_v45 = vpack.c.bf16 %v4876_v13, %v4872_v8  ;;  %5718 = vmatprep.mubr.bf16.mxu0 %v5479_v27  ;;  %5984 = vmatprep.mubr.bf16.mxu1 %v5481_v44 }
 0x77f   : > { %v4747_v34 = vpop.f32.mrf.mxu0  ;;  %v4878_v43 = vpop.f32.mrf.mxu1  ;;  %5719 = vmatmul.mubr.bf16.gmra.mxu0 %v5478_v29  ;;  %5985 = vmatmul.mubr.bf16.gmra.mxu1 %v5480_v31 }
 0x780   : > { %v5220_v56 = vpack.c.bf16 %v4747_v34, %v4743_v39  ;;  %v5222_v1 = vpack.c.bf16 %v4878_v43, %v4874_v10  ;;  %v5406_v62 = vadd.bf16 %v10686_v40, %v5219_v41  ;;  %v5408_v25 = vadd.bf16 %v10689_v42, %v5221_v45 }
 0x781   : > { %v4751_v63 = vpop.f32.mrf.mxu0  ;;  %v4882_v11 = vpop.f32.mrf.mxu1  ;;  %v5253_v10 = vcombine.high %v10679_v7, %v10679_v7 }
 0x782   : > { %v5407_v0 = vadd.bf16 %v10692_v47, %v5220_v56  ;;  %v5409_v32 = vadd.bf16 %v10695_v49, %v5222_v1  ;;  %v5486_v35 = vmax.bf16 %v8735_v3, %v5406_v62  ;;  %v5488_v60 = vmax.bf16 %v8735_v3, %v5408_v25 }
 0x783   : > { %v4753_v2 = vpop.f32.mrf.mxu0  ;;  %v4884_v26 = vpop.f32.mrf.mxu1  ;;  %v5267_v7 = vrot.slane %v5253_v10, %v9072_v28 }
 0x784   : > { %v5487_v12 = vmax.bf16 %v8735_v3, %v5407_v0  ;;  %v5489_v24 = vmax.bf16 %v8735_v3, %v5409_v32 }
 0x785   : > { %v4755_v6 = vpop.f32.mrf.mxu0  ;;  %v4886_v30 = vpop.f32.mrf.mxu1 }
 0x786   : > { %v5227_v17 = vpack.c.bf16 %v4755_v6, %v4751_v63  ;;  %v5229_v18 = vpack.c.bf16 %v4886_v30, %v4882_v11  ;;  %5726 = vmatprep.mubr.bf16.mxu0 %v5487_v12  ;;  %5992 = vmatprep.mubr.bf16.mxu1 %v5489_v24  ;;  %v5269_v12 = vcombine.high %v5267_v7, %v5267_v7 }
 0x787   : > { %v4757_v19 = vpop.f32.mrf.mxu0  ;;  %v4888_v57 = vpop.f32.mrf.mxu1  ;;  %5727 = vmatmul.mubr.bf16.gmra.mxu0 %v5486_v35  ;;  %5993 = vmatmul.mubr.bf16.gmra.mxu1 %v5488_v60 }
 0x788   : > { %v5228_v48 = vpack.c.bf16 %v4757_v19, %v4753_v2  ;;  %v5230_v20 = vpack.c.bf16 %v4888_v57, %v4884_v26  ;;  %v5414_v21 = vadd.bf16 %v10686_v40, %v5227_v17  ;;  %v5416_v58 = vadd.bf16 %v10689_v42, %v5229_v18 }
 0x789   : > { %v4761_v46 = vpop.f32.mrf.mxu0  ;;  %v4892_v15 = vpop.f32.mrf.mxu1 }
 0x78a   : > { %v5415_v8 = vadd.bf16 %v10692_v47, %v5228_v48  ;;  %v5417_v54 = vadd.bf16 %v10695_v49, %v5230_v20  ;;  %v5494_v29 = vmax.bf16 %v8735_v3, %v5414_v21  ;;  %v5496_v31 = vmax.bf16 %v8735_v3, %v5416_v58 }
 0x78b   : > { %v4763_v55 = vpop.f32.mrf.mxu0  ;;  %v4894_v39 = vpop.f32.mrf.mxu1 }
 0x78c   : > { %v5495_v27 = vmax.bf16 %v8735_v3, %v5415_v8  ;;  %v5497_v44 = vmax.bf16 %v8735_v3, %v5417_v54 }
 0x78d   : > { %v4765_v33 = vpop.f32.mrf.mxu0  ;;  %v4896_v13 = vpop.f32.mrf.mxu1 }
 0x78e   : > { %v5235_v41 = vpack.c.bf16 %v4765_v33, %v4761_v46  ;;  %v5237_v45 = vpack.c.bf16 %v4896_v13, %v4892_v15  ;;  %5734 = vmatprep.mubr.bf16.mxu0 %v5495_v27  ;;  %6000 = vmatprep.mubr.bf16.mxu1 %v5497_v44  ;;  %v5283_v15 = vrot.slane %v5267_v7, %v9072_v28 }
 0x78f   : > { %v4767_v34 = vpop.f32.mrf.mxu0  ;;  %v4898_v43 = vpop.f32.mrf.mxu1  ;;  %5735 = vmatmul.mubr.bf16.gmra.mxu0 %v5494_v29  ;;  %6001 = vmatmul.mubr.bf16.gmra.mxu1 %v5496_v31 }
 0x790   : > { %v5236_v56 = vpack.c.bf16 %v4767_v34, %v4763_v55  ;;  %v5238_v1 = vpack.c.bf16 %v4898_v43, %v4894_v39  ;;  %v5422_v62 = vadd.bf16 %v10686_v40, %v5235_v41  ;;  %v5424_v25 = vadd.bf16 %v10689_v42, %v5237_v45 }
 0x791   : > { %v4771_v63 = vpop.f32.mrf.mxu0  ;;  %v4902_v11 = vpop.f32.mrf.mxu1  ;;  %v10914_v55 = vrot.slane %v5269_v12, %v9072_v28  ;;  %v5331_v27 = vpack.i.b16 %v5283_v15, %v5283_v15 }
 0x792   : > { %v5423_v0 = vadd.bf16 %v10692_v47, %v5236_v56  ;;  %v5425_v32 = vadd.bf16 %v10695_v49, %v5238_v1  ;;  %v5502_v30 = vmax.bf16 %v8735_v3, %v5422_v62  ;;  %v5504_v17 = vmax.bf16 %v8735_v3, %v5424_v25 }
 0x793   : > { %v4773_v2 = vpop.f32.mrf.mxu0  ;;  %v4904_v26 = vpop.f32.mrf.mxu1  ;;  %v5243_v18 = vpack.c.bf16 %v4771_v63, %v4771_v63  ;;  %v5245_v19 = vpack.c.bf16 %v4902_v11, %v4902_v11  ;;  %v5338_v44 = vpack.i.b16 %v10914_v55, %v10914_v55 }
 0x794   : > { %v5244_v24 = vpack.c.bf16 %v4773_v2, %v4773_v2  ;;  %v5246_v35 = vpack.c.bf16 %v4904_v26, %v4904_v26  ;;  %v5503_v60 = vmax.bf16 %v8735_v3, %v5423_v0  ;;  %v5505_v6 = vmax.bf16 %v8735_v3, %v5425_v32 }
 0x795   : > { %v4775_v57 = vpop.f32.mrf.mxu0  ;;  %v4906_v48 = vpop.f32.mrf.mxu1  ;;  %v5430_v39 = vadd.bf16 %v10686_v40, %v5243_v18  ;;  %v10927_v40 = vrot.slane %v5331_v27, %v9089_v38  ;;  %v10934_v34 = vrot.slane %v5338_v44, %v9089_v38 }
 0x796   : > { %v5431_v20 = vadd.bf16 %v10692_v47, %v5244_v24  ;;  %v5433_v21 = vadd.bf16 %v10695_v49, %v5246_v35  ;;  %5742 = vmatprep.mubr.bf16.mxu0 %v5503_v60  ;;  %6008 = vmatprep.mubr.bf16.mxu1 %v5505_v6  ;;  %v5432_v47 = vadd.bf16 %v10689_v42, %v5245_v19 }
 0x797   : > { %v4776_v58 = vpop.f32.mrf.mxu0  ;;  %v4907_v46 = vpop.f32.mrf.mxu1  ;;  %5743 = vmatmul.mubr.bf16.gmra.mxu0 %v5502_v30  ;;  %6009 = vmatmul.mubr.bf16.gmra.mxu1 %v5504_v17  ;;  %v5510_v33 = vmax.bf16 %v8735_v3, %v5430_v39 }
 0x798   : > { %v5511_v8 = vmax.bf16 %v8735_v3, %v5431_v20  ;;  %v5513_v54 = vmax.bf16 %v8735_v3, %v5433_v21  ;;  %v5512_v28 = vmax.bf16 %v8735_v3, %v5432_v47  ;;  %v5299_v47 = vcombine.high %v5283_v15, %v5283_v15 }
 0x799   : > { %v4943_v49 = vpop.f32.mrf.mxu0  ;;  %v10918_v10 = vpop.f32.mrf.mxu1 }
 0x79a   : > { %5750 = vmatprep.mubr.bf16.mxu0 %v5511_v8  ;;  %6016 = vmatprep.mubr.bf16.mxu1 %v5513_v54 }
 0x79b   : > { %v4945_v29 = vpop.f32.mrf.mxu0  ;;  %v10922_v31 = vpop.f32.mrf.mxu1 }
 0x79d   : > { %v4947_v13 = vpop.f32.mrf.mxu0  ;;  %v10929_v42 = vpop.f32.mrf.mxu1 }
 0x79e   : > { %v5175_v41 = vpack.c.bf16 %v4947_v13, %v4943_v49  ;;  %v5177_v45 = vpack.c.bf16 %v10929_v42, %v10918_v10  ;;  %v5345_v13 = vpack.i.b16 %v5299_v47, %v5299_v47 }
 0x79f   : > { %v4949_v43 = vpop.f32.mrf.mxu0  ;;  %v10936_v7 = vpop.f32.mrf.mxu1  ;;  %5751 = vmatmul.mubr.bf16.gmra.mxu0 %v5510_v33  ;;  %6017 = vmatmul.mubr.bf16.gmra.mxu1 %v5512_v28 }
 0x7a0   : > { %v5176_v56 = vpack.c.bf16 %v4949_v43, %v4945_v29  ;;  %v5178_v1 = vpack.c.bf16 %v10936_v7, %v10922_v31  ;;  %v5362_v62 = vadd.bf16 %v10927_v40, %v5175_v41 }
 0x7a1   : > { %v4953_v25 = vpop.f32.mrf.mxu0  ;;  %v10941_v63 = vpop.f32.mrf.mxu1 }
 0x7a2   : > { %v5363_v11 = vadd.bf16 %v10934_v34, %v5176_v56  ;;  %v5442_v26 = vmax.bf16 %v8735_v3, %v5362_v62 }
 0x7a3   : > { %v4955_v0 = vpop.f32.mrf.mxu0  ;;  %v10944_v32 = vpop.f32.mrf.mxu1 }
 0x7a4   : > { %v5443_v2 = vmax.bf16 %v8735_v3, %v5363_v11 }
 0x7a5   : > { %v4957_v12 = vpop.f32.mrf.mxu0  ;;  %v10948_v24 = vpop.f32.mrf.mxu1 }
 0x7a6   : > { %v5183_v35 = vpack.c.bf16 %v4957_v12, %v4953_v25  ;;  %v5185_v60 = vpack.c.bf16 %v10948_v24, %v10941_v63  ;;  %6210 = vmatprep.mubr.bf16.mxu0 %v5443_v2 }
 0x7a7   : > { %v4959_v6 = vpop.f32.mrf.mxu0  ;;  %v10952_v30 = vpop.f32.mrf.mxu1  ;;  %6211 = vmatmul.mubr.bf16.vlgmr.msra.gmra.mxu0 %v5442_v26 }
 0x7a8   : > { %v5184_v17 = vpack.c.bf16 %v4959_v6, %v4955_v0  ;;  %v5186_v18 = vpack.c.bf16 %v10952_v30, %v10944_v32  ;;  %8159 = vmatpush3.bf16.msra.mxu0 %v10714_v16  ;;  %v5370_v19 = vadd.bf16 %v10927_v40, %v5183_v35 }
 0x7a9   : > { %v4963_v57 = vpop.f32.mrf.mxu0  ;;  %v10958_v48 = vpop.f32.mrf.mxu1  ;;  %8160 = vmatprep.subr.bf16.mxu0 %v10719_v59 }
 0x7aa   : > { %v5371_v20 = vadd.bf16 %v10934_v34, %v5184_v17  ;;  %v5450_v8 = vmax.bf16 %v8735_v3, %v5370_v19 }
 0x7ab   : > { %v4965_v21 = vpop.f32.mrf.mxu0  ;;  %v10962_v58 = vpop.f32.mrf.mxu1 }
 0x7ac   : > { %v5451_v46 = vmax.bf16 %v8735_v3, %v5371_v20  ;;  %8161 = vmatpush3.bf16.msra.mxu0 %v10733_v5  ;;  %v5301_v5 = vcombine.high %v10914_v55, %v10914_v55 }
 0x7ad   : > { %v4967_v54 = vpop.f32.mrf.mxu0  ;;  %v10967_v16 = vpop.f32.mrf.mxu1  ;;  %8162 = vmatprep.subr.bf16.mxu0 %v10752_v51 }
 0x7ae   : > { %v5191_v39 = vpack.c.bf16 %v4967_v54, %v4963_v57  ;;  %v5193_v59 = vpack.c.bf16 %v10967_v16, %v10958_v48  ;;  %6218 = vmatprep.mubr.bf16.mxu0 %v5451_v46  ;;  %v5352_v56 = vpack.i.b16 %v5301_v5, %v5301_v5 }
 0x7af   : > { %v4969_v49 = vpop.f32.mrf.mxu0  ;;  %v10972_v27 = vpop.f32.mrf.mxu1  ;;  %6219 = vmatmul.mubr.bf16.gmra.mxu0 %v5450_v8 }
 0x7b0   : > { %v5192_v44 = vpack.c.bf16 %v4969_v49, %v4965_v21  ;;  %v5194_v29 = vpack.c.bf16 %v10972_v27, %v10962_v58  ;;  %8163 = vmatpush3.bf16.msra.mxu0 %v10757_v53  ;;  %v5378_v51 = vadd.bf16 %v10927_v40, %v5191_v39  ;;  %v10990_v12 = vrot.slane %v5352_v56, %v9089_v38 }
 0x7b1   : > { %v4973_v33 = vpop.f32.mrf.mxu0  ;;  %v5104_v28 = vpop.f32.mrf.mxu1  ;;  %8164 = vmatprep.subr.bf16.mxu0 %v10762_v50  ;;  %v10987_v50 = vrot.slane %v5345_v13, %v9089_v38 }
 0x7b2   : > { %v5379_v15 = vadd.bf16 %v10934_v34, %v5192_v44  ;;  %v5458_v62 = vmax.bf16 %v8735_v3, %v5378_v51  ;;  %v5373_v7 = vadd.bf16 %v10990_v12, %v5186_v18  ;;  %v5381_v42 = vadd.bf16 %v10990_v12, %v5194_v29 }
 0x7b3   : > { %v4975_v41 = vpop.f32.mrf.mxu0  ;;  %v5106_v43 = vpop.f32.mrf.mxu1  ;;  %v5364_v31 = vadd.bf16 %v10987_v50, %v5177_v45  ;;  %v5372_v10 = vadd.bf16 %v10987_v50, %v5185_v60  ;;  %v5380_v63 = vadd.bf16 %v10987_v50, %v5193_v59 }
 0x7b4   : > { %v5459_v55 = vmax.bf16 %v8735_v3, %v5379_v15  ;;  %8165 = vmatpush3.bf16.msra.mxu0 %v10790_v14  ;;  %v5461_v18 = vmax.bf16 %v8735_v3, %v5381_v42 }
 0x7b5   : > { %v4977_v25 = vpop.f32.mrf.mxu0  ;;  %v5108_v53 = vpop.f32.mrf.mxu1  ;;  %8166 = vmatprep.subr.bf16.mxu0 %v10795_v37  ;;  %v5452_v30 = vmax.bf16 %v8735_v3, %v5372_v10  ;;  %v5460_v60 = vmax.bf16 %v8735_v3, %v5380_v63 }
 0x7b6   : > { %v5199_v11 = vpack.c.bf16 %v4977_v25, %v4973_v33  ;;  %v5201_v0 = vpack.c.bf16 %v5108_v53, %v5104_v28  ;;  %6226 = vmatprep.mubr.bf16.mxu0 %v5459_v55 }
 0x7b7   : > { %v4979_v2 = vpop.f32.mrf.mxu0  ;;  %v5110_v26 = vpop.f32.mrf.mxu1  ;;  %6227 = vmatmul.mubr.bf16.gmra.mxu0 %v5458_v62 }
 0x7b8   : > { %v5200_v35 = vpack.c.bf16 %v4979_v2, %v4975_v41  ;;  %v5202_v14 = vpack.c.bf16 %v5110_v26, %v5106_v43  ;;  %8167 = vmatpush3.bf16.msra.mxu0 %v10809_v22  ;;  %v5386_v6 = vadd.bf16 %v10927_v40, %v5199_v11  ;;  %v5388_v37 = vadd.bf16 %v10987_v50, %v5201_v0 }
 0x7b9   : > { %v4983_v17 = vpop.f32.mrf.mxu0  ;;  %v5114_v19 = vpop.f32.mrf.mxu1  ;;  %8168 = vmatprep.subr.bf16.mxu0 %v10828_v36 }
 0x7ba   : > { %v5387_v57 = vadd.bf16 %v10934_v34, %v5200_v35  ;;  %v5389_v20 = vadd.bf16 %v10990_v12, %v5202_v14  ;;  %v5466_v22 = vmax.bf16 %v8735_v3, %v5386_v6  ;;  %v5468_v54 = vmax.bf16 %v8735_v3, %v5388_v37 }
 0x7bb   : > { %v4985_v21 = vpop.f32.mrf.mxu0  ;;  %v5116_v46 = vpop.f32.mrf.mxu1 }
 0x7bc   : > { %v5467_v38 = vmax.bf16 %v8735_v3, %v5387_v57  ;;  %v5469_v8 = vmax.bf16 %v8735_v3, %v5389_v20  ;;  %8169 = vmatpush3.bf16.msra.mxu0 %v10833_v4 }
 0x7bd   : > { %v4987_v39 = vpop.f32.mrf.mxu0  ;;  %v5118_v47 = vpop.f32.mrf.mxu1  ;;  %8170 = vmatprep.subr.bf16.mxu0 %v10838_v52 }
 0x7be   : > { %v5207_v36 = vpack.c.bf16 %v4987_v39, %v4983_v17  ;;  %v5209_v49 = vpack.c.bf16 %v5118_v47, %v5114_v19  ;;  %6234 = vmatprep.mubr.bf16.mxu0 %v5467_v38  ;;  %6500 = vmatprep.mubr.bf16.mxu1 %v5469_v8 }
 0x7bf   : > { %v4989_v5 = vpop.f32.mrf.mxu0  ;;  %v5120_v44 = vpop.f32.mrf.mxu1  ;;  %6235 = vmatmul.mubr.bf16.gmra.mxu0 %v5466_v22  ;;  %6501 = vmatmul.mubr.bf16.vlgmr.msra.gmra.mxu1 %v5468_v54 }
 0x7c0   : > { %v5208_v51 = vpack.c.bf16 %v4989_v5, %v4985_v21  ;;  %v5210_v33 = vpack.c.bf16 %v5120_v44, %v5116_v46  ;;  %8171 = vmatpush3.bf16.msra.mxu0 %v10855_v9  ;;  %v5394_v4 = vadd.bf16 %v10927_v40, %v5207_v36  ;;  %v5396_v28 = vadd.bf16 %v10987_v50, %v5209_v49 }
 0x7c1   : > { %v4993_v15 = vpop.f32.mrf.mxu0  ;;  %v5124_v13 = vpop.f32.mrf.mxu1  ;;  %8172 = vmatprep.subr.bf16.mxu0 %v10863_v23 }
 0x7c2   : > { %v5395_v52 = vadd.bf16 %v10934_v34, %v5208_v51  ;;  %v5397_v41 = vadd.bf16 %v10990_v12, %v5210_v33  ;;  %v5474_v9 = vmax.bf16 %v8735_v3, %v5394_v4  ;;  %v5476_v25 = vmax.bf16 %v8735_v3, %v5396_v28 }
 0x7c3   : > { %v4995_v43 = vpop.f32.mrf.mxu0  ;;  %v5126_v56 = vpop.f32.mrf.mxu1 }
 0x7c4   : > { %v5475_v55 = vmax.bf16 %v8735_v3, %v5395_v52  ;;  %v5477_v62 = vmax.bf16 %v8735_v3, %v5397_v41  ;;  %8173 = vmatpush3.bf16.msra.mxu0 %v10869_v61 }
 0x7c5   : > { %v4997_v53 = vpop.f32.mrf.mxu0  ;;  %v5128_v11 = vpop.f32.mrf.mxu1 }
 0x7c6   : > { %v5215_v0 = vpack.c.bf16 %v4997_v53, %v4993_v15  ;;  %v5217_v23 = vpack.c.bf16 %v5128_v11, %v5124_v13  ;;  %6242 = vmatprep.mubr.bf16.mxu0 %v5475_v55  ;;  %6508 = vmatprep.mubr.bf16.mxu1 %v5477_v62 }
 0x7c7   : > { %v4999_v2 = vpop.f32.mrf.mxu0  ;;  %v5130_v26 = vpop.f32.mrf.mxu1  ;;  %6243 = vmatmul.mubr.bf16.gmra.mxu0 %v5474_v9  ;;  %6509 = vmatmul.mubr.bf16.gmra.mxu1 %v5476_v25 }
 0x7c8   : > { %v5216_v35 = vpack.c.bf16 %v4999_v2, %v4995_v43  ;;  %v5218_v14 = vpack.c.bf16 %v5130_v26, %v5126_v56  ;;  %v5402_v6 = vadd.bf16 %v10927_v40, %v5215_v0  ;;  %v5404_v61 = vadd.bf16 %v10987_v50, %v5217_v23 }
 0x7c9   : > { %v5003_v37 = vpop.f32.mrf.mxu0  ;;  %v5134_v17 = vpop.f32.mrf.mxu1 }
 0x7ca   : > { %v5403_v19 = vadd.bf16 %v10934_v34, %v5216_v35  ;;  %v5405_v57 = vadd.bf16 %v10990_v12, %v5218_v14  ;;  %v5482_v8 = vmax.bf16 %v8735_v3, %v5402_v6  ;;  %v5484_v22 = vmax.bf16 %v8735_v3, %v5404_v61 }
 0x7cb   : > { %v5005_v20 = vpop.f32.mrf.mxu0  ;;  %v5136_v21 = vpop.f32.mrf.mxu1 }
 0x7cc   : > { %v5483_v46 = vmax.bf16 %v8735_v3, %v5403_v19  ;;  %v5485_v38 = vmax.bf16 %v8735_v3, %v5405_v57 }
 0x7cd   : > { %v5007_v54 = vpop.f32.mrf.mxu0  ;;  %v5138_v39 = vpop.f32.mrf.mxu1 }
 0x7ce   : > { %v5223_v47 = vpack.c.bf16 %v5007_v54, %v5003_v37  ;;  %v5225_v36 = vpack.c.bf16 %v5138_v39, %v5134_v17  ;;  %6250 = vmatprep.mubr.bf16.mxu0 %v5483_v46  ;;  %6516 = vmatprep.mubr.bf16.mxu1 %v5485_v38 }
 0x7cf   : > { %v5009_v49 = vpop.f32.mrf.mxu0  ;;  %v5140_v5 = vpop.f32.mrf.mxu1  ;;  %6251 = vmatmul.mubr.bf16.gmra.mxu0 %v5482_v8  ;;  %6517 = vmatmul.mubr.bf16.gmra.mxu1 %v5484_v22 }
 0x7d0   : > { %v5224_v44 = vpack.c.bf16 %v5009_v49, %v5005_v20  ;;  %v5226_v51 = vpack.c.bf16 %v5140_v5, %v5136_v21  ;;  %v5410_v33 = vadd.bf16 %v10927_v40, %v5223_v47  ;;  %v5412_v4 = vadd.bf16 %v10987_v50, %v5225_v36 }
 0x7d1   : > { %v5013_v28 = vpop.f32.mrf.mxu0  ;;  %v5144_v15 = vpop.f32.mrf.mxu1 }
 0x7d2   : > { %v5411_v13 = vadd.bf16 %v10934_v34, %v5224_v44  ;;  %v5413_v52 = vadd.bf16 %v10990_v12, %v5226_v51  ;;  %v5490_v62 = vmax.bf16 %v8735_v3, %v5410_v33  ;;  %v5492_v9 = vmax.bf16 %v8735_v3, %v5412_v4 }
 0x7d3   : > { %v5015_v41 = vpop.f32.mrf.mxu0  ;;  %v5146_v43 = vpop.f32.mrf.mxu1 }
 0x7d4   : > { %v5491_v56 = vmax.bf16 %v8735_v3, %v5411_v13  ;;  %v5493_v55 = vmax.bf16 %v8735_v3, %v5413_v52  ;;  %v11043_v52 = vpop.permute.xlu0 %6622 }
 0x7d5   : > { %v5017_v25 = vpop.f32.mrf.mxu0  ;;  %v5148_v53 = vpop.f32.mrf.mxu1 }
 0x7d6   : > { %v5231_v11 = vpack.c.bf16 %v5017_v25, %v5013_v28  ;;  %v5233_v0 = vpack.c.bf16 %v5148_v53, %v5144_v15  ;;  %6258 = vmatprep.mubr.bf16.mxu0 %v5491_v56  ;;  %6524 = vmatprep.mubr.bf16.mxu1 %v5493_v55  ;;  %v11047_v25 = vpop.permute.xlu1 %6632 }
 0x7d7   : > { %v5019_v23 = vpop.f32.mrf.mxu0  ;;  %v5150_v2 = vpop.f32.mrf.mxu1  ;;  %6259 = vmatmul.mubr.bf16.gmra.mxu0 %v5490_v62  ;;  %6525 = vmatmul.mubr.bf16.gmra.mxu1 %v5492_v9 }
 0x7d8   : > { %v5232_v26 = vpack.c.bf16 %v5019_v23, %v5015_v41  ;;  %v5234_v35 = vpack.c.bf16 %v5150_v2, %v5146_v43  ;;  %v5418_v14 = vadd.bf16 %v10927_v40, %v5231_v11  ;;  %v5420_v6 = vadd.bf16 %v10987_v50, %v5233_v0 }
 0x7d9   : > { %v5023_v61 = vpop.f32.mrf.mxu0  ;;  %v5154_v37 = vpop.f32.mrf.mxu1 }
 0x7da   : > { %v5419_v17 = vadd.bf16 %v10934_v34, %v5232_v26  ;;  %v5421_v19 = vadd.bf16 %v10990_v12, %v5234_v35  ;;  %v5498_v38 = vmax.bf16 %v8735_v3, %v5418_v14  ;;  %v5500_v8 = vmax.bf16 %v8735_v3, %v5420_v6 }
 0x7db   : > { %v5025_v57 = vpop.f32.mrf.mxu0  ;;  %v5156_v20 = vpop.f32.mrf.mxu1 }
 0x7dc   : > { %v5499_v21 = vmax.bf16 %v8735_v3, %v5419_v17  ;;  %v5501_v46 = vmax.bf16 %v8735_v3, %v5421_v19  ;;  %v11055_v19 = vpop.permute.xlu0 %6627 }
 0x7dd   : > { %v5027_v22 = vpop.f32.mrf.mxu0  ;;  %v5158_v54 = vpop.f32.mrf.mxu1 }
 0x7de   : > { %v5239_v39 = vpack.c.bf16 %v5027_v22, %v5023_v61  ;;  %v5241_v47 = vpack.c.bf16 %v5158_v54, %v5154_v37  ;;  %6266 = vmatprep.mubr.bf16.mxu0 %v5499_v21  ;;  %6532 = vmatprep.mubr.bf16.mxu1 %v5501_v46  ;;  %v11063_v21 = vpop.permute.xlu1 %6637  ;;  %v5444_v54 = vmax.bf16 %v8735_v3, %v5364_v31 }
 0x7df   : > { %v5029_v36 = vpop.f32.mrf.mxu0  ;;  %v5160_v49 = vpop.f32.mrf.mxu1  ;;  %6267 = vmatmul.mubr.bf16.gmra.mxu0 %v5498_v38  ;;  %6533 = vmatmul.mubr.bf16.gmra.mxu1 %v5500_v8 }
 0x7e0   : > { %v5240_v5 = vpack.c.bf16 %v5029_v36, %v5025_v57  ;;  %v5242_v44 = vpack.c.bf16 %v5160_v49, %v5156_v20  ;;  %v5426_v51 = vadd.bf16 %v10927_v40, %v5239_v39  ;;  %v5428_v33 = vadd.bf16 %v10987_v50, %v5241_v47  ;;  %v11068_v22 = vpop.permute.xlu0 %6642 }
 0x7e1   : > { %v5033_v4 = vpop.f32.mrf.mxu0  ;;  %v5164_v28 = vpop.f32.mrf.mxu1  ;;  %v5453_v39 = vmax.bf16 %v8735_v3, %v5373_v7 }
 0x7e2   : > { %v5427_v15 = vadd.bf16 %v10934_v34, %v5240_v5  ;;  %v5429_v13 = vadd.bf16 %v10990_v12, %v5242_v44  ;;  %v5506_v53 = vmax.bf16 %v8735_v3, %v5426_v51  ;;  %v5508_v11 = vmax.bf16 %v8735_v3, %v5428_v33  ;;  %v11131_v51 = vld [vmem:[%s11620_s14] ss:$0 sm:$0xff] }
 0x7e3   : > { %v5035_v41 = vpop.f32.mrf.mxu0  ;;  %v5166_v43 = vpop.f32.mrf.mxu1  ;;  %v5247_v0 = vpack.c.bf16 %v5033_v4, %v5033_v4  ;;  %v5249_v23 = vpack.c.bf16 %v5164_v28, %v5164_v28 }
 0x7e4   : > { %v5248_v56 = vpack.c.bf16 %v5035_v41, %v5035_v41  ;;  %v5250_v55 = vpack.c.bf16 %v5166_v43, %v5166_v43  ;;  %v5507_v62 = vmax.bf16 %v8735_v3, %v5427_v15  ;;  %v5509_v9 = vmax.bf16 %v8735_v3, %v5429_v13 }
 0x7e5   : > { %v5037_v2 = vpop.f32.mrf.mxu0  ;;  %v5168_v26 = vpop.f32.mrf.mxu1  ;;  %v5434_v57 = vadd.bf16 %v10927_v40, %v5247_v0  ;;  %v5436_v20 = vadd.bf16 %v10987_v50, %v5249_v23 }
 0x7e6   : > { %v5435_v35 = vadd.bf16 %v10934_v34, %v5248_v56  ;;  %v5437_v14 = vadd.bf16 %v10990_v12, %v5250_v55  ;;  %6274 = vmatprep.mubr.bf16.mxu0 %v5507_v62  ;;  %6540 = vmatprep.mubr.bf16.mxu1 %v5509_v9  ;;  %v5365_v34 = vadd.bf16 %v10990_v12, %v5178_v1  ;;  %v11070_v40 = vpop.permute.xlu1 %6647  ;;  %v11080_v1 = vpop.permute.xlu0 %6652  ;;  %v6773_v56 = vld [vmem:[%s11139_s24] sm:$0xff] }
 0x7e7   : > { %v5038_v6 = vpop.f32.mrf.mxu0  ;;  %v5169_v61 = vpop.f32.mrf.mxu1  ;;  %6275 = vmatmul.mubr.bf16.gmra.mxu0 %v5506_v53  ;;  %6541 = vmatmul.mubr.bf16.gmra.mxu1 %v5508_v11  ;;  %v5514_v46 = vmax.bf16 %v8735_v3, %v5434_v57  ;;  %v5516_v38 = vmax.bf16 %v8735_v3, %v5436_v20  ;;  %v8708_v26 = vld [vmem:[%s8888_s1] sm:$0xff] }
 0x7e8   : > { %v5515_v37 = vmax.bf16 %v8735_v3, %v5435_v35  ;;  %v5517_v17 = vmax.bf16 %v8735_v3, %v5437_v14  ;;  %v5445_v8 = vmax.bf16 %v8735_v3, %v5365_v34  ;;  %v11126_v3 = vld [vmem:[%s11618_s12] ss:$0 sm:$0xff] }
 0x7ea   : > { %6282 = vmatprep.mubr.bf16.mxu0 %v5515_v37  ;;  %6548 = vmatprep.mubr.bf16.mxu1 %v5517_v17  ;;  %v11084_v47 = vpop.permute.xlu1 %6657  ;;  %v11094_v45 = vpop.permute.xlu0 %6662  ;;  %v6774_v17 = vld [vmem:[%s11139_s24 + $0x8] sm:$0xff] }
 0x7ee   : > { %v11096_v32 = vpop.permute.xlu1 %6667  ;;  %v11100_v36 = vpop.permute.xlu0 %6672 }
 0x7ef   : > { %6283 = vmatmul.mubr.bf16.gmra.mxu0 %v5514_v46  ;;  %6549 = vmatmul.mubr.bf16.gmra.mxu1 %v5516_v38 }
 0x7f0   : > { %6476 = vmatprep.mubr.bf16.mxu0 %v5445_v8 }
 0x7f2   : > { %v11106_v24 = vpop.permute.xlu1 %6677  ;;  %v11109_v58 = vpop.permute.xlu0 %6682 }
 0x7f6   : > { %v11111_v27 = vpop.permute.xlu1 %6687  ;;  %v11113_v29 = vpop.permute.xlu0 %6692 }
 0x7f7   : > { %6477 = vmatmul.mubr.bf16.vlgmr.msra.gmra.mxu0 %v5444_v54  ;;  %v8709_v54 = vld [vmem:[%s8888_s1 + $0x8] sm:$0xff] }
 0x7f8   : > { %6484 = vmatprep.mubr.bf16.mxu0 %v5453_v39 }
 0x7fa   : > { %v11115_v12 = vpop.permute.xlu1 %6697  ;;  %v11117_v49 = vpop.permute.xlu0 %6702 }
 0x7fe   : > { %v11119_v5 = vpop.permute.xlu1 %6707  ;;  %v11121_v59 = vpop.permute.xlu0 %6712 }
 0x7ff   : > { %6485 = vmatmul.mubr.bf16.gmra.mxu0 %v5452_v30 }
 0x800   : > { %6492 = vmatprep.mubr.bf16.mxu0 %v5461_v18  ;;  %v6775_v18 = vld [vmem:[%s11139_s24 + $0x10] sm:$0xff] }
 0x802   : > { %v11133_v28 = vpop.permute.xlu1 %6793  ;;  %v11146_v23 = vpop.permute.xlu0 %6797 }
 0x806   : > { %v11163_v37 = vpop.permute.xlu1 %6801 }
 0x807   : > { %6493 = vmatmul.mubr.bf16.gmra.mxu0 %v5460_v60 }
 0x817   : > { %v7946_v48 = vpop.f32.mrf.mxu0  ;;  %v8022_v16 = vpop.f32.mrf.mxu1 }
 0x819   : > { %v7947_v50 = vpop.f32.mrf.mxu0  ;;  %v8023_v44 = vpop.f32.mrf.mxu1 }
 0x81a   : > { %v7948_v33 = vadd.f32 %v7947_v50, %v7946_v48  ;;  %v8024_v4 = vadd.f32 %v8023_v44, %v8022_v16  ;;  %v11182_v44 = vpop.permute.xlu1 %6805 }
 0x81b   : > { %v7949_v15 = vpop.f32.mrf.mxu0  ;;  %v8025_v13 = vpop.f32.mrf.mxu1 }
 0x81c   : > { %v5765_v41 = vadd.f32 %v7948_v33, %v11126_v3  ;;  %v6031_v43 = vadd.f32 %v8024_v4, %v11131_v51 }
 0x81d   : > { %v7950_v55 = vpop.f32.mrf.mxu0  ;;  %v8026_v62 = vpop.f32.mrf.mxu1 }
 0x81e   : > { %v6715_v9 = vmul.f32 %v11043_v52, %v5765_v41  ;;  %v6868_v53 = vmul.f32 %v11133_v28, %v6031_v43  ;;  %v7951_v11 = vadd.f32 %v7950_v55, %v7949_v15  ;;  %v8027_v0 = vadd.f32 %v8026_v62, %v8025_v13  ;;  %v8710_v15 = vld [vmem:[%s8888_s1 + $0x10] sm:$0xff]  ;;  %v6776_v55 = vld [vmem:[%s11139_s24 + $0x18] sm:$0xff] }
 0x81f   : > { %v7952_v52 = vpop.f32.mrf.mxu0  ;;  %v8028_v2 = vpop.f32.mrf.mxu1 }
 0x820   : > { %v6734_v35 = vadd.f32 %v8708_v26, %v6715_v9  ;;  %v6887_v14 = vadd.f32 %v6868_v53, %v6773_v56  ;;  %v5766_v6 = vadd.f32 %v7951_v11, %v11126_v3  ;;  %v6032_v61 = vadd.f32 %v8027_v0, %v11131_v51 }
 0x821   : > { %v7953_v57 = vpop.f32.mrf.mxu0  ;;  %v8029_v20 = vpop.f32.mrf.mxu1 }
 0x822   : > { %6754 = vst.msk [vmem:[%s11152_s4] sm:$0xff] %vm6753_vm2, %v6734_v35  ;;  %v6716_v34 = vmul.f32 %v11055_v19, %v5766_v6  ;;  %v6869_v46 = vmul.f32 %v11146_v23, %v6032_v61  ;;  %v7954_v38 = vadd.f32 %v7953_v57, %v7952_v52  ;;  %v8030_v8 = vadd.f32 %v8029_v20, %v8028_v2  ;;  %v11194_v52 = vpop.permute.xlu0 %6809  ;;  %v8711_v35 = vld [vmem:[%s8888_s1 + $0x18] sm:$0xff]  ;;  %v6777_v57 = vld [vmem:[%s11139_s24 + $0x20] sm:$0xff] }
 0x823   : > { %6907 = vst.msk [vmem:[%s11158_s2] sm:$0xff] %vm6906_vm3, %v6887_v14  ;;  %v7955_v31 = vpop.f32.mrf.mxu0  ;;  %v8031_v7 = vpop.f32.mrf.mxu1 }
 0x824   : > { %v6735_v39 = vadd.f32 %v8709_v54, %v6716_v34  ;;  %v6888_v10 = vadd.f32 %v6869_v46, %v6774_v17  ;;  %v5767_v42 = vadd.f32 %v7954_v38, %v11126_v3  ;;  %v6033_v30 = vadd.f32 %v8030_v8, %v11131_v51 }
 0x825   : > { %v7956_v63 = vpop.f32.mrf.mxu0  ;;  %v8032_v60 = vpop.f32.mrf.mxu1 }
 0x826   : > { %6755 = vst.msk [vmem:[%s11152_s4 + $0x8] sm:$0xff] %vm6753_vm2, %v6735_v39  ;;  %v6717_v19 = vmul.f32 %v11047_v25, %v5767_v42  ;;  %v6870_v48 = vmul.f32 %v11163_v37, %v6033_v30  ;;  %v7957_v16 = vadd.f32 %v7956_v63, %v7955_v31  ;;  %v8033_v50 = vadd.f32 %v8032_v60, %v8031_v7  ;;  %v11206_v31 = vpop.permute.xlu1 %6813  ;;  %v8712_v39 = vld [vmem:[%s8888_s1 + $0x20] sm:$0xff]  ;;  %v6778_v63 = vld [vmem:[%s11139_s24 + $0x28] sm:$0xff] }
 0x827   : > { %6908 = vst.msk [vmem:[%s11158_s2 + $0x8] sm:$0xff] %vm6906_vm3, %v6888_v10  ;;  %v7958_v33 = vpop.f32.mrf.mxu0  ;;  %v8034_v4 = vpop.f32.mrf.mxu1 }
 0x828   : > { %v6736_v13 = vadd.f32 %v8710_v15, %v6717_v19  ;;  %v6889_v41 = vadd.f32 %v6870_v48, %v6775_v18  ;;  %v5768_v43 = vadd.f32 %v7957_v16, %v11126_v3  ;;  %v6034_v56 = vadd.f32 %v8033_v50, %v11131_v51 }
 0x829   : > { %v7959_v62 = vpop.f32.mrf.mxu0  ;;  %v8035_v25 = vpop.f32.mrf.mxu1 }
 0x82a   : > { %6756 = vst.msk [vmem:[%s11152_s4 + $0x10] sm:$0xff] %vm6753_vm2, %v6736_v13  ;;  %v6718_v9 = vmul.f32 %v11063_v21, %v5768_v43  ;;  %v6871_v53 = vmul.f32 %v11182_v44, %v6034_v56  ;;  %v7960_v11 = vadd.f32 %v7959_v62, %v7958_v33  ;;  %v8036_v0 = vadd.f32 %v8035_v25, %v8034_v4  ;;  %v11218_v33 = vpop.permute.xlu0 %6817  ;;  %v8713_v13 = vld [vmem:[%s8888_s1 + $0x28] sm:$0xff]  ;;  %v6779_v62 = vld [vmem:[%s11139_s24 + $0x30] sm:$0xff] }
 0x82b   : > { %6909 = vst.msk [vmem:[%s11158_s2 + $0x10] sm:$0xff] %vm6906_vm3, %v6889_v41  ;;  %v7961_v2 = vpop.f32.mrf.mxu0  ;;  %v8037_v26 = vpop.f32.mrf.mxu1 }
 0x82c   : > { %v6737_v14 = vadd.f32 %v8711_v35, %v6718_v9  ;;  %v6890_v6 = vadd.f32 %v6871_v53, %v6776_v55  ;;  %v5769_v61 = vadd.f32 %v7960_v11, %v11126_v3  ;;  %v6035_v17 = vadd.f32 %v8036_v0, %v11131_v51 }
 0x82d   : > { %v7962_v20 = vpop.f32.mrf.mxu0  ;;  %v8038_v21 = vpop.f32.mrf.mxu1 }
 0x82e   : > { %6757 = vst.msk [vmem:[%s11152_s4 + $0x18] sm:$0xff] %vm6753_vm2, %v6737_v14  ;;  %v6719_v34 = vmul.f32 %v11068_v22, %v5769_v61  ;;  %v6872_v46 = vmul.f32 %v11194_v52, %v6035_v17  ;;  %v7963_v38 = vadd.f32 %v7962_v20, %v7961_v2  ;;  %v8039_v8 = vadd.f32 %v8038_v21, %v8037_v26  ;;  %v11230_v2 = vpop.permute.xlu1 %6821  ;;  %v8714_v14 = vld [vmem:[%s8888_s1 + $0x30] sm:$0xff]  ;;  %v6780_v20 = vld [vmem:[%s11139_s24 + $0x38] sm:$0xff] }
 0x82f   : > { %6910 = vst.msk [vmem:[%s11158_s2 + $0x18] sm:$0xff] %vm6906_vm3, %v6890_v6  ;;  %v7964_v7 = vpop.f32.mrf.mxu0  ;;  %v8040_v54 = vpop.f32.mrf.mxu1 }
 0x830   : > { %v6738_v10 = vadd.f32 %v8712_v39, %v6719_v34  ;;  %v6891_v42 = vadd.f32 %v6872_v46, %v6777_v57  ;;  %v5770_v30 = vadd.f32 %v7963_v38, %v11126_v3  ;;  %v6036_v18 = vadd.f32 %v8039_v8, %v11131_v51 }
 0x831   : > { %v7965_v60 = vpop.f32.mrf.mxu0  ;;  %v8041_v22 = vpop.f32.mrf.mxu1 }
 0x832   : > { %6758 = vst.msk [vmem:[%s11152_s4 + $0x20] sm:$0xff] %vm6753_vm2, %v6738_v10  ;;  %v6720_v19 = vmul.f32 %v11070_v40, %v5770_v30  ;;  %v6873_v48 = vmul.f32 %v11206_v31, %v6036_v18  ;;  %v7966_v16 = vadd.f32 %v7965_v60, %v7964_v7  ;;  %v8042_v50 = vadd.f32 %v8041_v22, %v8040_v54  ;;  %v11242_v7 = vpop.permute.xlu0 %6825  ;;  %v8715_v10 = vld [vmem:[%s8888_s1 + $0x38] sm:$0xff]  ;;  %v6781_v60 = vld [vmem:[%s11139_s24 + $0x40] sm:$0xff] }
 0x833   : > { %6911 = vst.msk [vmem:[%s11158_s2 + $0x20] sm:$0xff] %vm6906_vm3, %v6891_v42  ;;  %v7967_v4 = vpop.f32.mrf.mxu0  ;;  %v8043_v15 = vpop.f32.mrf.mxu1 }
 0x834   : > { %v6739_v41 = vadd.f32 %v8713_v13, %v6720_v19  ;;  %v6892_v43 = vadd.f32 %v6873_v48, %v6778_v63  ;;  %v5771_v56 = vadd.f32 %v7966_v16, %v11126_v3  ;;  %v6037_v55 = vadd.f32 %v8042_v50, %v11131_v51 }
 0x835   : > { %v7968_v25 = vpop.f32.mrf.mxu0  ;;  %v8044_v40 = vpop.f32.mrf.mxu1 }
 0x836   : > { %6759 = vst.msk [vmem:[%s11152_s4 + $0x28] sm:$0xff] %vm6753_vm2, %v6739_v41  ;;  %v6721_v9 = vmul.f32 %v11080_v1, %v5771_v56  ;;  %v6874_v53 = vmul.f32 %v11218_v33, %v6037_v55  ;;  %v7969_v11 = vadd.f32 %v7968_v25, %v7967_v4  ;;  %v8045_v0 = vadd.f32 %v8044_v40, %v8043_v15  ;;  %v11254_v4 = vpop.permute.xlu1 %6829  ;;  %v8716_v41 = vld [vmem:[%s8888_s1 + $0x40] sm:$0xff]  ;;  %v6782_v25 = vld [vmem:[%s11139_s24 + $0x48] sm:$0xff] }
 0x837   : > { %6912 = vst.msk [vmem:[%s11158_s2 + $0x28] sm:$0xff] %vm6906_vm3, %v6892_v43  ;;  %v7970_v26 = vpop.f32.mrf.mxu0  ;;  %v8046_v35 = vpop.f32.mrf.mxu1 }
 0x838   : > { %v6740_v6 = vadd.f32 %v8714_v14, %v6721_v9  ;;  %v6893_v61 = vadd.f32 %v6874_v53, %v6779_v62  ;;  %v5772_v17 = vadd.f32 %v7969_v11, %v11126_v3  ;;  %v6038_v57 = vadd.f32 %v8045_v0, %v11131_v51 }
 0x839   : > { %v7971_v21 = vpop.f32.mrf.mxu0  ;;  %v8047_v1 = vpop.f32.mrf.mxu1 }
 0x83a   : > { %6760 = vst.msk [vmem:[%s11152_s4 + $0x30] sm:$0xff] %vm6753_vm2, %v6740_v6  ;;  %v6722_v34 = vmul.f32 %v11084_v47, %v5772_v17  ;;  %v6875_v46 = vmul.f32 %v11230_v2, %v6038_v57  ;;  %v7972_v38 = vadd.f32 %v7971_v21, %v7970_v26  ;;  %v8048_v8 = vadd.f32 %v8047_v1, %v8046_v35  ;;  %v11266_v26 = vpop.permute.xlu0 %6833  ;;  %v8717_v6 = vld [vmem:[%s8888_s1 + $0x48] sm:$0xff]  ;;  %v6783_v21 = vld [vmem:[%s11139_s24 + $0x50] sm:$0xff] }
 0x83b   : > { %6913 = vst.msk [vmem:[%s11158_s2 + $0x30] sm:$0xff] %vm6906_vm3, %v6893_v61  ;;  %v7973_v54 = vpop.f32.mrf.mxu0  ;;  %v8049_v39 = vpop.f32.mrf.mxu1 }
 0x83c   : > { %v6741_v42 = vadd.f32 %v8715_v10, %v6722_v34  ;;  %v6894_v30 = vadd.f32 %v6875_v46, %v6780_v20  ;;  %v5773_v18 = vadd.f32 %v7972_v38, %v11126_v3  ;;  %v6039_v63 = vadd.f32 %v8048_v8, %v11131_v51 }
 0x83d   : > { %v7974_v22 = vpop.f32.mrf.mxu0  ;;  %v8050_v47 = vpop.f32.mrf.mxu1 }
 0x83e   : > { %6761 = vst.msk [vmem:[%s11152_s4 + $0x38] sm:$0xff] %vm6753_vm2, %v6741_v42  ;;  %v6723_v19 = vmul.f32 %v11094_v45, %v5773_v18  ;;  %v6876_v48 = vmul.f32 %v11242_v7, %v6039_v63  ;;  %v7975_v16 = vadd.f32 %v7974_v22, %v7973_v54  ;;  %v8051_v50 = vadd.f32 %v8050_v47, %v8049_v39  ;;  %v11278_v54 = vpop.permute.xlu1 %6837  ;;  %v8718_v42 = vld [vmem:[%s8888_s1 + $0x50] sm:$0xff]  ;;  %v6784_v22 = vld [vmem:[%s11139_s24 + $0x58] sm:$0xff] }
 0x83f   : > { %6914 = vst.msk [vmem:[%s11158_s2 + $0x38] sm:$0xff] %vm6906_vm3, %v6894_v30  ;;  %v7976_v15 = vpop.f32.mrf.mxu0  ;;  %v8052_v13 = vpop.f32.mrf.mxu1 }
 0x840   : > { %v6742_v43 = vadd.f32 %v8716_v41, %v6723_v19  ;;  %v6895_v56 = vadd.f32 %v6876_v48, %v6781_v60  ;;  %v5774_v55 = vadd.f32 %v7975_v16, %v11126_v3  ;;  %v6040_v62 = vadd.f32 %v8051_v50, %v11131_v51 }
 0x841   : > { %v7977_v40 = vpop.f32.mrf.mxu0  ;;  %v8053_v45 = vpop.f32.mrf.mxu1 }
 0x842   : > { %6762 = vst.msk [vmem:[%s11152_s4 + $0x40] sm:$0xff] %vm6753_vm2, %v6742_v43  ;;  %v6724_v9 = vmul.f32 %v11096_v32, %v5774_v55  ;;  %v6877_v53 = vmul.f32 %v11254_v4, %v6040_v62  ;;  %v7978_v11 = vadd.f32 %v7977_v40, %v7976_v15  ;;  %v8054_v0 = vadd.f32 %v8053_v45, %v8052_v13  ;;  %v11290_v15 = vpop.permute.xlu0 %6841  ;;  %v8719_v43 = vld [vmem:[%s8888_s1 + $0x58] sm:$0xff]  ;;  %v6785_v40 = vld [vmem:[%s11139_s24 + $0x60] sm:$0xff] }
 0x843   : > { %6915 = vst.msk [vmem:[%s11158_s2 + $0x40] sm:$0xff] %vm6906_vm3, %v6895_v56  ;;  %v7979_v35 = vpop.f32.mrf.mxu0  ;;  %v8055_v14 = vpop.f32.mrf.mxu1 }
 0x844   : > { %v6743_v61 = vadd.f32 %v8717_v6, %v6724_v9  ;;  %v6896_v17 = vadd.f32 %v6877_v53, %v6782_v25  ;;  %v5775_v57 = vadd.f32 %v7978_v11, %v11126_v3  ;;  %v6041_v20 = vadd.f32 %v8054_v0, %v11131_v51 }
 0x845   : > { %v7980_v1 = vpop.f32.mrf.mxu0  ;;  %v8056_v32 = vpop.f32.mrf.mxu1 }
 0x846   : > { %6763 = vst.msk [vmem:[%s11152_s4 + $0x48] sm:$0xff] %vm6753_vm2, %v6743_v61  ;;  %v6725_v34 = vmul.f32 %v11100_v36, %v5775_v57  ;;  %v6878_v46 = vmul.f32 %v11266_v26, %v6041_v20  ;;  %v7981_v38 = vadd.f32 %v7980_v1, %v7979_v35  ;;  %v8057_v8 = vadd.f32 %v8056_v32, %v8055_v14  ;;  %v11302_v35 = vpop.permute.xlu1 %6845  ;;  %v8720_v61 = vld [vmem:[%s8888_s1 + $0x60] sm:$0xff]  ;;  %v6786_v1 = vld [vmem:[%s11139_s24 + $0x68] sm:$0xff] }
 0x847   : > { %6916 = vst.msk [vmem:[%s11158_s2 + $0x48] sm:$0xff] %vm6906_vm3, %v6896_v17  ;;  %v7982_v39 = vpop.f32.mrf.mxu0  ;;  %v8058_v10 = vpop.f32.mrf.mxu1 }
 0x848   : > { %v6744_v30 = vadd.f32 %v8718_v42, %v6725_v34  ;;  %v6897_v18 = vadd.f32 %v6878_v46, %v6783_v21  ;;  %v5776_v63 = vadd.f32 %v7981_v38, %v11126_v3  ;;  %v6042_v60 = vadd.f32 %v8057_v8, %v11131_v51 }
 0x849   : > { %v7983_v47 = vpop.f32.mrf.mxu0  ;;  %v8059_v36 = vpop.f32.mrf.mxu1 }
 0x84a   : > { %6764 = vst.msk [vmem:[%s11152_s4 + $0x50] sm:$0xff] %vm6753_vm2, %v6744_v30  ;;  %v6726_v19 = vmul.f32 %v11106_v24, %v5776_v63  ;;  %v6879_v48 = vmul.f32 %v11278_v54, %v6042_v60  ;;  %v7984_v16 = vadd.f32 %v7983_v47, %v7982_v39  ;;  %v8060_v50 = vadd.f32 %v8059_v36, %v8058_v10  ;;  %v11314_v39 = vpop.permute.xlu0 %6849  ;;  %v8721_v30 = vld [vmem:[%s8888_s1 + $0x68] sm:$0xff]  ;;  %v6787_v47 = vld [vmem:[%s11139_s24 + $0x70] sm:$0xff] }
 0x84b   : > { %6917 = vst.msk [vmem:[%s11158_s2 + $0x50] sm:$0xff] %vm6906_vm3, %v6897_v18  ;;  %v7985_v13 = vpop.f32.mrf.mxu0  ;;  %v8061_v41 = vpop.f32.mrf.mxu1 }
 0x84c   : > { %v6745_v56 = vadd.f32 %v8719_v43, %v6726_v19  ;;  %v6898_v55 = vadd.f32 %v6879_v48, %v6784_v22  ;;  %v5777_v62 = vadd.f32 %v7984_v16, %v11126_v3  ;;  %v6043_v25 = vadd.f32 %v8060_v50, %v11131_v51 }
 0x84d   : > { %v7986_v45 = vpop.f32.mrf.mxu0  ;;  %v8062_v24 = vpop.f32.mrf.mxu1 }
 0x84e   : > { %6765 = vst.msk [vmem:[%s11152_s4 + $0x58] sm:$0xff] %vm6753_vm2, %v6745_v56  ;;  %v6727_v9 = vmul.f32 %v11109_v58, %v5777_v62  ;;  %v6880_v53 = vmul.f32 %v11290_v15, %v6043_v25  ;;  %v7987_v11 = vadd.f32 %v7986_v45, %v7985_v13  ;;  %v8063_v0 = vadd.f32 %v8062_v24, %v8061_v41  ;;  %v11326_v13 = vpop.permute.xlu1 %6853  ;;  %v8722_v56 = vld [vmem:[%s8888_s1 + $0x70] sm:$0xff]  ;;  %v6788_v45 = vld [vmem:[%s11139_s24 + $0x78] sm:$0xff] }
 0x84f   : > { %6918 = vst.msk [vmem:[%s11158_s2 + $0x58] sm:$0xff] %vm6906_vm3, %v6898_v55  ;;  %v7988_v14 = vpop.f32.mrf.mxu0  ;;  %v8064_v6 = vpop.f32.mrf.mxu1 }
 0x850   : > { %v6746_v17 = vadd.f32 %v8720_v61, %v6727_v9  ;;  %v6899_v57 = vadd.f32 %v6880_v53, %v6785_v40  ;;  %v5778_v20 = vadd.f32 %v7987_v11, %v11126_v3  ;;  %v6044_v21 = vadd.f32 %v8063_v0, %v11131_v51 }
 0x851   : > { %v7989_v32 = vpop.f32.mrf.mxu0  ;;  %v8065_v58 = vpop.f32.mrf.mxu1 }
 0x852   : > { %6766 = vst.msk [vmem:[%s11152_s4 + $0x60] sm:$0xff] %vm6753_vm2, %v6746_v17  ;;  %v6728_v34 = vmul.f32 %v11111_v27, %v5778_v20  ;;  %v6881_v46 = vmul.f32 %v11302_v35, %v6044_v21  ;;  %v7990_v38 = vadd.f32 %v7989_v32, %v7988_v14  ;;  %v8066_v8 = vadd.f32 %v8065_v58, %v8064_v6  ;;  %v11338_v14 = vpop.permute.xlu0 %6857  ;;  %v8723_v17 = vld [vmem:[%s8888_s1 + $0x78] sm:$0xff]  ;;  %v6789_v32 = vld [vmem:[%s11139_s24 + $0x80] sm:$0xff] }
 0x853   : > { %6919 = vst.msk [vmem:[%s11158_s2 + $0x60] sm:$0xff] %vm6906_vm3, %v6899_v57  ;;  %v7991_v10 = vpop.f32.mrf.mxu0  ;;  %v8067_v42 = vpop.f32.mrf.mxu1 }
 0x854   : > { %v6747_v18 = vadd.f32 %v8721_v30, %v6728_v34  ;;  %v6900_v63 = vadd.f32 %v6881_v46, %v6786_v1  ;;  %v5779_v60 = vadd.f32 %v7990_v38, %v11126_v3  ;;  %v6045_v22 = vadd.f32 %v8066_v8, %v11131_v51 }
 0x855   : > { %v7992_v36 = vpop.f32.mrf.mxu0  ;;  %v8068_v27 = vpop.f32.mrf.mxu1 }
 0x856   : > { %6767 = vst.msk [vmem:[%s11152_s4 + $0x68] sm:$0xff] %vm6753_vm2, %v6747_v18  ;;  %v6729_v19 = vmul.f32 %v11113_v29, %v5779_v60  ;;  %v6882_v48 = vmul.f32 %v11314_v39, %v6045_v22  ;;  %v7993_v16 = vadd.f32 %v7992_v36, %v7991_v10  ;;  %v8069_v50 = vadd.f32 %v8068_v27, %v8067_v42  ;;  %v11350_v10 = vpop.permute.xlu1 %6861  ;;  %v8724_v18 = vld [vmem:[%s8888_s1 + $0x80] sm:$0xff]  ;;  %v6790_v36 = vld [vmem:[%s11139_s24 + $0x88] sm:$0xff] }
 0x857   : > { %6920 = vst.msk [vmem:[%s11158_s2 + $0x68] sm:$0xff] %vm6906_vm3, %v6900_v63  ;;  %v7994_v41 = vpop.f32.mrf.mxu0  ;;  %v8070_v43 = vpop.f32.mrf.mxu1 }
 0x858   : > { %v6748_v55 = vadd.f32 %v8722_v56, %v6729_v19  ;;  %v6901_v62 = vadd.f32 %v6882_v48, %v6787_v47  ;;  %v5780_v25 = vadd.f32 %v7993_v16, %v11126_v3  ;;  %v6046_v40 = vadd.f32 %v8069_v50, %v11131_v51 }
 0x859   : > { %v7995_v24 = vpop.f32.mrf.mxu0  ;;  %v8071_v29 = vpop.f32.mrf.mxu1 }
 0x85a   : > { %6768 = vst.msk [vmem:[%s11152_s4 + $0x70] sm:$0xff] %vm6753_vm2, %v6748_v55  ;;  %v6730_v9 = vmul.f32 %v11115_v12, %v5780_v25  ;;  %v6883_v53 = vmul.f32 %v11326_v13, %v6046_v40  ;;  %v7996_v11 = vadd.f32 %v7995_v24, %v7994_v41  ;;  %v8072_v0 = vadd.f32 %v8071_v29, %v8070_v43  ;;  %v11362_v41 = vpop.permute.xlu0 %6865  ;;  %v8725_v55 = vld [vmem:[%s8888_s1 + $0x88] sm:$0xff] }
 0x85b   : > { %6921 = vst.msk [vmem:[%s11158_s2 + $0x70] sm:$0xff] %vm6906_vm3, %v6901_v62  ;;  %v7997_v6 = vpop.f32.mrf.mxu0  ;;  %v8073_v61 = vpop.f32.mrf.mxu1 }
 0x85c   : > { %v6749_v57 = vadd.f32 %v8723_v17, %v6730_v9  ;;  %v6902_v20 = vadd.f32 %v6883_v53, %v6788_v45  ;;  %v5781_v21 = vadd.f32 %v7996_v11, %v11126_v3  ;;  %v6047_v1 = vadd.f32 %v8072_v0, %v11131_v51  ;;  %v8726_v0 = vld [vmem:[%s8888_s1 + $0x90] sm:$0xff] }
 0x85d   : > { %v7998_v58 = vpop.f32.mrf.mxu0  ;;  %v8074_v12 = vpop.f32.mrf.mxu1 }
 0x85e   : > { %6769 = vst.msk [vmem:[%s11152_s4 + $0x78] sm:$0xff] %vm6753_vm2, %v6749_v57  ;;  %v6731_v34 = vmul.f32 %v11117_v49, %v5781_v21  ;;  %v6884_v46 = vmul.f32 %v11338_v14, %v6047_v1  ;;  %v7999_v38 = vadd.f32 %v7998_v58, %v7997_v6  ;;  %v8075_v8 = vadd.f32 %v8074_v12, %v8073_v61 }
 0x85f   : > { %6922 = vst.msk [vmem:[%s11158_s2 + $0x78] sm:$0xff] %vm6906_vm3, %v6902_v20  ;;  %v8000_v42 = vpop.f32.mrf.mxu0  ;;  %v8076_v30 = vpop.f32.mrf.mxu1 }
 0x860   : > { %v6750_v63 = vadd.f32 %v8724_v18, %v6731_v34  ;;  %v6903_v60 = vadd.f32 %v6884_v46, %v6789_v32  ;;  %v5782_v22 = vadd.f32 %v7999_v38, %v11126_v3  ;;  %v6048_v47 = vadd.f32 %v8075_v8, %v11131_v51 }
 0x861   : > { %v8001_v27 = vpop.f32.mrf.mxu0  ;;  %v8077_v49 = vpop.f32.mrf.mxu1 }
 0x862   : > { %6770 = vst.msk [vmem:[%s11152_s4 + $0x80] sm:$0xff] %vm6753_vm2, %v6750_v63  ;;  %v6732_v19 = vmul.f32 %v11119_v5, %v5782_v22  ;;  %v6885_v48 = vmul.f32 %v11350_v10, %v6048_v47  ;;  %v8002_v16 = vadd.f32 %v8001_v27, %v8000_v42  ;;  %v8078_v50 = vadd.f32 %v8077_v49, %v8076_v30  ;;  %v6791_v5 = vld [vmem:[%s11139_s24 + $0x90] sm:$0xff]  ;;  %s11388_s24 = scalar_lea.vmem %s11641_s5, %s8882_s29  ;;  %s11447_s5 = scalar_lea.vmem %s11628_s22, %s8882_s29 }
 0x863   : > { %6923 = vst.msk [vmem:[%s11158_s2 + $0x80] sm:$0xff] %vm6906_vm3, %v6903_v60  ;;  %v8003_v43 = vpop.f32.mrf.mxu0  ;;  %v8079_v56 = vpop.f32.mrf.mxu1  ;;  %v6926_v20 = vld [vmem:[%s11388_s24] sm:$0xff]  ;;  %v6927_v46 = vld [vmem:[%s11388_s24 + $0x8] sm:$0xff]  ;;  %v6928_v60 = vld [vmem:[%s11388_s24 + $0x10] sm:$0xff] }
 0x864   : > { %v6751_v62 = vadd.f32 %v8725_v55, %v6732_v19  ;;  %v6904_v25 = vadd.f32 %v6885_v48, %v6790_v36  ;;  %v5783_v40 = vadd.f32 %v8002_v16, %v11126_v3  ;;  %v6049_v45 = vadd.f32 %v8078_v50, %v11131_v51  ;;  %v11378_v51 = vld [vmem:[%s11622_s16] ss:$0 sm:$0xff]  ;;  %v6929_v48 = vld [vmem:[%s11388_s24 + $0x18] sm:$0xff] }
 0x865   : > { %v8004_v24 = vpop.f32.mrf.mxu0  ;;  %v8080_v29 = vpop.f32.mrf.mxu1 }
 0x866   : > { %6771 = vst.msk [vmem:[%s11152_s4 + $0x88] sm:$0xff] %vm6753_vm2, %v6751_v62  ;;  %v6733_v9 = vmul.f32 %v11121_v59, %v5783_v40  ;;  %v6886_v53 = vmul.f32 %v11362_v41, %v6049_v45 }
 0x867   : > { %6924 = vst.msk [vmem:[%s11158_s2 + $0x88] sm:$0xff] %vm6906_vm3, %v6904_v25  ;;  %v8098_v11 = vpop.f32.mrf.mxu0  ;;  %v6930_v25 = vld [vmem:[%s11388_s24 + $0x20] sm:$0xff] }
 0x868   : > { %v6752_v6 = vadd.f32 %v8726_v0, %v6733_v9  ;;  %v6905_v3 = vadd.f32 %v6886_v53, %v6791_v5 }
 0x869   : > { %v8099_v61 = vpop.f32.mrf.mxu0 }
 0x86a   : > { %6772 = vst.msk [vmem:[%s11152_s4 + $0x90] sm:$0xff] %vm6753_vm2, %v6752_v6  ;;  %v8100_v59 = vadd.f32 %v8099_v61, %v8098_v11  ;;  %v6931_v11 = vld [vmem:[%s11388_s24 + $0x28] sm:$0xff] }
 0x86b   : > { %6925 = vst.msk [vmem:[%s11158_s2 + $0x90] sm:$0xff] %vm6906_vm3, %v6905_v3  ;;  %v8101_v17 = vpop.f32.mrf.mxu0  ;;  %v11424_v3 = vld [vmem:[%s11624_s18] ss:$0 sm:$0xff] }
 0x86c   : > { %v6297_v57 = vadd.f32 %v8100_v59, %v11378_v51 }
 0x86d   : > { %v8102_v21 = vpop.f32.mrf.mxu0 }
 0x86e   : > { %v6945_v1 = vmul.f32 %v11133_v28, %v6297_v57  ;;  %v8103_v32 = vadd.f32 %v8102_v21, %v8101_v17 }
 0x86f   : > { %v8104_v58 = vpop.f32.mrf.mxu0 }
 0x870   : > { %v6964_v12 = vadd.f32 %v6945_v1, %v6926_v20  ;;  %v6298_v34 = vadd.f32 %v8103_v32, %v11378_v51 }
 0x871   : > { %v8105_v38 = vpop.f32.mrf.mxu0 }
 0x872   : > { %6984 = vst.msk [vmem:[%s11397_s6] sm:$0xff] %vm6983_vm4, %v6964_v12  ;;  %v6946_v8 = vmul.f32 %v11146_v23, %v6298_v34  ;;  %v8106_v42 = vadd.f32 %v8105_v38, %v8104_v58  ;;  %v6932_v58 = vld [vmem:[%s11388_s24 + $0x30] sm:$0xff] }
 0x873   : > { %v8107_v30 = vpop.f32.mrf.mxu0  ;;  %v7009_v12 = vld [vmem:[%s11433_s28 + $0x30] sm:$0xff] }
 0x874   : > { %v6965_v18 = vadd.f32 %v6946_v8, %v6927_v46  ;;  %v6299_v63 = vadd.f32 %v8106_v42, %v11378_v51 }
 0x875   : > { %v8108_v22 = vpop.f32.mrf.mxu0 }
 0x876   : > { %6985 = vst.msk [vmem:[%s11397_s6 + $0x8] sm:$0xff] %vm6983_vm4, %v6965_v18  ;;  %v6947_v47 = vmul.f32 %v11163_v37, %v6299_v63  ;;  %v8109_v36 = vadd.f32 %v8108_v22, %v8107_v30 }
 0x877   : > { %v8110_v27 = vpop.f32.mrf.mxu0 }
 0x878   : > { %v6966_v49 = vadd.f32 %v6947_v47, %v6928_v60  ;;  %v6300_v19 = vadd.f32 %v8109_v36, %v11378_v51 }
 0x879   : > { %v8111_v16 = vpop.f32.mrf.mxu0 }
 0x87a   : > { %6986 = vst.msk [vmem:[%s11397_s6 + $0x10] sm:$0xff] %vm6983_vm4, %v6966_v49  ;;  %v6948_v50 = vmul.f32 %v11182_v44, %v6300_v19  ;;  %v8112_v43 = vadd.f32 %v8111_v16, %v8110_v27  ;;  %v6933_v27 = vld [vmem:[%s11388_s24 + $0x38] sm:$0xff] }
 0x87b   : > { %v8113_v56 = vpop.f32.mrf.mxu0 }
 0x87c   : > { %v6967_v55 = vadd.f32 %v6948_v50, %v6929_v48  ;;  %v6301_v62 = vadd.f32 %v8112_v43, %v11378_v51 }
 0x87d   : > { %v8114_v40 = vpop.f32.mrf.mxu0 }
 0x87e   : > { %6987 = vst.msk [vmem:[%s11397_s6 + $0x18] sm:$0xff] %vm6983_vm4, %v6967_v55  ;;  %v6949_v45 = vmul.f32 %v11194_v52, %v6301_v62  ;;  %v8115_v5 = vadd.f32 %v8114_v40, %v8113_v56 }
 0x87f   : > { %v8116_v24 = vpop.f32.mrf.mxu0  ;;  %v8192_v29 = vpop.f32.mrf.mxu1 }
 0x880   : > { %v6968_v9 = vadd.f32 %v6949_v45, %v6930_v25  ;;  %v6302_v53 = vadd.f32 %v8115_v5, %v11378_v51  ;;  %v6934_v5 = vld [vmem:[%s11388_s24 + $0x40] sm:$0xff] }
 0x881   : > { %v8117_v0 = vpop.f32.mrf.mxu0  ;;  %v8193_v6 = vpop.f32.mrf.mxu1 }
 0x882   : > { %6988 = vst.msk [vmem:[%s11397_s6 + $0x20] sm:$0xff] %vm6983_vm4, %v6968_v9  ;;  %v6950_v61 = vmul.f32 %v11206_v31, %v6302_v53  ;;  %v8118_v59 = vadd.f32 %v8117_v0, %v8116_v24  ;;  %v8194_v17 = vadd.f32 %v8193_v6, %v8192_v29  ;;  %v7011_v24 = vld [vmem:[%s11433_s28 + $0x40] sm:$0xff] }
 0x883   : > { %v8119_v57 = vpop.f32.mrf.mxu0  ;;  %v8195_v20 = vpop.f32.mrf.mxu1 }
 0x884   : > { %v6969_v21 = vadd.f32 %v6950_v61, %v6931_v11  ;;  %v6303_v1 = vadd.f32 %v8118_v59, %v11378_v51  ;;  %v6569_v32 = vadd.f32 %v8194_v17, %v11424_v3 }
 0x885   : > { %v8120_v34 = vpop.f32.mrf.mxu0  ;;  %v8196_v46 = vpop.f32.mrf.mxu1 }
 0x886   : > { %6989 = vst.msk [vmem:[%s11397_s6 + $0x28] sm:$0xff] %vm6983_vm4, %v6969_v21  ;;  %v6951_v38 = vmul.f32 %v11218_v33, %v6303_v1  ;;  %v7028_v8 = vmul.f32 %v11218_v33, %v6569_v32  ;;  %v8121_v42 = vadd.f32 %v8120_v34, %v8119_v57  ;;  %v8197_v30 = vadd.f32 %v8196_v46, %v8195_v20  ;;  %v7010_v33 = vld [vmem:[%s11433_s28 + $0x38] sm:$0xff]  ;;  %v6935_v21 = vld [vmem:[%s11388_s24 + $0x48] sm:$0xff] }
 0x887   : > { %v8122_v18 = vpop.f32.mrf.mxu0  ;;  %v8198_v63 = vpop.f32.mrf.mxu1  ;;  %v7012_v1 = vld [vmem:[%s11433_s28 + $0x48] sm:$0xff] }
 0x888   : > { %v6970_v60 = vadd.f32 %v6951_v38, %v6932_v58  ;;  %v7047_v22 = vadd.f32 %v7028_v8, %v7009_v12  ;;  %v6304_v47 = vadd.f32 %v8121_v42, %v11378_v51  ;;  %v6570_v36 = vadd.f32 %v8197_v30, %v11424_v3 }
 0x889   : > { %v8123_v49 = vpop.f32.mrf.mxu0  ;;  %v8199_v19 = vpop.f32.mrf.mxu1 }
 0x88a   : > { %6990 = vst.msk [vmem:[%s11397_s6 + $0x30] sm:$0xff] %vm6983_vm4, %v6970_v60  ;;  %v6952_v48 = vmul.f32 %v11230_v2, %v6304_v47  ;;  %v7029_v16 = vmul.f32 %v11230_v2, %v6570_v36  ;;  %v8124_v50 = vadd.f32 %v8123_v49, %v8122_v18  ;;  %v8200_v43 = vadd.f32 %v8199_v19, %v8198_v63  ;;  %v6936_v60 = vld [vmem:[%s11388_s24 + $0x50] sm:$0xff] }
 0x88b   : > { %7067 = vst.msk [vmem:[%s11447_s5 + $0x30] sm:$0xff] %vm7060_vm5, %v7047_v22  ;;  %v8125_v56 = vpop.f32.mrf.mxu0  ;;  %v8201_v55 = vpop.f32.mrf.mxu1  ;;  %v7013_v22 = vld [vmem:[%s11433_s28 + $0x50] sm:$0xff] }
 0x88c   : > { %v6971_v62 = vadd.f32 %v6952_v48, %v6933_v27  ;;  %v7048_v25 = vadd.f32 %v7029_v16, %v7010_v33  ;;  %v6305_v40 = vadd.f32 %v8124_v50, %v11378_v51  ;;  %v6571_v45 = vadd.f32 %v8200_v43, %v11424_v3 }
 0x88d   : > { %v8126_v29 = vpop.f32.mrf.mxu0  ;;  %v8202_v9 = vpop.f32.mrf.mxu1 }
 0x88e   : > { %6991 = vst.msk [vmem:[%s11397_s6 + $0x38] sm:$0xff] %vm6983_vm4, %v6971_v62  ;;  %v6953_v2 = vmul.f32 %v11242_v7, %v6305_v40  ;;  %v7030_v53 = vmul.f32 %v11242_v7, %v6571_v45  ;;  %v8127_v11 = vadd.f32 %v8126_v29, %v8125_v56  ;;  %v8203_v0 = vadd.f32 %v8202_v9, %v8201_v55  ;;  %v6937_v55 = vld [vmem:[%s11388_s24 + $0x58] sm:$0xff] }
 0x88f   : > { %7068 = vst.msk [vmem:[%s11447_s5 + $0x38] sm:$0xff] %vm7060_vm5, %v7048_v25  ;;  %v8128_v6 = vpop.f32.mrf.mxu0  ;;  %v8204_v61 = vpop.f32.mrf.mxu1  ;;  %v7014_v62 = vld [vmem:[%s11433_s28 + $0x58] sm:$0xff] }
 0x890   : > { %v6972_v59 = vadd.f32 %v6953_v2, %v6934_v5  ;;  %v7049_v17 = vadd.f32 %v7030_v53, %v7011_v24  ;;  %v6306_v57 = vadd.f32 %v8127_v11, %v11378_v51  ;;  %v6572_v20 = vadd.f32 %v8203_v0, %v11424_v3 }
 0x891   : > { %v8129_v32 = vpop.f32.mrf.mxu0  ;;  %v8205_v58 = vpop.f32.mrf.mxu1 }
 0x892   : > { %6992 = vst.msk [vmem:[%s11397_s6 + $0x40] sm:$0xff] %vm6983_vm4, %v6972_v59  ;;  %v6954_v7 = vmul.f32 %v11254_v4, %v6306_v57  ;;  %v7031_v12 = vmul.f32 %v11254_v4, %v6572_v20  ;;  %v8130_v34 = vadd.f32 %v8129_v32, %v8128_v6  ;;  %v8206_v46 = vadd.f32 %v8205_v58, %v8204_v61  ;;  %v6938_v6 = vld [vmem:[%s11388_s24 + $0x60] sm:$0xff] }
 0x893   : > { %7069 = vst.msk [vmem:[%s11447_s5 + $0x40] sm:$0xff] %vm7060_vm5, %v7049_v17  ;;  %v8131_v38 = vpop.f32.mrf.mxu0  ;;  %v8207_v8 = vpop.f32.mrf.mxu1  ;;  %v7015_v61 = vld [vmem:[%s11433_s28 + $0x60] sm:$0xff] }
 0x894   : > { %v6973_v42 = vadd.f32 %v6954_v7, %v6935_v21  ;;  %v7050_v30 = vadd.f32 %v7031_v12, %v7012_v1  ;;  %v6307_v18 = vadd.f32 %v8130_v34, %v11378_v51  ;;  %v6573_v63 = vadd.f32 %v8206_v46, %v11424_v3  ;;  %v6939_v46 = vld [vmem:[%s11388_s24 + $0x68] sm:$0xff] }
 0x895   : > { %v8132_v47 = vpop.f32.mrf.mxu0  ;;  %v8208_v36 = vpop.f32.mrf.mxu1 }
 0x896   : > { %6993 = vst.msk [vmem:[%s11397_s6 + $0x48] sm:$0xff] %vm6983_vm4, %v6973_v42  ;;  %v6955_v4 = vmul.f32 %v11266_v26, %v6307_v18  ;;  %v7032_v27 = vmul.f32 %v11266_v26, %v6573_v63  ;;  %v8133_v33 = vadd.f32 %v8132_v47, %v8131_v38  ;;  %v8209_v49 = vadd.f32 %v8208_v36, %v8207_v8  ;;  %v7016_v38 = vld [vmem:[%s11433_s28 + $0x68] sm:$0xff] }
 0x897   : > { %7070 = vst.msk [vmem:[%s11447_s5 + $0x48] sm:$0xff] %vm7060_vm5, %v7050_v30  ;;  %v8134_v19 = vpop.f32.mrf.mxu0  ;;  %v8210_v48 = vpop.f32.mrf.mxu1 }
 0x898   : > { %v6974_v16 = vadd.f32 %v6955_v4, %v6936_v60  ;;  %v7051_v50 = vadd.f32 %v7032_v27, %v7013_v22  ;;  %v6308_v43 = vadd.f32 %v8133_v33, %v11378_v51  ;;  %v6574_v56 = vadd.f32 %v8209_v49, %v11424_v3  ;;  %v6940_v33 = vld [vmem:[%s11388_s24 + $0x70] sm:$0xff] }
 0x899   : > { %v8135_v25 = vpop.f32.mrf.mxu0  ;;  %v8211_v40 = vpop.f32.mrf.mxu1  ;;  %v7017_v49 = vld [vmem:[%s11433_s28 + $0x70] sm:$0xff] }
 0x89a   : > { %6994 = vst.msk [vmem:[%s11397_s6 + $0x50] sm:$0xff] %vm6983_vm4, %v6974_v16  ;;  %v6956_v26 = vmul.f32 %v11278_v54, %v6308_v43  ;;  %v7033_v45 = vmul.f32 %v11278_v54, %v6574_v56  ;;  %v8136_v5 = vadd.f32 %v8135_v25, %v8134_v19  ;;  %v8212_v24 = vadd.f32 %v8211_v40, %v8210_v48 }
 0x89b   : > { %7071 = vst.msk [vmem:[%s11447_s5 + $0x50] sm:$0xff] %vm7060_vm5, %v7051_v50  ;;  %v8137_v29 = vpop.f32.mrf.mxu0  ;;  %v8213_v9 = vpop.f32.mrf.mxu1 }
 0x89c   : > { %v6975_v2 = vadd.f32 %v6956_v26, %v6937_v55  ;;  %v7052_v53 = vadd.f32 %v7033_v45, %v7014_v62  ;;  %v6309_v11 = vadd.f32 %v8136_v5, %v11378_v51  ;;  %v6575_v0 = vadd.f32 %v8212_v24, %v11424_v3  ;;  %v6941_v45 = vld [vmem:[%s11388_s24 + $0x78] sm:$0xff] }
 0x89d   : > { %v8138_v59 = vpop.f32.mrf.mxu0  ;;  %v8214_v17 = vpop.f32.mrf.mxu1  ;;  %v7018_v5 = vld [vmem:[%s11433_s28 + $0x78] sm:$0xff] }
 0x89e   : > { %6995 = vst.msk [vmem:[%s11397_s6 + $0x58] sm:$0xff] %vm6983_vm4, %v6975_v2  ;;  %v6957_v54 = vmul.f32 %v11290_v15, %v6309_v11  ;;  %v7034_v57 = vmul.f32 %v11290_v15, %v6575_v0  ;;  %v8139_v20 = vadd.f32 %v8138_v59, %v8137_v29  ;;  %v8215_v21 = vadd.f32 %v8214_v17, %v8213_v9 }
 0x89f   : > { %7072 = vst.msk [vmem:[%s11447_s5 + $0x58] sm:$0xff] %vm7060_vm5, %v7052_v53  ;;  %v8140_v1 = vpop.f32.mrf.mxu0  ;;  %v8216_v32 = vpop.f32.mrf.mxu1 }
 0x8a0   : > { %v6976_v58 = vadd.f32 %v6957_v54, %v6938_v6  ;;  %v7053_v7 = vadd.f32 %v7034_v57, %v7015_v61  ;;  %v6310_v12 = vadd.f32 %v8139_v20, %v11378_v51  ;;  %v6576_v34 = vadd.f32 %v8215_v21, %v11424_v3  ;;  %v6942_v54 = vld [vmem:[%s11388_s24 + $0x80] sm:$0xff] }
 0x8a1   : > { %v8141_v8 = vpop.f32.mrf.mxu0  ;;  %v8217_v42 = vpop.f32.mrf.mxu1  ;;  %v7019_v57 = vld [vmem:[%s11433_s28 + $0x80] sm:$0xff] }
 0x8a2   : > { %6996 = vst.msk [vmem:[%s11397_s6 + $0x60] sm:$0xff] %vm6983_vm4, %v6976_v58  ;;  %v6958_v15 = vmul.f32 %v11302_v35, %v6310_v12  ;;  %v7035_v30 = vmul.f32 %v11302_v35, %v6576_v34  ;;  %v8142_v18 = vadd.f32 %v8141_v8, %v8140_v1  ;;  %v8218_v63 = vadd.f32 %v8217_v42, %v8216_v32  ;;  %v6943_v42 = vld [vmem:[%s11388_s24 + $0x88] sm:$0xff] }
 0x8a3   : > { %7073 = vst.msk [vmem:[%s11447_s5 + $0x60] sm:$0xff] %vm7060_vm5, %v7053_v7  ;;  %v8143_v60 = vpop.f32.mrf.mxu0  ;;  %v8219_v22 = vpop.f32.mrf.mxu1 }
 0x8a4   : > { %v6977_v47 = vadd.f32 %v6958_v15, %v6939_v46  ;;  %v7054_v36 = vadd.f32 %v7035_v30, %v7016_v38  ;;  %v6311_v4 = vadd.f32 %v8142_v18, %v11378_v51  ;;  %v6577_v27 = vadd.f32 %v8218_v63, %v11424_v3  ;;  %v7020_v15 = vld [vmem:[%s11433_s28 + $0x88] sm:$0xff] }
 0x8a5   : > { %v8144_v19 = vpop.f32.mrf.mxu0  ;;  %v8220_v48 = vpop.f32.mrf.mxu1 }
 0x8a6   : > { %6997 = vst.msk [vmem:[%s11397_s6 + $0x68] sm:$0xff] %vm6983_vm4, %v6977_v47  ;;  %v6959_v35 = vmul.f32 %v11314_v39, %v6311_v4  ;;  %v7036_v16 = vmul.f32 %v11314_v39, %v6577_v27  ;;  %v8145_v50 = vadd.f32 %v8144_v19, %v8143_v60  ;;  %v8221_v43 = vadd.f32 %v8220_v48, %v8219_v22  ;;  %v6944_v19 = vld [vmem:[%s11388_s24 + $0x90] sm:$0xff] }
 0x8a7   : > { %7074 = vst.msk [vmem:[%s11447_s5 + $0x68] sm:$0xff] %vm7060_vm5, %v7054_v36  ;;  %v8146_v56 = vpop.f32.mrf.mxu0  ;;  %v8222_v55 = vpop.f32.mrf.mxu1  ;;  %v7021_v48 = vld [vmem:[%s11433_s28 + $0x90] sm:$0xff] }
 0x8a8   : > { %v6978_v62 = vadd.f32 %v6959_v35, %v6940_v33  ;;  %v7055_v25 = vadd.f32 %v7036_v16, %v7017_v49  ;;  %v6312_v40 = vadd.f32 %v8145_v50, %v11378_v51  ;;  %v6578_v26 = vadd.f32 %v8221_v43, %v11424_v3 }
 0x8a9   : > { %v8147_v24 = vpop.f32.mrf.mxu0  ;;  %v8223_v29 = vpop.f32.mrf.mxu1 }
 0x8aa   : > { %6998 = vst.msk [vmem:[%s11397_s6 + $0x70] sm:$0xff] %vm6983_vm4, %v6978_v62  ;;  %v6960_v39 = vmul.f32 %v11326_v13, %v6312_v40  ;;  %v7037_v9 = vmul.f32 %v11326_v13, %v6578_v26  ;;  %v8148_v2 = vadd.f32 %v8147_v24, %v8146_v56  ;;  %v8224_v53 = vadd.f32 %v8223_v29, %v8222_v55  ;;  %v7003_v26 = vld [vmem:[%s11433_s28] sm:$0xff] }
 0x8ab   : > { %7075 = vst.msk [vmem:[%s11447_s5 + $0x70] sm:$0xff] %vm7060_vm5, %v7055_v25  ;;  %v8149_v11 = vpop.f32.mrf.mxu0  ;;  %v8225_v0 = vpop.f32.mrf.mxu1 }
 0x8ac   : > { %v6979_v6 = vadd.f32 %v6960_v39, %v6941_v45  ;;  %v7056_v61 = vadd.f32 %v7037_v9, %v7018_v5  ;;  %v6313_v59 = vadd.f32 %v8148_v2, %v11378_v51  ;;  %v6579_v17 = vadd.f32 %v8224_v53, %v11424_v3  ;;  %v7004_v9 = vld [vmem:[%s11433_s28 + $0x8] sm:$0xff] }
 0x8ad   : > { %v8150_v20 = vpop.f32.mrf.mxu0  ;;  %v8226_v21 = vpop.f32.mrf.mxu1 }
 0x8ae   : > { %6999 = vst.msk [vmem:[%s11397_s6 + $0x78] sm:$0xff] %vm6983_vm4, %v6979_v6  ;;  %v6961_v13 = vmul.f32 %v11338_v14, %v6313_v59  ;;  %v7038_v1 = vmul.f32 %v11338_v14, %v6579_v17  ;;  %v8151_v32 = vadd.f32 %v8150_v20, %v8149_v11  ;;  %v8227_v58 = vadd.f32 %v8226_v21, %v8225_v0  ;;  %v7005_v59 = vld [vmem:[%s11433_s28 + $0x10] sm:$0xff] }
 0x8af   : > { %7076 = vst.msk [vmem:[%s11447_s5 + $0x78] sm:$0xff] %vm7060_vm5, %v7056_v61  ;;  %v8152_v7 = vpop.f32.mrf.mxu0  ;;  %v8228_v12 = vpop.f32.mrf.mxu1 }
 0x8b0   : > { %v6980_v34 = vadd.f32 %v6961_v13, %v6942_v54  ;;  %v7057_v46 = vadd.f32 %v7038_v1, %v7019_v57  ;;  %v6314_v38 = vadd.f32 %v8151_v32, %v11378_v51  ;;  %v6580_v8 = vadd.f32 %v8227_v58, %v11424_v3 }
 0x8b1   : > { %v8153_v30 = vpop.f32.mrf.mxu0  ;;  %v8229_v18 = vpop.f32.mrf.mxu1 }
 0x8b2   : > { %7000 = vst.msk [vmem:[%s11397_s6 + $0x80] sm:$0xff] %vm6983_vm4, %v6980_v34  ;;  %v6962_v14 = vmul.f32 %v11350_v10, %v6314_v38  ;;  %v7039_v63 = vmul.f32 %v11350_v10, %v6580_v8  ;;  %v8154_v60 = vadd.f32 %v8153_v30, %v8152_v7  ;;  %v8230_v22 = vadd.f32 %v8229_v18, %v8228_v12 }
 0x8b3   : > { %7077 = vst.msk [vmem:[%s11447_s5 + $0x80] sm:$0xff] %vm7060_vm5, %v7057_v46  ;;  %v8155_v47 = vpop.f32.mrf.mxu0  ;;  %v8231_v36 = vpop.f32.mrf.mxu1 }
 0x8b4   : > { %v6981_v4 = vadd.f32 %v6962_v14, %v6943_v42  ;;  %v7058_v27 = vadd.f32 %v7039_v63, %v7020_v15  ;;  %v6315_v33 = vadd.f32 %v8154_v60, %v11378_v51  ;;  %v6581_v49 = vadd.f32 %v8230_v22, %v11424_v3  ;;  %v7008_v15 = vld [vmem:[%s11433_s28 + $0x28] sm:$0xff] }
 0x8b5   : > { %v8156_v35 = vpop.f32.mrf.mxu0  ;;  %v8232_v16 = vpop.f32.mrf.mxu1 }
 0x8b6   : > { %7001 = vst.msk [vmem:[%s11397_s6 + $0x88] sm:$0xff] %vm6983_vm4, %v6981_v4  ;;  %v6963_v10 = vmul.f32 %v11362_v41, %v6315_v33  ;;  %v7040_v50 = vmul.f32 %v11362_v41, %v6581_v49 }
 0x8b7   : > { %7078 = vst.msk [vmem:[%s11447_s5 + $0x88] sm:$0xff] %vm7060_vm5, %v7058_v27  ;;  %v8174_v43 = vpop.f32.mrf.mxu0 }
 0x8b8   : > { %v6982_v56 = vadd.f32 %v6963_v10, %v6944_v19  ;;  %v7059_v55 = vadd.f32 %v7040_v50, %v7021_v48 }
 0x8b9   : > { %v8175_v51 = vpop.f32.mrf.mxu0 }
 0x8ba   : > { %7002 = vst.msk [vmem:[%s11397_s6 + $0x90] sm:$0xff] %vm6983_vm4, %v6982_v56  ;;  %v8176_v62 = vadd.f32 %v8175_v51, %v8174_v43 }
 0x8bb   : > { %7079 = vst.msk [vmem:[%s11447_s5 + $0x90] sm:$0xff] %vm7060_vm5, %v7059_v55  ;;  %v8177_v25 = vpop.f32.mrf.mxu0 }
 0x8bc   : > { %v6563_v40 = vadd.f32 %v8176_v62, %v11424_v3 }
 0x8bd   : > { %v8178_v45 = vpop.f32.mrf.mxu0 }
 0x8be   : > { %v7022_v41 = vmul.f32 %v11133_v28, %v6563_v40  ;;  %v8179_v5 = vadd.f32 %v8178_v45, %v8177_v25 }
 0x8bf   : > { %v8180_v24 = vpop.f32.mrf.mxu0 }
 0x8c0   : > { %v7041_v29 = vadd.f32 %v7022_v41, %v7003_v26  ;;  %v6564_v39 = vadd.f32 %v8179_v5, %v11424_v3 }
 0x8c1   : > { %v8181_v2 = vpop.f32.mrf.mxu0 }
 0x8c2   : > { %7061 = vst.msk [vmem:[%s11447_s5] sm:$0xff] %vm7060_vm5, %v7041_v29  ;;  %v7023_v53 = vmul.f32 %v11146_v23, %v6564_v39  ;;  %v8182_v11 = vadd.f32 %v8181_v2, %v8180_v24  ;;  %v7006_v23 = vld [vmem:[%s11433_s28 + $0x18] sm:$0xff] }
 0x8c3   : > { %v8183_v0 = vpop.f32.mrf.mxu0 }
 0x8c4   : > { %v7042_v6 = vadd.f32 %v7023_v53, %v7004_v9  ;;  %v6565_v61 = vadd.f32 %v8182_v11, %v11424_v3 }
 0x8c5   : > { %v8184_v28 = vpop.f32.mrf.mxu0 }
 0x8c6   : > { %7062 = vst.msk [vmem:[%s11447_s5 + $0x8] sm:$0xff] %vm7060_vm5, %v7042_v6  ;;  %v7024_v17 = vmul.f32 %v11163_v37, %v6565_v61  ;;  %v8185_v54 = vadd.f32 %v8184_v28, %v8183_v0  ;;  %v7007_v37 = vld [vmem:[%s11433_s28 + $0x20] sm:$0xff] }
 0x8c7   : > { %v8186_v57 = vpop.f32.mrf.mxu0 }
 0x8c8   : > { %v7043_v20 = vadd.f32 %v7024_v17, %v7005_v59  ;;  %v6566_v21 = vadd.f32 %v8185_v54, %v11424_v3 }
 0x8c9   : > { %v8187_v13 = vpop.f32.mrf.mxu0 }
 0x8ca   : > { %7063 = vst.msk [vmem:[%s11447_s5 + $0x10] sm:$0xff] %vm7060_vm5, %v7043_v20  ;;  %v7025_v1 = vmul.f32 %v11182_v44, %v6566_v21  ;;  %v8188_v32 = vadd.f32 %v8187_v13, %v8186_v57 }
 0x8cb   : > { %v8189_v58 = vpop.f32.mrf.mxu0 }
 0x8cc   : > { %v7044_v7 = vadd.f32 %v7025_v1, %v7006_v23  ;;  %v6567_v12 = vadd.f32 %v8188_v32, %v11424_v3 }
 0x8cd   : > { %v8190_v34 = vpop.f32.mrf.mxu0 }
 0x8ce   : > { %7064 = vst.msk [vmem:[%s11447_s5 + $0x18] sm:$0xff] %vm7060_vm5, %v7044_v7  ;;  %v7026_v46 = vmul.f32 %v11194_v52, %v6567_v12  ;;  %v8191_v38 = vadd.f32 %v8190_v34, %v8189_v58 }
 0x8d0   : > { %v7045_v8 = vadd.f32 %v7026_v46, %v7007_v37  ;;  %v6568_v42 = vadd.f32 %v8191_v38, %v11424_v3 }
 0x8d2   : > { %7065 = vst.msk [vmem:[%s11447_s5 + $0x20] sm:$0xff] %vm7060_vm5, %v7045_v8  ;;  %v7027_v44 = vmul.f32 %v11206_v31, %v6568_v42 }
 0x8d4   : > { %v7046_v30 = vadd.f32 %v7027_v44, %v7008_v15 }
 0x8d6   : > { %7066 = vst.msk [vmem:[%s11447_s5 + $0x28] sm:$0xff] %vm7060_vm5, %v7046_v30 }
 0x8d7 PF: > { %s33_s3 = sadd.s32 1, %s8733_s3  }
 0x8d8   : > { %p30_p4 = scmp.ge.s32.totalorder %s33_s3, 4  }
 0x8da   :  { %32 = sbr.rel (!%p30_p4) target bundleno = 8 (0x8), region = 180 }

</bundles_post_ra>
